<compile_context>
chip_gen: v7x
topology: tpu7x:2x2x1
jax: 0.10.0
libtpu: 0.0.40
codegen_flags: <defaults>
</compile_context>

<pallas_src>
import functools
import math

import jax
import jax.numpy as jnp
from jax.experimental import pallas as pl
from jax.experimental.pallas import tpu as pltpu

EPS = 1e-8           # clamp_min used throughout the torch code
ACOSH_EPS = 1e-7     # arcosh domain clamp


def _round_up(a, b):
    return -(-a // b) * b


# ----------------------------------------------------------------------------------
# Small shared helpers (wrapper / reference side, plain JAX)
# ----------------------------------------------------------------------------------
def _l_inner(u, v):
    """Lorentz inner product <u,v>_L = -u0*v0 + sum_{i>0} ui*vi (keepdims, last axis)."""
    uv = u * v
    return jnp.sum(uv[..., 1:], axis=-1, keepdims=True) - uv[..., 0:1]


def _arcosh(z):
    z = jnp.maximum(z, 1.0 + ACOSH_EPS)
    return jnp.log(z + jnp.sqrt(z * z - 1.0))


def _expmap0(v):
    """Lorentz exp map at the origin (k=1); v is a tangent vector (time comp ~ 0)."""
    n = jnp.sqrt(jnp.maximum(_l_inner(v, v), EPS))
    time = jnp.cosh(n) + jnp.sinh(n) * v[..., 0:1] / n
    space = jnp.sinh(n) * v[..., 1:] / n
    return jnp.concatenate([time, space], axis=-1)


# ----------------------------------------------------------------------------------
# Pallas kernel (transposed / lane-dense layout, per-neighbour streaming)
# ----------------------------------------------------------------------------------
def _kp_kernel(x_ref, xnei_ref, mask_ref, w_ref, scale_ref, o_ref, *,
               nei_num, tile_n, d_in, d_out, kernel_k, pad_f):
    T = tile_n
    band = d_out                         # per-head band: [zero pad row, OD-1 space rows]
    x2 = x_ref[...]                      # (D, T)  base points of this tile
    W = w_ref[...]                       # (rows_pad, pad_f) fused weights
    scales = scale_ref[...]              # (8, 1)  per-head scale, rows >= K are 0

    # ---- constants hoisted out of the neighbour loop ----
    tail = (jax.lax.broadcasted_iota(jnp.int32, (pad_f - d_in, T), 0) == 0
            ).astype(jnp.float32)                                  # [ones row ; zeros]
    row8 = jax.lax.broadcasted_iota(jnp.int32, (8, T), 0)
    head_valid = (row8 < kernel_k).astype(jnp.float32)             # zero padded head rows
    sel_r = jax.lax.broadcasted_iota(jnp.int32, (8, kernel_k * band), 0)
    sel_c = jax.lax.broadcasted_iota(jnp.int32, (8, kernel_k * band), 1)
    sel = ((sel_c >= sel_r * band) & (sel_c < (sel_r + 1) * band)
           ).astype(jnp.float32)                                   # (8, K*band) group-sum matrix
    is_time_d = jax.lax.broadcasted_iota(jnp.int32, (d_in, T), 0) == 0
    is_time_o = jax.lax.broadcasted_iota(jnp.int32, (d_out, T), 0) == 0
    x2_t = x2[0:1, :]
    inv_onepx = pl.reciprocal(1.0 + x2_t, approx=True)             # reused for every neighbour

    acc = jnp.zeros((d_out, T), jnp.float32)
    for j in range(nei_num):             # static unroll; every slice is (8,128)-aligned
        xn = xnei_ref[:, j * T:(j + 1) * T]                        # (D, T) gathered neighbours
        msk = mask_ref[j:j + 1, :]                                 # (1, T)

        # ---- transport_x: logmap at x, parallel transport x -> origin, expmap0 ----
        prod = x2 * xn
        ip = jnp.sum(prod, axis=0, keepdims=True) - 2.0 * prod[0:1, :]      # <x, xn>_L
        z = jnp.maximum(-ip, 1.0 + ACOSH_EPS)
        d_xy = jnp.log(z + jnp.sqrt(z * z - 1.0))                           # arcosh
        nomin = xn + ip * x2
        nsq = (jnp.sum(nomin * nomin, axis=0, keepdims=True)
               - 2.0 * nomin[0:1, :] * nomin[0:1, :])                       # <nomin,nomin>_L
        u = (d_xy * jax.lax.rsqrt(jnp.maximum(nsq, EPS))) * nomin           # logmap_x(xn)
        coeff = u[0:1, :] * inv_onepx
        w = u - coeff * x2               # rows >=1 are the transported space comps; row 0 unused
        vsq = jnp.sum(w * w, axis=0, keepdims=True) - w[0:1, :] * w[0:1, :]
        inv_nrm = jax.lax.rsqrt(jnp.maximum(vsq, EPS))
        nrm = vsq * inv_nrm
        e = jnp.exp(nrm)
        inv_e = pl.reciprocal(e, approx=True)
        sinh_n = 0.5 * (e - inv_e)
        cosh_n = 0.5 * (e + inv_e)
        x0n = jnp.where(is_time_d, cosh_n, (sinh_n * inv_nrm) * w)          # expmap0(v), (D,T)

        # ---- fused MXU matmul: K LorentzLinear heads (+bias) + K kernel-point products ----
        fused = jnp.dot(W, jnp.concatenate([x0n, tail], axis=0),
                        preferred_element_type=jnp.float32)                 # (rows_pad, T)
        time_raw = fused[0:8, :]                                            # K time rows + pad
        space = fused[8:8 + kernel_k * band, :]                             # K bands of OD rows
        kp_raw = fused[8 + kernel_k * band:16 + kernel_k * band, :]         # K kp rows + pad

        # ---- batched head math on (8, T) slabs ----
        t = jax.nn.sigmoid(time_raw) * scales + (1.0 + 0.0001)              # (8, T)
        zk = jnp.maximum(-kp_raw, 1.0 + ACOSH_EPS)
        wgt = jnp.log(zk + jnp.sqrt(zk * zk - 1.0)) * (msk * head_valid)    # masked distances
        ssq = jnp.dot(sel, space * space,
                      preferred_element_type=jnp.float32)                   # per-head |space|^2
        sqrt_sf = jnp.sqrt((t * t - 1.0)
                           * pl.reciprocal(jnp.maximum(ssq, EPS), approx=True))
        cs = wgt * sqrt_sf                                                  # space coefficients

        # ---- distance-weighted Lorentz midpoint over the K heads ----
        ave_time = jnp.sum(wgt * t, axis=0, keepdims=True)                  # (1, T)
        ave_band = cs[0:1, :] * space[0:band, :]                            # band row 0 is 0
        for k in range(1, kernel_k):
            ave_band = ave_band + cs[k:k + 1, :] * space[k * band:(k + 1) * band, :]
        ave = jnp.where(is_time_o, ave_time, ave_band)                      # (OD, T)
        a_in = (jnp.sum(ave * ave, axis=0, keepdims=True)
                - 2.0 * ave[0:1, :] * ave[0:1, :])
        acc = acc + ave * jax.lax.rsqrt(jnp.maximum(jnp.abs(a_in), EPS))    # += mid1_j

    # ---- unweighted Lorentz midpoint over neighbours (nei_agg == 0) ----
    a2 = (jnp.sum(acc * acc, axis=0, keepdims=True)
          - 2.0 * acc[0:1, :] * acc[0:1, :])
    o_ref[...] = (acc * jax.lax.rsqrt(jnp.maximum(jnp.abs(a2), EPS))).astype(o_ref.dtype)


def kp_graph_convolution(inputs, params, *, tile_n=256):
    """Forward of KPGraphConvolution: returns (h, nei, nei_mask)."""
    x, nei, nei_mask = inputs
    N, D = x.shape
    NEI = nei.shape[1]
    K, _, OD = params["W"].shape
    assert tile_n % 128 == 0, "tile_n must be a multiple of 128 (lane alignment)"
    assert D % 8 == 0 and OD % 8 == 0, "feature dims must be sublane (8) aligned"
    assert K <= 8, "kernel_size must fit one sublane block"

    n_pad = _round_up(N, tile_n)
    pad_rows = n_pad - N
    xp = jnp.pad(x, ((0, pad_rows), (0, 0))) if pad_rows else x          # padded nodes masked 0
    neip = jnp.pad(nei, ((0, pad_rows), (0, 0))) if pad_rows else nei
    maskp = jnp.pad(nei_mask, ((0, pad_rows), (0, 0))) if pad_rows else nei_mask
    grid_n = n_pad // tile_n

    # Neighbour gather directly in the transposed, per-tile neighbour-major layout.
    # TODO(synk): an in-kernel scalar-prefetch / DMA gather would remove this XLA gather pass.
    x_t = xp.T.astype(jnp.float32)                                       # (D, n_pad)
    flat_idx = (neip.reshape(grid_n, tile_n, NEI)
                .transpose(0, 2, 1).reshape(-1))                         # (n_pad*NEI,)
    xnei_t = jnp.take(x_t, flat_idx, axis=1)                             # (D, n_pad*NEI)
    mask_t = maskp.T.astype(jnp.float32)                                 # (NEI, n_pad) sublane-dense

    # Fused RHS rows: [K time rows|pad to 8][K aligned bands: (0, OD-1 space rows)]
    #                 [K metric-flipped kernel-point rows|pad to 8]; bias folded into col D.
    kp_m = _expmap0(params["kernel_points"])                             # (K, D) on manifold
    kp_flip = jnp.concatenate([-kp_m[:, 0:1], kp_m[:, 1:]], axis=1)      # (K, D)
    Wk, bk = params["W"], params["b"]
    pad_f = _round_up(D + 1, 8)
    band = OD
    rows_pad = 8 + K * band + 8
    fused_w = jnp.zeros((rows_pad, pad_f), jnp.float32)
    fused_w = fused_w.at[0:K, 0:D].set(Wk[:, :, 0])
    fused_w = fused_w.at[0:K, D].set(bk[:, 0])
    space_rows = jnp.concatenate(
        [Wk[:, :, 1:].transpose(0, 2, 1), bk[:, 1:, None]], axis=2)      # (K, OD-1, D+1)
    for k in range(K):
        fused_w = fused_w.at[8 + k * band + 1:8 + (k + 1) * band, 0:D + 1].set(space_rows[k])
    fused_w = fused_w.at[8 + K * band:8 + K * band + K, 0:D].set(kp_flip)
    scales8 = jnp.zeros((8, 1), jnp.float32).at[0:K, 0].set(params["scales"])

    kernel = functools.partial(_kp_kernel, nei_num=NEI, tile_n=tile_n, d_in=D,
                               d_out=OD, kernel_k=K, pad_f=pad_f)
    out_t = pl.pallas_call(
        kernel,
        out_shape=jax.ShapeDtypeStruct((OD, n_pad), jnp.float32),
        grid=(grid_n,),
        in_specs=[
            pl.BlockSpec((D, tile_n), lambda i: (0, i)),
            pl.BlockSpec((D, NEI * tile_n), lambda i: (0, i)),
            pl.BlockSpec((NEI, tile_n), lambda i: (0, i)),
            pl.BlockSpec((rows_pad, pad_f), lambda i: (0, 0)),
            pl.BlockSpec((8, 1), lambda i: (0, 0)),
        ],
        out_specs=pl.BlockSpec((OD, tile_n), lambda i: (0, i)),
        compiler_params=pltpu.CompilerParams(
            dimension_semantics=("parallel",),
            vmem_limit_bytes=32 * 1024 * 1024),
    )(x_t, xnei_t, mask_t, fused_w, scales8)

    h = out_t.T[:N]                                                      # back to (N, OD)
    return h, nei, nei_mask


# ----------------------------------------------------------------------------------
# Pure-JAX reference (same math, row-major, no Pallas) for verification
# ----------------------------------------------------------------------------------
def kp_graph_convolution_reference(inputs, params):
    x, nei, nei_mask = inputs
    K, _, OD = params["W"].shape
    hi = jax.lax.Precision.HIGHEST

    xn = jnp.take(x, nei, axis=0)                        # (N, NEI, D)
    xb = x[:, None, :]
    m = nei_mask.astype(jnp.float32)[:, :, None]

    ip = _l_inner(xb, xn)
    d_xy = _arcosh(-ip)
    nomin = xn + ip * xb
    u = d_xy * nomin / jnp.sqrt(jnp.maximum(_l_inner(nomin, nomin), EPS))
    coeff = u[..., 0:1] / (1.0 + xb[..., 0:1])
    v_space = u[..., 1:] - coeff * xb[..., 1:]           # transported time comp is 0
    vsq = jnp.sum(v_space * v_space, axis=-1, keepdims=True)
    n_ = jnp.sqrt(jnp.maximum(vsq, EPS))
    x0n = jnp.concatenate([jnp.cosh(n_), jnp.sinh(n_) * v_space / n_], axis=-1)

    kp_m = _expmap0(params["kernel_points"])             # (K, D)
    kp_flip = jnp.concatenate([-kp_m[:, 0:1], kp_m[:, 1:]], axis=1)
    ipk = jnp.einsum('bnd,kd->bnk', x0n, kp_flip, precision=hi)
    wgt = _arcosh(-ipk) * m                              # (N, NEI, K) masked distances

    ave = jnp.zeros(x0n.shape[:2] + (OD,), jnp.float32)
    for k in range(K):
        y = jnp.einsum('bnd,do->bno', x0n, params["W"][k], precision=hi) + params["b"][k]
        t = jax.nn.sigmoid(y[..., 0:1]) * params["scales"][k] + 1.0 + 0.0001
        sp = y[..., 1:]
        sf = (t * t - 1.0) / jnp.maximum(jnp.sum(sp * sp, axis=-1, keepdims=True), EPS)
        tk = jnp.concatenate([t, sp * jnp.sqrt(sf)], axis=-1)
        ave = ave + wgt[..., k:k + 1] * tk
    mid1 = ave / jnp.sqrt(jnp.maximum(jnp.abs(_l_inner(ave, ave)), EPS))
    acc = jnp.sum(mid1, axis=1)                          # nei_agg == 0 midpoint (sum form)
    return acc / jnp.sqrt(jnp.maximum(jnp.abs(_l_inner(acc, acc)), EPS))


# ----------------------------------------------------------------------------------
# Deterministic parameter init (mirrors the module __init__ shapes)
# ----------------------------------------------------------------------------------
def init_params(key, K, D, OD, kp_extent):
    kw, kk = jax.random.split(key)
    stdv = 1.0 / math.sqrt(OD)
    # K LorentzLinear layers: weight (in->out) uniform(-stdv, stdv), input column 0 zeroed,
    # bias zero, scale = log(10) -> exp(scale) = 10 (stored pre-exponentiated).
    W = jax.random.uniform(kw, (K, D, OD), jnp.float32, -stdv, stdv)
    W = W.at[:, 0, :].set(0.0)
    b = jnp.zeros((K, OD), jnp.float32)
    scales = jnp.full((K,), 10.0, jnp.float32)
    # TODO(synk): load_kernels' repulsion-optimised kernel-point disposition is not
    # reproduced; deterministic random tangent points of norm KP_extent are used
    # (first point = center), matching the (K, D) tangent-space parameter shape.
    sp = jax.random.normal(kk, (K - 1, D - 1), jnp.float32)
    sp = sp / jnp.linalg.norm(sp, axis=-1, keepdims=True) * kp_extent
    space = jnp.concatenate([jnp.zeros((1, D - 1), jnp.float32), sp], axis=0)
    kp_t = jnp.concatenate([jnp.zeros((K, 1), jnp.float32), space], axis=1)  # (K, D)
    return dict(W=W, b=b, scales=scales, kernel_points=kp_t)


if __name__ == "__main__":
    N, NEI = 512, 8           # nodes, neighbours per node
    D, OD, K = 8, 16, 4       # in_features, out_features, kernel_size
    KP_EXTENT = 0.66

    key = jax.random.PRNGKey(0)
    kx, kn, km, kp = jax.random.split(key, 4)

    # points on the Lorentz hyperboloid (k=1): x0 = sqrt(1 + |x_space|^2)
    space = 0.5 * jax.random.normal(kx, (N, D - 1), jnp.float32)
    x = jnp.concatenate(
        [jnp.sqrt(1.0 + jnp.sum(space * space, axis=-1, keepdims=True)), space], axis=-1)
    nei = jax.random.randint(kn, (N, NEI), 0, N, dtype=jnp.int32)
    nei_mask = (jax.random.uniform(km, (N, NEI)) < 0.8).astype(jnp.int32)

    params = init_params(kp, K, D, OD, KP_EXTENT)

    # tile_n=128 -> 4 grid steps: >= 2 steps per TensorCore on v7x megacore.
    h, nei_out, mask_out = kp_graph_convolution((x, nei, nei_mask), params, tile_n=128)
    h = jax.block_until_ready(h)

    h_ref = kp_graph_convolution_reference((x, nei, nei_mask), params)
    err = float(jnp.max(jnp.abs(h - h_ref) / (1.0 + jnp.abs(h_ref))))
    assert h.shape == (N, OD)
    assert bool(jnp.all(jnp.isfinite(h))), "non-finite output"
    assert err < 1e-2, f"mismatch vs reference (max normalized error): {err}"
    print("KERNEL_OK")
</pallas_src>

<mosaic_0001>
module attributes {stable_mosaic.version = 11 : i64} {
  func.func @_kp_kernel(%arg0: i32, %arg1: memref<8x128xf32, #tpu.memory_space<vmem>>, %arg2: memref<8x1024xf32, #tpu.memory_space<vmem>>, %arg3: memref<8x128xf32, #tpu.memory_space<vmem>>, %arg4: memref<80x16xf32, #tpu.memory_space<vmem>>, %arg5: memref<8x1xf32, #tpu.memory_space<vmem>>, %arg6: memref<16x128xf32, #tpu.memory_space<vmem>>) attributes {dimension_semantics = [#tpu.dimension_semantics<parallel>], iteration_bounds = array<i64: 4>, scalar_prefetch = 0 : i64, scratch_operands = 0 : i64, tpu.core_type = #tpu.core_type<tc>, window_params = [{transform_indices = @transform_0, window_bounds = array<i64: 8, 128>}, {transform_indices = @transform_1, window_bounds = array<i64: 8, 1024>}, {transform_indices = @transform_2, window_bounds = array<i64: 8, 128>}, {pipeline_mode = #tpu.pipeline_mode<synchronous>, transform_indices = @transform_3, window_bounds = array<i64: 80, 16>}, {pipeline_mode = #tpu.pipeline_mode<synchronous>, transform_indices = @transform_4, window_bounds = array<i64: 8, 1>}, {transform_indices = @transform_5, window_bounds = array<i64: 16, 128>}]} {
    %c0 = arith.constant 0 : index
    %c0_0 = arith.constant 0 : index
    %0 = vector.load %arg1[%c0, %c0_0] : memref<8x128xf32, #tpu.memory_space<vmem>>, vector<8x128xf32>
    %c0_1 = arith.constant 0 : index
    %c0_2 = arith.constant 0 : index
    %1 = vector.load %arg4[%c0_1, %c0_2] : memref<80x16xf32, #tpu.memory_space<vmem>>, vector<80x16xf32>
    %c0_3 = arith.constant 0 : index
    %c0_4 = arith.constant 0 : index
    %2 = vector.load %arg5[%c0_3, %c0_4] : memref<8x1xf32, #tpu.memory_space<vmem>>, vector<8x1xf32>
    %3 = tpu.iota {dimensions = array<i32: 0>} : vector<8x128xi32>
    %c0_i32 = arith.constant 0 : i32
    %4 = vector.broadcast %c0_i32 : i32 to vector<8x128xi32>
    %5 = arith.cmpi eq, %3, %4 : vector<8x128xi32>
    %6 = arith.extui %5 : vector<8x128xi1> to vector<8x128xi32>
    %7 = arith.sitofp %6 : vector<8x128xi32> to vector<8x128xf32>
    %8 = tpu.iota {dimensions = array<i32: 0>} : vector<8x128xi32>
    %c4_i32 = arith.constant 4 : i32
    %9 = vector.broadcast %c4_i32 : i32 to vector<8x128xi32>
    %10 = arith.cmpi slt, %8, %9 : vector<8x128xi32>
    %11 = arith.extui %10 : vector<8x128xi1> to vector<8x128xi32>
    %12 = arith.sitofp %11 : vector<8x128xi32> to vector<8x128xf32>
    %13 = tpu.iota {dimensions = array<i32: 0>} : vector<8x64xi32>
    %14 = tpu.iota {dimensions = array<i32: 1>} : vector<8x64xi32>
    %c16_i32 = arith.constant 16 : i32
    %15 = vector.broadcast %c16_i32 : i32 to vector<8x64xi32>
    %16 = arith.muli %13, %15 : vector<8x64xi32>
    %17 = arith.cmpi sge, %14, %16 : vector<8x64xi32>
    %c1_i32 = arith.constant 1 : i32
    %18 = vector.broadcast %c1_i32 : i32 to vector<8x64xi32>
    %19 = arith.addi %13, %18 : vector<8x64xi32>
    %c16_i32_5 = arith.constant 16 : i32
    %20 = vector.broadcast %c16_i32_5 : i32 to vector<8x64xi32>
    %21 = arith.muli %19, %20 : vector<8x64xi32>
    %22 = arith.cmpi slt, %14, %21 : vector<8x64xi32>
    %23 = arith.andi %17, %22 : vector<8x64xi1>
    %24 = arith.extui %23 : vector<8x64xi1> to vector<8x64xi32>
    %25 = arith.sitofp %24 : vector<8x64xi32> to vector<8x64xf32>
    %26 = tpu.iota {dimensions = array<i32: 0>} : vector<8x128xi32>
    %c0_i32_6 = arith.constant 0 : i32
    %27 = vector.broadcast %c0_i32_6 : i32 to vector<8x128xi32>
    %28 = arith.cmpi eq, %26, %27 : vector<8x128xi32>
    %29 = tpu.iota {dimensions = array<i32: 0>} : vector<16x128xi32>
    %c0_i32_7 = arith.constant 0 : i32
    %30 = vector.broadcast %c0_i32_7 : i32 to vector<16x128xi32>
    %31 = arith.cmpi eq, %29, %30 : vector<16x128xi32>
    %32 = vector.extract_strided_slice %0 {offsets = [0, 0], sizes = [1, 128], strides = [1, 1]} : vector<8x128xf32> to vector<1x128xf32>
    %cst = arith.constant 1.000000e+00 : f32
    %33 = vector.broadcast %cst : f32 to vector<1x128xf32>
    %34 = arith.addf %33, %32 : vector<1x128xf32>
    %35 = tpu.reciprocal %34 {approx = true} : vector<1x128xf32> -> vector<1x128xf32>
    %cst_8 = arith.constant 0.000000e+00 : f32
    %36 = vector.broadcast %cst_8 : f32 to vector<16x128xf32>
    %c0_9 = arith.constant 0 : index
    %c0_10 = arith.constant 0 : index
    %37 = vector.load %arg2[%c0_9, %c0_10] : memref<8x1024xf32, #tpu.memory_space<vmem>>, vector<8x128xf32>
    %c0_11 = arith.constant 0 : index
    %c0_12 = arith.constant 0 : index
    %38 = vector.load %arg3[%c0_11, %c0_12] : memref<8x128xf32, #tpu.memory_space<vmem>>, vector<1x128xf32>
    %39 = arith.mulf %0, %37 : vector<8x128xf32>
    %cst_13 = arith.constant dense<0.000000e+00> : vector<128xf32>
    %40 = vector.multi_reduction <add>, %39, %cst_13 [0] : vector<8x128xf32> to vector<128xf32>
    %41 = vector.shape_cast %40 : vector<128xf32> to vector<1x128xf32>
    %42 = vector.extract_strided_slice %39 {offsets = [0, 0], sizes = [1, 128], strides = [1, 1]} : vector<8x128xf32> to vector<1x128xf32>
    %cst_14 = arith.constant 2.000000e+00 : f32
    %43 = vector.broadcast %cst_14 : f32 to vector<1x128xf32>
    %44 = arith.mulf %43, %42 : vector<1x128xf32>
    %45 = arith.subf %41, %44 : vector<1x128xf32>
    %cst_15 = arith.constant 0.000000e+00 : f32
    %46 = vector.broadcast %cst_15 : f32 to vector<1x128xf32>
    %47 = arith.subf %46, %45 : vector<1x128xf32>
    %cst_16 = arith.constant 1.00000012 : f32
    %48 = vector.broadcast %cst_16 : f32 to vector<1x128xf32>
    %49 = arith.maximumf %47, %48 : vector<1x128xf32>
    %50 = arith.mulf %49, %49 : vector<1x128xf32>
    %cst_17 = arith.constant 1.000000e+00 : f32
    %51 = vector.broadcast %cst_17 : f32 to vector<1x128xf32>
    %52 = arith.subf %50, %51 : vector<1x128xf32>
    %53 = math.sqrt %52 : vector<1x128xf32>
    %54 = arith.addf %49, %53 : vector<1x128xf32>
    %55 = math.log %54 : vector<1x128xf32>
    %56 = vector.broadcast %45 : vector<1x128xf32> to vector<8x128xf32>
    %57 = arith.mulf %56, %0 : vector<8x128xf32>
    %58 = arith.addf %37, %57 : vector<8x128xf32>
    %59 = arith.mulf %58, %58 : vector<8x128xf32>
    %cst_18 = arith.constant dense<0.000000e+00> : vector<128xf32>
    %60 = vector.multi_reduction <add>, %59, %cst_18 [0] : vector<8x128xf32> to vector<128xf32>
    %61 = vector.shape_cast %60 : vector<128xf32> to vector<1x128xf32>
    %62 = vector.extract_strided_slice %58 {offsets = [0, 0], sizes = [1, 128], strides = [1, 1]} : vector<8x128xf32> to vector<1x128xf32>
    %cst_19 = arith.constant 2.000000e+00 : f32
    %63 = vector.broadcast %cst_19 : f32 to vector<1x128xf32>
    %64 = arith.mulf %63, %62 : vector<1x128xf32>
    %65 = vector.extract_strided_slice %58 {offsets = [0, 0], sizes = [1, 128], strides = [1, 1]} : vector<8x128xf32> to vector<1x128xf32>
    %66 = arith.mulf %64, %65 : vector<1x128xf32>
    %67 = arith.subf %61, %66 : vector<1x128xf32>
    %cst_20 = arith.constant 9.99999993E-9 : f32
    %68 = vector.broadcast %cst_20 : f32 to vector<1x128xf32>
    %69 = arith.maximumf %67, %68 : vector<1x128xf32>
    %70 = math.rsqrt %69 : vector<1x128xf32>
    %71 = arith.mulf %55, %70 : vector<1x128xf32>
    %72 = vector.broadcast %71 : vector<1x128xf32> to vector<8x128xf32>
    %73 = arith.mulf %72, %58 : vector<8x128xf32>
    %74 = vector.extract_strided_slice %73 {offsets = [0, 0], sizes = [1, 128], strides = [1, 1]} : vector<8x128xf32> to vector<1x128xf32>
    %75 = arith.mulf %74, %35 : vector<1x128xf32>
    %76 = vector.broadcast %75 : vector<1x128xf32> to vector<8x128xf32>
    %77 = arith.mulf %76, %0 : vector<8x128xf32>
    %78 = arith.subf %73, %77 : vector<8x128xf32>
    %79 = arith.mulf %78, %78 : vector<8x128xf32>
    %cst_21 = arith.constant dense<0.000000e+00> : vector<128xf32>
    %80 = vector.multi_reduction <add>, %79, %cst_21 [0] : vector<8x128xf32> to vector<128xf32>
    %81 = vector.shape_cast %80 : vector<128xf32> to vector<1x128xf32>
    %82 = vector.extract_strided_slice %78 {offsets = [0, 0], sizes = [1, 128], strides = [1, 1]} : vector<8x128xf32> to vector<1x128xf32>
    %83 = vector.extract_strided_slice %78 {offsets = [0, 0], sizes = [1, 128], strides = [1, 1]} : vector<8x128xf32> to vector<1x128xf32>
    %84 = arith.mulf %82, %83 : vector<1x128xf32>
    %85 = arith.subf %81, %84 : vector<1x128xf32>
    %cst_22 = arith.constant 9.99999993E-9 : f32
    %86 = vector.broadcast %cst_22 : f32 to vector<1x128xf32>
    %87 = arith.maximumf %85, %86 : vector<1x128xf32>
    %88 = math.rsqrt %87 : vector<1x128xf32>
    %89 = arith.mulf %85, %88 : vector<1x128xf32>
    %90 = math.exp %89 : vector<1x128xf32>
    %91 = tpu.reciprocal %90 {approx = true} : vector<1x128xf32> -> vector<1x128xf32>
    %92 = arith.subf %90, %91 : vector<1x128xf32>
    %cst_23 = arith.constant 5.000000e-01 : f32
    %93 = vector.broadcast %cst_23 : f32 to vector<1x128xf32>
    %94 = arith.mulf %93, %92 : vector<1x128xf32>
    %95 = arith.addf %90, %91 : vector<1x128xf32>
    %cst_24 = arith.constant 5.000000e-01 : f32
    %96 = vector.broadcast %cst_24 : f32 to vector<1x128xf32>
    %97 = arith.mulf %96, %95 : vector<1x128xf32>
    %98 = arith.mulf %94, %88 : vector<1x128xf32>
    %99 = vector.broadcast %98 : vector<1x128xf32> to vector<8x128xf32>
    %100 = arith.mulf %99, %78 : vector<8x128xf32>
    %101 = vector.shape_cast %97 : vector<1x128xf32> to vector<1x128xf32>
    %102 = vector.broadcast %101 : vector<1x128xf32> to vector<8x128xf32>
    %103 = arith.select %28, %102, %100 : vector<8x128xi1>, vector<8x128xf32>
    %104 = tpu.concatenate %103, %7 in 0 : vector<8x128xf32>, vector<8x128xf32> -> vector<16x128xf32>
    %cst_25 = arith.constant dense<0.000000e+00> : vector<80x128xf32>
    %105 = tpu.matmul %1, %104, %cst_25 {dimension_numbers = #tpu.dot_dimension_numbers<[1], [0], [0], [1], [0, 0, 1, 1], [], []>} : vector<80x16xf32>, vector<16x128xf32>, vector<80x128xf32> -> vector<80x128xf32>
    %106 = vector.extract_strided_slice %105 {offsets = [0, 0], sizes = [8, 128], strides = [1, 1]} : vector<80x128xf32> to vector<8x128xf32>
    %107 = vector.extract_strided_slice %105 {offsets = [8, 0], sizes = [64, 128], strides = [1, 1]} : vector<80x128xf32> to vector<64x128xf32>
    %108 = vector.extract_strided_slice %105 {offsets = [72, 0], sizes = [8, 128], strides = [1, 1]} : vector<80x128xf32> to vector<8x128xf32>
    %109 = arith.negf %106 : vector<8x128xf32>
    %110 = math.exp %109 : vector<8x128xf32>
    %cst_26 = arith.constant 1.000000e+00 : f32
    %111 = vector.broadcast %cst_26 : f32 to vector<8x128xf32>
    %112 = arith.addf %111, %110 : vector<8x128xf32>
    %113 = arith.divf %111, %112 : vector<8x128xf32>
    %114 = vector.broadcast %2 : vector<8x1xf32> to vector<8x128xf32>
    %115 = arith.mulf %113, %114 : vector<8x128xf32>
    %cst_27 = arith.constant 1.000100e+00 : f32
    %116 = vector.broadcast %cst_27 : f32 to vector<8x128xf32>
    %117 = arith.addf %115, %116 : vector<8x128xf32>
    %cst_28 = arith.constant 0.000000e+00 : f32
    %118 = vector.broadcast %cst_28 : f32 to vector<8x128xf32>
    %119 = arith.subf %118, %108 : vector<8x128xf32>
    %cst_29 = arith.constant 1.00000012 : f32
    %120 = vector.broadcast %cst_29 : f32 to vector<8x128xf32>
    %121 = arith.maximumf %119, %120 : vector<8x128xf32>
    %122 = arith.mulf %121, %121 : vector<8x128xf32>
    %cst_30 = arith.constant 1.000000e+00 : f32
    %123 = vector.broadcast %cst_30 : f32 to vector<8x128xf32>
    %124 = arith.subf %122, %123 : vector<8x128xf32>
    %125 = math.sqrt %124 : vector<8x128xf32>
    %126 = arith.addf %121, %125 : vector<8x128xf32>
    %127 = math.log %126 : vector<8x128xf32>
    %128 = vector.broadcast %38 : vector<1x128xf32> to vector<8x128xf32>
    %129 = arith.mulf %128, %12 : vector<8x128xf32>
    %130 = arith.mulf %127, %129 : vector<8x128xf32>
    %131 = arith.mulf %107, %107 : vector<64x128xf32>
    %cst_31 = arith.constant dense<0.000000e+00> : vector<8x128xf32>
    %132 = tpu.matmul %25, %131, %cst_31 {dimension_numbers = #tpu.dot_dimension_numbers<[1], [0], [0], [1], [0, 0, 1, 1], [], []>} : vector<8x64xf32>, vector<64x128xf32>, vector<8x128xf32> -> vector<8x128xf32>
    %133 = arith.mulf %117, %117 : vector<8x128xf32>
    %cst_32 = arith.constant 1.000000e+00 : f32
    %134 = vector.broadcast %cst_32 : f32 to vector<8x128xf32>
    %135 = arith.subf %133, %134 : vector<8x128xf32>
    %cst_33 = arith.constant 9.99999993E-9 : f32
    %136 = vector.broadcast %cst_33 : f32 to vector<8x128xf32>
    %137 = arith.maximumf %132, %136 : vector<8x128xf32>
    %138 = tpu.reciprocal %137 {approx = true} : vector<8x128xf32> -> vector<8x128xf32>
    %139 = arith.mulf %135, %138 : vector<8x128xf32>
    %140 = math.sqrt %139 : vector<8x128xf32>
    %141 = arith.mulf %130, %140 : vector<8x128xf32>
    %142 = arith.mulf %130, %117 : vector<8x128xf32>
    %cst_34 = arith.constant dense<0.000000e+00> : vector<128xf32>
    %143 = vector.multi_reduction <add>, %142, %cst_34 [0] : vector<8x128xf32> to vector<128xf32>
    %144 = vector.shape_cast %143 : vector<128xf32> to vector<1x128xf32>
    %145 = vector.extract_strided_slice %141 {offsets = [0, 0], sizes = [1, 128], strides = [1, 1]} : vector<8x128xf32> to vector<1x128xf32>
    %146 = vector.extract_strided_slice %107 {offsets = [0, 0], sizes = [16, 128], strides = [1, 1]} : vector<64x128xf32> to vector<16x128xf32>
    %147 = vector.broadcast %145 : vector<1x128xf32> to vector<16x128xf32>
    %148 = arith.mulf %147, %146 : vector<16x128xf32>
    %149 = vector.extract_strided_slice %141 {offsets = [1, 0], sizes = [1, 128], strides = [1, 1]} : vector<8x128xf32> to vector<1x128xf32>
    %150 = vector.extract_strided_slice %107 {offsets = [16, 0], sizes = [16, 128], strides = [1, 1]} : vector<64x128xf32> to vector<16x128xf32>
    %151 = vector.broadcast %149 : vector<1x128xf32> to vector<16x128xf32>
    %152 = arith.mulf %151, %150 : vector<16x128xf32>
    %153 = arith.addf %148, %152 : vector<16x128xf32>
    %154 = vector.extract_strided_slice %141 {offsets = [2, 0], sizes = [1, 128], strides = [1, 1]} : vector<8x128xf32> to vector<1x128xf32>
    %155 = vector.extract_strided_slice %107 {offsets = [32, 0], sizes = [16, 128], strides = [1, 1]} : vector<64x128xf32> to vector<16x128xf32>
    %156 = vector.broadcast %154 : vector<1x128xf32> to vector<16x128xf32>
    %157 = arith.mulf %156, %155 : vector<16x128xf32>
    %158 = arith.addf %153, %157 : vector<16x128xf32>
    %159 = vector.extract_strided_slice %141 {offsets = [3, 0], sizes = [1, 128], strides = [1, 1]} : vector<8x128xf32> to vector<1x128xf32>
    %160 = vector.extract_strided_slice %107 {offsets = [48, 0], sizes = [16, 128], strides = [1, 1]} : vector<64x128xf32> to vector<16x128xf32>
    %161 = vector.broadcast %159 : vector<1x128xf32> to vector<16x128xf32>
    %162 = arith.mulf %161, %160 : vector<16x128xf32>
    %163 = arith.addf %158, %162 : vector<16x128xf32>
    %164 = vector.shape_cast %144 : vector<1x128xf32> to vector<1x128xf32>
    %165 = vector.broadcast %164 : vector<1x128xf32> to vector<16x128xf32>
    %166 = arith.select %31, %165, %163 : vector<16x128xi1>, vector<16x128xf32>
    %167 = arith.mulf %166, %166 : vector<16x128xf32>
    %cst_35 = arith.constant dense<0.000000e+00> : vector<128xf32>
    %168 = vector.multi_reduction <add>, %167, %cst_35 [0] : vector<16x128xf32> to vector<128xf32>
    %169 = vector.shape_cast %168 : vector<128xf32> to vector<1x128xf32>
    %170 = vector.extract_strided_slice %166 {offsets = [0, 0], sizes = [1, 128], strides = [1, 1]} : vector<16x128xf32> to vector<1x128xf32>
    %cst_36 = arith.constant 2.000000e+00 : f32
    %171 = vector.broadcast %cst_36 : f32 to vector<1x128xf32>
    %172 = arith.mulf %171, %170 : vector<1x128xf32>
    %173 = vector.extract_strided_slice %166 {offsets = [0, 0], sizes = [1, 128], strides = [1, 1]} : vector<16x128xf32> to vector<1x128xf32>
    %174 = arith.mulf %172, %173 : vector<1x128xf32>
    %175 = arith.subf %169, %174 : vector<1x128xf32>
    %176 = math.absf %175 : vector<1x128xf32>
    %cst_37 = arith.constant 9.99999993E-9 : f32
    %177 = vector.broadcast %cst_37 : f32 to vector<1x128xf32>
    %178 = arith.maximumf %176, %177 : vector<1x128xf32>
    %179 = math.rsqrt %178 : vector<1x128xf32>
    %180 = vector.broadcast %179 : vector<1x128xf32> to vector<16x128xf32>
    %181 = arith.mulf %166, %180 : vector<16x128xf32>
    %182 = arith.addf %36, %181 : vector<16x128xf32>
    %c0_38 = arith.constant 0 : index
    %c128 = arith.constant 128 : index
    %183 = vector.load %arg2[%c0_38, %c128] : memref<8x1024xf32, #tpu.memory_space<vmem>>, vector<8x128xf32>
    %c1 = arith.constant 1 : index
    %c0_39 = arith.constant 0 : index
    %184 = vector.load %arg3[%c1, %c0_39] : memref<8x128xf32, #tpu.memory_space<vmem>>, vector<1x128xf32>
    %185 = arith.mulf %0, %183 : vector<8x128xf32>
    %cst_40 = arith.constant dense<0.000000e+00> : vector<128xf32>
    %186 = vector.multi_reduction <add>, %185, %cst_40 [0] : vector<8x128xf32> to vector<128xf32>
    %187 = vector.shape_cast %186 : vector<128xf32> to vector<1x128xf32>
    %188 = vector.extract_strided_slice %185 {offsets = [0, 0], sizes = [1, 128], strides = [1, 1]} : vector<8x128xf32> to vector<1x128xf32>
    %cst_41 = arith.constant 2.000000e+00 : f32
    %189 = vector.broadcast %cst_41 : f32 to vector<1x128xf32>
    %190 = arith.mulf %189, %188 : vector<1x128xf32>
    %191 = arith.subf %187, %190 : vector<1x128xf32>
    %cst_42 = arith.constant 0.000000e+00 : f32
    %192 = vector.broadcast %cst_42 : f32 to vector<1x128xf32>
    %193 = arith.subf %192, %191 : vector<1x128xf32>
    %cst_43 = arith.constant 1.00000012 : f32
    %194 = vector.broadcast %cst_43 : f32 to vector<1x128xf32>
    %195 = arith.maximumf %193, %194 : vector<1x128xf32>
    %196 = arith.mulf %195, %195 : vector<1x128xf32>
    %cst_44 = arith.constant 1.000000e+00 : f32
    %197 = vector.broadcast %cst_44 : f32 to vector<1x128xf32>
    %198 = arith.subf %196, %197 : vector<1x128xf32>
    %199 = math.sqrt %198 : vector<1x128xf32>
    %200 = arith.addf %195, %199 : vector<1x128xf32>
    %201 = math.log %200 : vector<1x128xf32>
    %202 = vector.broadcast %191 : vector<1x128xf32> to vector<8x128xf32>
    %203 = arith.mulf %202, %0 : vector<8x128xf32>
    %204 = arith.addf %183, %203 : vector<8x128xf32>
    %205 = arith.mulf %204, %204 : vector<8x128xf32>
    %cst_45 = arith.constant dense<0.000000e+00> : vector<128xf32>
    %206 = vector.multi_reduction <add>, %205, %cst_45 [0] : vector<8x128xf32> to vector<128xf32>
    %207 = vector.shape_cast %206 : vector<128xf32> to vector<1x128xf32>
    %208 = vector.extract_strided_slice %204 {offsets = [0, 0], sizes = [1, 128], strides = [1, 1]} : vector<8x128xf32> to vector<1x128xf32>
    %cst_46 = arith.constant 2.000000e+00 : f32
    %209 = vector.broadcast %cst_46 : f32 to vector<1x128xf32>
    %210 = arith.mulf %209, %208 : vector<1x128xf32>
    %211 = vector.extract_strided_slice %204 {offsets = [0, 0], sizes = [1, 128], strides = [1, 1]} : vector<8x128xf32> to vector<1x128xf32>
    %212 = arith.mulf %210, %211 : vector<1x128xf32>
    %213 = arith.subf %207, %212 : vector<1x128xf32>
    %cst_47 = arith.constant 9.99999993E-9 : f32
    %214 = vector.broadcast %cst_47 : f32 to vector<1x128xf32>
    %215 = arith.maximumf %213, %214 : vector<1x128xf32>
    %216 = math.rsqrt %215 : vector<1x128xf32>
    %217 = arith.mulf %201, %216 : vector<1x128xf32>
    %218 = vector.broadcast %217 : vector<1x128xf32> to vector<8x128xf32>
    %219 = arith.mulf %218, %204 : vector<8x128xf32>
    %220 = vector.extract_strided_slice %219 {offsets = [0, 0], sizes = [1, 128], strides = [1, 1]} : vector<8x128xf32> to vector<1x128xf32>
    %221 = arith.mulf %220, %35 : vector<1x128xf32>
    %222 = vector.broadcast %221 : vector<1x128xf32> to vector<8x128xf32>
    %223 = arith.mulf %222, %0 : vector<8x128xf32>
    %224 = arith.subf %219, %223 : vector<8x128xf32>
    %225 = arith.mulf %224, %224 : vector<8x128xf32>
    %cst_48 = arith.constant dense<0.000000e+00> : vector<128xf32>
    %226 = vector.multi_reduction <add>, %225, %cst_48 [0] : vector<8x128xf32> to vector<128xf32>
    %227 = vector.shape_cast %226 : vector<128xf32> to vector<1x128xf32>
    %228 = vector.extract_strided_slice %224 {offsets = [0, 0], sizes = [1, 128], strides = [1, 1]} : vector<8x128xf32> to vector<1x128xf32>
    %229 = vector.extract_strided_slice %224 {offsets = [0, 0], sizes = [1, 128], strides = [1, 1]} : vector<8x128xf32> to vector<1x128xf32>
    %230 = arith.mulf %228, %229 : vector<1x128xf32>
    %231 = arith.subf %227, %230 : vector<1x128xf32>
    %cst_49 = arith.constant 9.99999993E-9 : f32
    %232 = vector.broadcast %cst_49 : f32 to vector<1x128xf32>
    %233 = arith.maximumf %231, %232 : vector<1x128xf32>
    %234 = math.rsqrt %233 : vector<1x128xf32>
    %235 = arith.mulf %231, %234 : vector<1x128xf32>
    %236 = math.exp %235 : vector<1x128xf32>
    %237 = tpu.reciprocal %236 {approx = true} : vector<1x128xf32> -> vector<1x128xf32>
    %238 = arith.subf %236, %237 : vector<1x128xf32>
    %cst_50 = arith.constant 5.000000e-01 : f32
    %239 = vector.broadcast %cst_50 : f32 to vector<1x128xf32>
    %240 = arith.mulf %239, %238 : vector<1x128xf32>
    %241 = arith.addf %236, %237 : vector<1x128xf32>
    %cst_51 = arith.constant 5.000000e-01 : f32
    %242 = vector.broadcast %cst_51 : f32 to vector<1x128xf32>
    %243 = arith.mulf %242, %241 : vector<1x128xf32>
    %244 = arith.mulf %240, %234 : vector<1x128xf32>
    %245 = vector.broadcast %244 : vector<1x128xf32> to vector<8x128xf32>
    %246 = arith.mulf %245, %224 : vector<8x128xf32>
    %247 = vector.shape_cast %243 : vector<1x128xf32> to vector<1x128xf32>
    %248 = vector.broadcast %247 : vector<1x128xf32> to vector<8x128xf32>
    %249 = arith.select %28, %248, %246 : vector<8x128xi1>, vector<8x128xf32>
    %250 = tpu.concatenate %249, %7 in 0 : vector<8x128xf32>, vector<8x128xf32> -> vector<16x128xf32>
    %cst_52 = arith.constant dense<0.000000e+00> : vector<80x128xf32>
    %251 = tpu.matmul %1, %250, %cst_52 {dimension_numbers = #tpu.dot_dimension_numbers<[1], [0], [0], [1], [0, 0, 1, 1], [], []>} : vector<80x16xf32>, vector<16x128xf32>, vector<80x128xf32> -> vector<80x128xf32>
    %252 = vector.extract_strided_slice %251 {offsets = [0, 0], sizes = [8, 128], strides = [1, 1]} : vector<80x128xf32> to vector<8x128xf32>
    %253 = vector.extract_strided_slice %251 {offsets = [8, 0], sizes = [64, 128], strides = [1, 1]} : vector<80x128xf32> to vector<64x128xf32>
    %254 = vector.extract_strided_slice %251 {offsets = [72, 0], sizes = [8, 128], strides = [1, 1]} : vector<80x128xf32> to vector<8x128xf32>
    %255 = arith.negf %252 : vector<8x128xf32>
    %256 = math.exp %255 : vector<8x128xf32>
    %cst_53 = arith.constant 1.000000e+00 : f32
    %257 = vector.broadcast %cst_53 : f32 to vector<8x128xf32>
    %258 = arith.addf %257, %256 : vector<8x128xf32>
    %259 = arith.divf %257, %258 : vector<8x128xf32>
    %260 = vector.broadcast %2 : vector<8x1xf32> to vector<8x128xf32>
    %261 = arith.mulf %259, %260 : vector<8x128xf32>
    %cst_54 = arith.constant 1.000100e+00 : f32
    %262 = vector.broadcast %cst_54 : f32 to vector<8x128xf32>
    %263 = arith.addf %261, %262 : vector<8x128xf32>
    %cst_55 = arith.constant 0.000000e+00 : f32
    %264 = vector.broadcast %cst_55 : f32 to vector<8x128xf32>
    %265 = arith.subf %264, %254 : vector<8x128xf32>
    %cst_56 = arith.constant 1.00000012 : f32
    %266 = vector.broadcast %cst_56 : f32 to vector<8x128xf32>
    %267 = arith.maximumf %265, %266 : vector<8x128xf32>
    %268 = arith.mulf %267, %267 : vector<8x128xf32>
    %cst_57 = arith.constant 1.000000e+00 : f32
    %269 = vector.broadcast %cst_57 : f32 to vector<8x128xf32>
    %270 = arith.subf %268, %269 : vector<8x128xf32>
    %271 = math.sqrt %270 : vector<8x128xf32>
    %272 = arith.addf %267, %271 : vector<8x128xf32>
    %273 = math.log %272 : vector<8x128xf32>
    %274 = vector.broadcast %184 : vector<1x128xf32> to vector<8x128xf32>
    %275 = arith.mulf %274, %12 : vector<8x128xf32>
    %276 = arith.mulf %273, %275 : vector<8x128xf32>
    %277 = arith.mulf %253, %253 : vector<64x128xf32>
    %cst_58 = arith.constant dense<0.000000e+00> : vector<8x128xf32>
    %278 = tpu.matmul %25, %277, %cst_58 {dimension_numbers = #tpu.dot_dimension_numbers<[1], [0], [0], [1], [0, 0, 1, 1], [], []>} : vector<8x64xf32>, vector<64x128xf32>, vector<8x128xf32> -> vector<8x128xf32>
    %279 = arith.mulf %263, %263 : vector<8x128xf32>
    %cst_59 = arith.constant 1.000000e+00 : f32
    %280 = vector.broadcast %cst_59 : f32 to vector<8x128xf32>
    %281 = arith.subf %279, %280 : vector<8x128xf32>
    %cst_60 = arith.constant 9.99999993E-9 : f32
    %282 = vector.broadcast %cst_60 : f32 to vector<8x128xf32>
    %283 = arith.maximumf %278, %282 : vector<8x128xf32>
    %284 = tpu.reciprocal %283 {approx = true} : vector<8x128xf32> -> vector<8x128xf32>
    %285 = arith.mulf %281, %284 : vector<8x128xf32>
    %286 = math.sqrt %285 : vector<8x128xf32>
    %287 = arith.mulf %276, %286 : vector<8x128xf32>
    %288 = arith.mulf %276, %263 : vector<8x128xf32>
    %cst_61 = arith.constant dense<0.000000e+00> : vector<128xf32>
    %289 = vector.multi_reduction <add>, %288, %cst_61 [0] : vector<8x128xf32> to vector<128xf32>
    %290 = vector.shape_cast %289 : vector<128xf32> to vector<1x128xf32>
    %291 = vector.extract_strided_slice %287 {offsets = [0, 0], sizes = [1, 128], strides = [1, 1]} : vector<8x128xf32> to vector<1x128xf32>
    %292 = vector.extract_strided_slice %253 {offsets = [0, 0], sizes = [16, 128], strides = [1, 1]} : vector<64x128xf32> to vector<16x128xf32>
    %293 = vector.broadcast %291 : vector<1x128xf32> to vector<16x128xf32>
    %294 = arith.mulf %293, %292 : vector<16x128xf32>
    %295 = vector.extract_strided_slice %287 {offsets = [1, 0], sizes = [1, 128], strides = [1, 1]} : vector<8x128xf32> to vector<1x128xf32>
    %296 = vector.extract_strided_slice %253 {offsets = [16, 0], sizes = [16, 128], strides = [1, 1]} : vector<64x128xf32> to vector<16x128xf32>
    %297 = vector.broadcast %295 : vector<1x128xf32> to vector<16x128xf32>
    %298 = arith.mulf %297, %296 : vector<16x128xf32>
    %299 = arith.addf %294, %298 : vector<16x128xf32>
    %300 = vector.extract_strided_slice %287 {offsets = [2, 0], sizes = [1, 128], strides = [1, 1]} : vector<8x128xf32> to vector<1x128xf32>
    %301 = vector.extract_strided_slice %253 {offsets = [32, 0], sizes = [16, 128], strides = [1, 1]} : vector<64x128xf32> to vector<16x128xf32>
    %302 = vector.broadcast %300 : vector<1x128xf32> to vector<16x128xf32>
    %303 = arith.mulf %302, %301 : vector<16x128xf32>
    %304 = arith.addf %299, %303 : vector<16x128xf32>
    %305 = vector.extract_strided_slice %287 {offsets = [3, 0], sizes = [1, 128], strides = [1, 1]} : vector<8x128xf32> to vector<1x128xf32>
    %306 = vector.extract_strided_slice %253 {offsets = [48, 0], sizes = [16, 128], strides = [1, 1]} : vector<64x128xf32> to vector<16x128xf32>
    %307 = vector.broadcast %305 : vector<1x128xf32> to vector<16x128xf32>
    %308 = arith.mulf %307, %306 : vector<16x128xf32>
    %309 = arith.addf %304, %308 : vector<16x128xf32>
    %310 = vector.shape_cast %290 : vector<1x128xf32> to vector<1x128xf32>
    %311 = vector.broadcast %310 : vector<1x128xf32> to vector<16x128xf32>
    %312 = arith.select %31, %311, %309 : vector<16x128xi1>, vector<16x128xf32>
    %313 = arith.mulf %312, %312 : vector<16x128xf32>
    %cst_62 = arith.constant dense<0.000000e+00> : vector<128xf32>
    %314 = vector.multi_reduction <add>, %313, %cst_62 [0] : vector<16x128xf32> to vector<128xf32>
    %315 = vector.shape_cast %314 : vector<128xf32> to vector<1x128xf32>
    %316 = vector.extract_strided_slice %312 {offsets = [0, 0], sizes = [1, 128], strides = [1, 1]} : vector<16x128xf32> to vector<1x128xf32>
    %cst_63 = arith.constant 2.000000e+00 : f32
    %317 = vector.broadcast %cst_63 : f32 to vector<1x128xf32>
    %318 = arith.mulf %317, %316 : vector<1x128xf32>
    %319 = vector.extract_strided_slice %312 {offsets = [0, 0], sizes = [1, 128], strides = [1, 1]} : vector<16x128xf32> to vector<1x128xf32>
    %320 = arith.mulf %318, %319 : vector<1x128xf32>
    %321 = arith.subf %315, %320 : vector<1x128xf32>
    %322 = math.absf %321 : vector<1x128xf32>
    %cst_64 = arith.constant 9.99999993E-9 : f32
    %323 = vector.broadcast %cst_64 : f32 to vector<1x128xf32>
    %324 = arith.maximumf %322, %323 : vector<1x128xf32>
    %325 = math.rsqrt %324 : vector<1x128xf32>
    %326 = vector.broadcast %325 : vector<1x128xf32> to vector<16x128xf32>
    %327 = arith.mulf %312, %326 : vector<16x128xf32>
    %328 = arith.addf %182, %327 : vector<16x128xf32>
    %c0_65 = arith.constant 0 : index
    %c256 = arith.constant 256 : index
    %329 = vector.load %arg2[%c0_65, %c256] : memref<8x1024xf32, #tpu.memory_space<vmem>>, vector<8x128xf32>
    %c2 = arith.constant 2 : index
    %c0_66 = arith.constant 0 : index
    %330 = vector.load %arg3[%c2, %c0_66] : memref<8x128xf32, #tpu.memory_space<vmem>>, vector<1x128xf32>
    %331 = arith.mulf %0, %329 : vector<8x128xf32>
    %cst_67 = arith.constant dense<0.000000e+00> : vector<128xf32>
    %332 = vector.multi_reduction <add>, %331, %cst_67 [0] : vector<8x128xf32> to vector<128xf32>
    %333 = vector.shape_cast %332 : vector<128xf32> to vector<1x128xf32>
    %334 = vector.extract_strided_slice %331 {offsets = [0, 0], sizes = [1, 128], strides = [1, 1]} : vector<8x128xf32> to vector<1x128xf32>
    %cst_68 = arith.constant 2.000000e+00 : f32
    %335 = vector.broadcast %cst_68 : f32 to vector<1x128xf32>
    %336 = arith.mulf %335, %334 : vector<1x128xf32>
    %337 = arith.subf %333, %336 : vector<1x128xf32>
    %cst_69 = arith.constant 0.000000e+00 : f32
    %338 = vector.broadcast %cst_69 : f32 to vector<1x128xf32>
    %339 = arith.subf %338, %337 : vector<1x128xf32>
    %cst_70 = arith.constant 1.00000012 : f32
    %340 = vector.broadcast %cst_70 : f32 to vector<1x128xf32>
    %341 = arith.maximumf %339, %340 : vector<1x128xf32>
    %342 = arith.mulf %341, %341 : vector<1x128xf32>
    %cst_71 = arith.constant 1.000000e+00 : f32
    %343 = vector.broadcast %cst_71 : f32 to vector<1x128xf32>
    %344 = arith.subf %342, %343 : vector<1x128xf32>
    %345 = math.sqrt %344 : vector<1x128xf32>
    %346 = arith.addf %341, %345 : vector<1x128xf32>
    %347 = math.log %346 : vector<1x128xf32>
    %348 = vector.broadcast %337 : vector<1x128xf32> to vector<8x128xf32>
    %349 = arith.mulf %348, %0 : vector<8x128xf32>
    %350 = arith.addf %329, %349 : vector<8x128xf32>
    %351 = arith.mulf %350, %350 : vector<8x128xf32>
    %cst_72 = arith.constant dense<0.000000e+00> : vector<128xf32>
    %352 = vector.multi_reduction <add>, %351, %cst_72 [0] : vector<8x128xf32> to vector<128xf32>
    %353 = vector.shape_cast %352 : vector<128xf32> to vector<1x128xf32>
    %354 = vector.extract_strided_slice %350 {offsets = [0, 0], sizes = [1, 128], strides = [1, 1]} : vector<8x128xf32> to vector<1x128xf32>
    %cst_73 = arith.constant 2.000000e+00 : f32
    %355 = vector.broadcast %cst_73 : f32 to vector<1x128xf32>
    %356 = arith.mulf %355, %354 : vector<1x128xf32>
    %357 = vector.extract_strided_slice %350 {offsets = [0, 0], sizes = [1, 128], strides = [1, 1]} : vector<8x128xf32> to vector<1x128xf32>
    %358 = arith.mulf %356, %357 : vector<1x128xf32>
    %359 = arith.subf %353, %358 : vector<1x128xf32>
    %cst_74 = arith.constant 9.99999993E-9 : f32
    %360 = vector.broadcast %cst_74 : f32 to vector<1x128xf32>
    %361 = arith.maximumf %359, %360 : vector<1x128xf32>
    %362 = math.rsqrt %361 : vector<1x128xf32>
    %363 = arith.mulf %347, %362 : vector<1x128xf32>
    %364 = vector.broadcast %363 : vector<1x128xf32> to vector<8x128xf32>
    %365 = arith.mulf %364, %350 : vector<8x128xf32>
    %366 = vector.extract_strided_slice %365 {offsets = [0, 0], sizes = [1, 128], strides = [1, 1]} : vector<8x128xf32> to vector<1x128xf32>
    %367 = arith.mulf %366, %35 : vector<1x128xf32>
    %368 = vector.broadcast %367 : vector<1x128xf32> to vector<8x128xf32>
    %369 = arith.mulf %368, %0 : vector<8x128xf32>
    %370 = arith.subf %365, %369 : vector<8x128xf32>
    %371 = arith.mulf %370, %370 : vector<8x128xf32>
    %cst_75 = arith.constant dense<0.000000e+00> : vector<128xf32>
    %372 = vector.multi_reduction <add>, %371, %cst_75 [0] : vector<8x128xf32> to vector<128xf32>
    %373 = vector.shape_cast %372 : vector<128xf32> to vector<1x128xf32>
    %374 = vector.extract_strided_slice %370 {offsets = [0, 0], sizes = [1, 128], strides = [1, 1]} : vector<8x128xf32> to vector<1x128xf32>
    %375 = vector.extract_strided_slice %370 {offsets = [0, 0], sizes = [1, 128], strides = [1, 1]} : vector<8x128xf32> to vector<1x128xf32>
    %376 = arith.mulf %374, %375 : vector<1x128xf32>
    %377 = arith.subf %373, %376 : vector<1x128xf32>
    %cst_76 = arith.constant 9.99999993E-9 : f32
    %378 = vector.broadcast %cst_76 : f32 to vector<1x128xf32>
    %379 = arith.maximumf %377, %378 : vector<1x128xf32>
    %380 = math.rsqrt %379 : vector<1x128xf32>
    %381 = arith.mulf %377, %380 : vector<1x128xf32>
    %382 = math.exp %381 : vector<1x128xf32>
    %383 = tpu.reciprocal %382 {approx = true} : vector<1x128xf32> -> vector<1x128xf32>
    %384 = arith.subf %382, %383 : vector<1x128xf32>
    %cst_77 = arith.constant 5.000000e-01 : f32
    %385 = vector.broadcast %cst_77 : f32 to vector<1x128xf32>
    %386 = arith.mulf %385, %384 : vector<1x128xf32>
    %387 = arith.addf %382, %383 : vector<1x128xf32>
    %cst_78 = arith.constant 5.000000e-01 : f32
    %388 = vector.broadcast %cst_78 : f32 to vector<1x128xf32>
    %389 = arith.mulf %388, %387 : vector<1x128xf32>
    %390 = arith.mulf %386, %380 : vector<1x128xf32>
    %391 = vector.broadcast %390 : vector<1x128xf32> to vector<8x128xf32>
    %392 = arith.mulf %391, %370 : vector<8x128xf32>
    %393 = vector.shape_cast %389 : vector<1x128xf32> to vector<1x128xf32>
    %394 = vector.broadcast %393 : vector<1x128xf32> to vector<8x128xf32>
    %395 = arith.select %28, %394, %392 : vector<8x128xi1>, vector<8x128xf32>
    %396 = tpu.concatenate %395, %7 in 0 : vector<8x128xf32>, vector<8x128xf32> -> vector<16x128xf32>
    %cst_79 = arith.constant dense<0.000000e+00> : vector<80x128xf32>
    %397 = tpu.matmul %1, %396, %cst_79 {dimension_numbers = #tpu.dot_dimension_numbers<[1], [0], [0], [1], [0, 0, 1, 1], [], []>} : vector<80x16xf32>, vector<16x128xf32>, vector<80x128xf32> -> vector<80x128xf32>
    %398 = vector.extract_strided_slice %397 {offsets = [0, 0], sizes = [8, 128], strides = [1, 1]} : vector<80x128xf32> to vector<8x128xf32>
    %399 = vector.extract_strided_slice %397 {offsets = [8, 0], sizes = [64, 128], strides = [1, 1]} : vector<80x128xf32> to vector<64x128xf32>
    %400 = vector.extract_strided_slice %397 {offsets = [72, 0], sizes = [8, 128], strides = [1, 1]} : vector<80x128xf32> to vector<8x128xf32>
    %401 = arith.negf %398 : vector<8x128xf32>
    %402 = math.exp %401 : vector<8x128xf32>
    %cst_80 = arith.constant 1.000000e+00 : f32
    %403 = vector.broadcast %cst_80 : f32 to vector<8x128xf32>
    %404 = arith.addf %403, %402 : vector<8x128xf32>
    %405 = arith.divf %403, %404 : vector<8x128xf32>
    %406 = vector.broadcast %2 : vector<8x1xf32> to vector<8x128xf32>
    %407 = arith.mulf %405, %406 : vector<8x128xf32>
    %cst_81 = arith.constant 1.000100e+00 : f32
    %408 = vector.broadcast %cst_81 : f32 to vector<8x128xf32>
    %409 = arith.addf %407, %408 : vector<8x128xf32>
    %cst_82 = arith.constant 0.000000e+00 : f32
    %410 = vector.broadcast %cst_82 : f32 to vector<8x128xf32>
    %411 = arith.subf %410, %400 : vector<8x128xf32>
    %cst_83 = arith.constant 1.00000012 : f32
    %412 = vector.broadcast %cst_83 : f32 to vector<8x128xf32>
    %413 = arith.maximumf %411, %412 : vector<8x128xf32>
    %414 = arith.mulf %413, %413 : vector<8x128xf32>
    %cst_84 = arith.constant 1.000000e+00 : f32
    %415 = vector.broadcast %cst_84 : f32 to vector<8x128xf32>
    %416 = arith.subf %414, %415 : vector<8x128xf32>
    %417 = math.sqrt %416 : vector<8x128xf32>
    %418 = arith.addf %413, %417 : vector<8x128xf32>
    %419 = math.log %418 : vector<8x128xf32>
    %420 = vector.broadcast %330 : vector<1x128xf32> to vector<8x128xf32>
    %421 = arith.mulf %420, %12 : vector<8x128xf32>
    %422 = arith.mulf %419, %421 : vector<8x128xf32>
    %423 = arith.mulf %399, %399 : vector<64x128xf32>
    %cst_85 = arith.constant dense<0.000000e+00> : vector<8x128xf32>
    %424 = tpu.matmul %25, %423, %cst_85 {dimension_numbers = #tpu.dot_dimension_numbers<[1], [0], [0], [1], [0, 0, 1, 1], [], []>} : vector<8x64xf32>, vector<64x128xf32>, vector<8x128xf32> -> vector<8x128xf32>
    %425 = arith.mulf %409, %409 : vector<8x128xf32>
    %cst_86 = arith.constant 1.000000e+00 : f32
    %426 = vector.broadcast %cst_86 : f32 to vector<8x128xf32>
    %427 = arith.subf %425, %426 : vector<8x128xf32>
    %cst_87 = arith.constant 9.99999993E-9 : f32
    %428 = vector.broadcast %cst_87 : f32 to vector<8x128xf32>
    %429 = arith.maximumf %424, %428 : vector<8x128xf32>
    %430 = tpu.reciprocal %429 {approx = true} : vector<8x128xf32> -> vector<8x128xf32>
    %431 = arith.mulf %427, %430 : vector<8x128xf32>
    %432 = math.sqrt %431 : vector<8x128xf32>
    %433 = arith.mulf %422, %432 : vector<8x128xf32>
    %434 = arith.mulf %422, %409 : vector<8x128xf32>
    %cst_88 = arith.constant dense<0.000000e+00> : vector<128xf32>
    %435 = vector.multi_reduction <add>, %434, %cst_88 [0] : vector<8x128xf32> to vector<128xf32>
    %436 = vector.shape_cast %435 : vector<128xf32> to vector<1x128xf32>
    %437 = vector.extract_strided_slice %433 {offsets = [0, 0], sizes = [1, 128], strides = [1, 1]} : vector<8x128xf32> to vector<1x128xf32>
    %438 = vector.extract_strided_slice %399 {offsets = [0, 0], sizes = [16, 128], strides = [1, 1]} : vector<64x128xf32> to vector<16x128xf32>
    %439 = vector.broadcast %437 : vector<1x128xf32> to vector<16x128xf32>
    %440 = arith.mulf %439, %438 : vector<16x128xf32>
    %441 = vector.extract_strided_slice %433 {offsets = [1, 0], sizes = [1, 128], strides = [1, 1]} : vector<8x128xf32> to vector<1x128xf32>
    %442 = vector.extract_strided_slice %399 {offsets = [16, 0], sizes = [16, 128], strides = [1, 1]} : vector<64x128xf32> to vector<16x128xf32>
    %443 = vector.broadcast %441 : vector<1x128xf32> to vector<16x128xf32>
    %444 = arith.mulf %443, %442 : vector<16x128xf32>
    %445 = arith.addf %440, %444 : vector<16x128xf32>
    %446 = vector.extract_strided_slice %433 {offsets = [2, 0], sizes = [1, 128], strides = [1, 1]} : vector<8x128xf32> to vector<1x128xf32>
    %447 = vector.extract_strided_slice %399 {offsets = [32, 0], sizes = [16, 128], strides = [1, 1]} : vector<64x128xf32> to vector<16x128xf32>
    %448 = vector.broadcast %446 : vector<1x128xf32> to vector<16x128xf32>
    %449 = arith.mulf %448, %447 : vector<16x128xf32>
    %450 = arith.addf %445, %449 : vector<16x128xf32>
    %451 = vector.extract_strided_slice %433 {offsets = [3, 0], sizes = [1, 128], strides = [1, 1]} : vector<8x128xf32> to vector<1x128xf32>
    %452 = vector.extract_strided_slice %399 {offsets = [48, 0], sizes = [16, 128], strides = [1, 1]} : vector<64x128xf32> to vector<16x128xf32>
    %453 = vector.broadcast %451 : vector<1x128xf32> to vector<16x128xf32>
    %454 = arith.mulf %453, %452 : vector<16x128xf32>
    %455 = arith.addf %450, %454 : vector<16x128xf32>
    %456 = vector.shape_cast %436 : vector<1x128xf32> to vector<1x128xf32>
    %457 = vector.broadcast %456 : vector<1x128xf32> to vector<16x128xf32>
    %458 = arith.select %31, %457, %455 : vector<16x128xi1>, vector<16x128xf32>
    %459 = arith.mulf %458, %458 : vector<16x128xf32>
    %cst_89 = arith.constant dense<0.000000e+00> : vector<128xf32>
    %460 = vector.multi_reduction <add>, %459, %cst_89 [0] : vector<16x128xf32> to vector<128xf32>
    %461 = vector.shape_cast %460 : vector<128xf32> to vector<1x128xf32>
    %462 = vector.extract_strided_slice %458 {offsets = [0, 0], sizes = [1, 128], strides = [1, 1]} : vector<16x128xf32> to vector<1x128xf32>
    %cst_90 = arith.constant 2.000000e+00 : f32
    %463 = vector.broadcast %cst_90 : f32 to vector<1x128xf32>
    %464 = arith.mulf %463, %462 : vector<1x128xf32>
    %465 = vector.extract_strided_slice %458 {offsets = [0, 0], sizes = [1, 128], strides = [1, 1]} : vector<16x128xf32> to vector<1x128xf32>
    %466 = arith.mulf %464, %465 : vector<1x128xf32>
    %467 = arith.subf %461, %466 : vector<1x128xf32>
    %468 = math.absf %467 : vector<1x128xf32>
    %cst_91 = arith.constant 9.99999993E-9 : f32
    %469 = vector.broadcast %cst_91 : f32 to vector<1x128xf32>
    %470 = arith.maximumf %468, %469 : vector<1x128xf32>
    %471 = math.rsqrt %470 : vector<1x128xf32>
    %472 = vector.broadcast %471 : vector<1x128xf32> to vector<16x128xf32>
    %473 = arith.mulf %458, %472 : vector<16x128xf32>
    %474 = arith.addf %328, %473 : vector<16x128xf32>
    %c0_92 = arith.constant 0 : index
    %c384 = arith.constant 384 : index
    %475 = vector.load %arg2[%c0_92, %c384] : memref<8x1024xf32, #tpu.memory_space<vmem>>, vector<8x128xf32>
    %c3 = arith.constant 3 : index
    %c0_93 = arith.constant 0 : index
    %476 = vector.load %arg3[%c3, %c0_93] : memref<8x128xf32, #tpu.memory_space<vmem>>, vector<1x128xf32>
    %477 = arith.mulf %0, %475 : vector<8x128xf32>
    %cst_94 = arith.constant dense<0.000000e+00> : vector<128xf32>
    %478 = vector.multi_reduction <add>, %477, %cst_94 [0] : vector<8x128xf32> to vector<128xf32>
    %479 = vector.shape_cast %478 : vector<128xf32> to vector<1x128xf32>
    %480 = vector.extract_strided_slice %477 {offsets = [0, 0], sizes = [1, 128], strides = [1, 1]} : vector<8x128xf32> to vector<1x128xf32>
    %cst_95 = arith.constant 2.000000e+00 : f32
    %481 = vector.broadcast %cst_95 : f32 to vector<1x128xf32>
    %482 = arith.mulf %481, %480 : vector<1x128xf32>
    %483 = arith.subf %479, %482 : vector<1x128xf32>
    %cst_96 = arith.constant 0.000000e+00 : f32
    %484 = vector.broadcast %cst_96 : f32 to vector<1x128xf32>
    %485 = arith.subf %484, %483 : vector<1x128xf32>
    %cst_97 = arith.constant 1.00000012 : f32
    %486 = vector.broadcast %cst_97 : f32 to vector<1x128xf32>
    %487 = arith.maximumf %485, %486 : vector<1x128xf32>
    %488 = arith.mulf %487, %487 : vector<1x128xf32>
    %cst_98 = arith.constant 1.000000e+00 : f32
    %489 = vector.broadcast %cst_98 : f32 to vector<1x128xf32>
    %490 = arith.subf %488, %489 : vector<1x128xf32>
    %491 = math.sqrt %490 : vector<1x128xf32>
    %492 = arith.addf %487, %491 : vector<1x128xf32>
    %493 = math.log %492 : vector<1x128xf32>
    %494 = vector.broadcast %483 : vector<1x128xf32> to vector<8x128xf32>
    %495 = arith.mulf %494, %0 : vector<8x128xf32>
    %496 = arith.addf %475, %495 : vector<8x128xf32>
    %497 = arith.mulf %496, %496 : vector<8x128xf32>
    %cst_99 = arith.constant dense<0.000000e+00> : vector<128xf32>
    %498 = vector.multi_reduction <add>, %497, %cst_99 [0] : vector<8x128xf32> to vector<128xf32>
    %499 = vector.shape_cast %498 : vector<128xf32> to vector<1x128xf32>
    %500 = vector.extract_strided_slice %496 {offsets = [0, 0], sizes = [1, 128], strides = [1, 1]} : vector<8x128xf32> to vector<1x128xf32>
    %cst_100 = arith.constant 2.000000e+00 : f32
    %501 = vector.broadcast %cst_100 : f32 to vector<1x128xf32>
    %502 = arith.mulf %501, %500 : vector<1x128xf32>
    %503 = vector.extract_strided_slice %496 {offsets = [0, 0], sizes = [1, 128], strides = [1, 1]} : vector<8x128xf32> to vector<1x128xf32>
    %504 = arith.mulf %502, %503 : vector<1x128xf32>
    %505 = arith.subf %499, %504 : vector<1x128xf32>
    %cst_101 = arith.constant 9.99999993E-9 : f32
    %506 = vector.broadcast %cst_101 : f32 to vector<1x128xf32>
    %507 = arith.maximumf %505, %506 : vector<1x128xf32>
    %508 = math.rsqrt %507 : vector<1x128xf32>
    %509 = arith.mulf %493, %508 : vector<1x128xf32>
    %510 = vector.broadcast %509 : vector<1x128xf32> to vector<8x128xf32>
    %511 = arith.mulf %510, %496 : vector<8x128xf32>
    %512 = vector.extract_strided_slice %511 {offsets = [0, 0], sizes = [1, 128], strides = [1, 1]} : vector<8x128xf32> to vector<1x128xf32>
    %513 = arith.mulf %512, %35 : vector<1x128xf32>
    %514 = vector.broadcast %513 : vector<1x128xf32> to vector<8x128xf32>
    %515 = arith.mulf %514, %0 : vector<8x128xf32>
    %516 = arith.subf %511, %515 : vector<8x128xf32>
    %517 = arith.mulf %516, %516 : vector<8x128xf32>
    %cst_102 = arith.constant dense<0.000000e+00> : vector<128xf32>
    %518 = vector.multi_reduction <add>, %517, %cst_102 [0] : vector<8x128xf32> to vector<128xf32>
    %519 = vector.shape_cast %518 : vector<128xf32> to vector<1x128xf32>
    %520 = vector.extract_strided_slice %516 {offsets = [0, 0], sizes = [1, 128], strides = [1, 1]} : vector<8x128xf32> to vector<1x128xf32>
    %521 = vector.extract_strided_slice %516 {offsets = [0, 0], sizes = [1, 128], strides = [1, 1]} : vector<8x128xf32> to vector<1x128xf32>
    %522 = arith.mulf %520, %521 : vector<1x128xf32>
    %523 = arith.subf %519, %522 : vector<1x128xf32>
    %cst_103 = arith.constant 9.99999993E-9 : f32
    %524 = vector.broadcast %cst_103 : f32 to vector<1x128xf32>
    %525 = arith.maximumf %523, %524 : vector<1x128xf32>
    %526 = math.rsqrt %525 : vector<1x128xf32>
    %527 = arith.mulf %523, %526 : vector<1x128xf32>
    %528 = math.exp %527 : vector<1x128xf32>
    %529 = tpu.reciprocal %528 {approx = true} : vector<1x128xf32> -> vector<1x128xf32>
    %530 = arith.subf %528, %529 : vector<1x128xf32>
    %cst_104 = arith.constant 5.000000e-01 : f32
    %531 = vector.broadcast %cst_104 : f32 to vector<1x128xf32>
    %532 = arith.mulf %531, %530 : vector<1x128xf32>
    %533 = arith.addf %528, %529 : vector<1x128xf32>
    %cst_105 = arith.constant 5.000000e-01 : f32
    %534 = vector.broadcast %cst_105 : f32 to vector<1x128xf32>
    %535 = arith.mulf %534, %533 : vector<1x128xf32>
    %536 = arith.mulf %532, %526 : vector<1x128xf32>
    %537 = vector.broadcast %536 : vector<1x128xf32> to vector<8x128xf32>
    %538 = arith.mulf %537, %516 : vector<8x128xf32>
    %539 = vector.shape_cast %535 : vector<1x128xf32> to vector<1x128xf32>
    %540 = vector.broadcast %539 : vector<1x128xf32> to vector<8x128xf32>
    %541 = arith.select %28, %540, %538 : vector<8x128xi1>, vector<8x128xf32>
    %542 = tpu.concatenate %541, %7 in 0 : vector<8x128xf32>, vector<8x128xf32> -> vector<16x128xf32>
    %cst_106 = arith.constant dense<0.000000e+00> : vector<80x128xf32>
    %543 = tpu.matmul %1, %542, %cst_106 {dimension_numbers = #tpu.dot_dimension_numbers<[1], [0], [0], [1], [0, 0, 1, 1], [], []>} : vector<80x16xf32>, vector<16x128xf32>, vector<80x128xf32> -> vector<80x128xf32>
    %544 = vector.extract_strided_slice %543 {offsets = [0, 0], sizes = [8, 128], strides = [1, 1]} : vector<80x128xf32> to vector<8x128xf32>
    %545 = vector.extract_strided_slice %543 {offsets = [8, 0], sizes = [64, 128], strides = [1, 1]} : vector<80x128xf32> to vector<64x128xf32>
    %546 = vector.extract_strided_slice %543 {offsets = [72, 0], sizes = [8, 128], strides = [1, 1]} : vector<80x128xf32> to vector<8x128xf32>
    %547 = arith.negf %544 : vector<8x128xf32>
    %548 = math.exp %547 : vector<8x128xf32>
    %cst_107 = arith.constant 1.000000e+00 : f32
    %549 = vector.broadcast %cst_107 : f32 to vector<8x128xf32>
    %550 = arith.addf %549, %548 : vector<8x128xf32>
    %551 = arith.divf %549, %550 : vector<8x128xf32>
    %552 = vector.broadcast %2 : vector<8x1xf32> to vector<8x128xf32>
    %553 = arith.mulf %551, %552 : vector<8x128xf32>
    %cst_108 = arith.constant 1.000100e+00 : f32
    %554 = vector.broadcast %cst_108 : f32 to vector<8x128xf32>
    %555 = arith.addf %553, %554 : vector<8x128xf32>
    %cst_109 = arith.constant 0.000000e+00 : f32
    %556 = vector.broadcast %cst_109 : f32 to vector<8x128xf32>
    %557 = arith.subf %556, %546 : vector<8x128xf32>
    %cst_110 = arith.constant 1.00000012 : f32
    %558 = vector.broadcast %cst_110 : f32 to vector<8x128xf32>
    %559 = arith.maximumf %557, %558 : vector<8x128xf32>
    %560 = arith.mulf %559, %559 : vector<8x128xf32>
    %cst_111 = arith.constant 1.000000e+00 : f32
    %561 = vector.broadcast %cst_111 : f32 to vector<8x128xf32>
    %562 = arith.subf %560, %561 : vector<8x128xf32>
    %563 = math.sqrt %562 : vector<8x128xf32>
    %564 = arith.addf %559, %563 : vector<8x128xf32>
    %565 = math.log %564 : vector<8x128xf32>
    %566 = vector.broadcast %476 : vector<1x128xf32> to vector<8x128xf32>
    %567 = arith.mulf %566, %12 : vector<8x128xf32>
    %568 = arith.mulf %565, %567 : vector<8x128xf32>
    %569 = arith.mulf %545, %545 : vector<64x128xf32>
    %cst_112 = arith.constant dense<0.000000e+00> : vector<8x128xf32>
    %570 = tpu.matmul %25, %569, %cst_112 {dimension_numbers = #tpu.dot_dimension_numbers<[1], [0], [0], [1], [0, 0, 1, 1], [], []>} : vector<8x64xf32>, vector<64x128xf32>, vector<8x128xf32> -> vector<8x128xf32>
    %571 = arith.mulf %555, %555 : vector<8x128xf32>
    %cst_113 = arith.constant 1.000000e+00 : f32
    %572 = vector.broadcast %cst_113 : f32 to vector<8x128xf32>
    %573 = arith.subf %571, %572 : vector<8x128xf32>
    %cst_114 = arith.constant 9.99999993E-9 : f32
    %574 = vector.broadcast %cst_114 : f32 to vector<8x128xf32>
    %575 = arith.maximumf %570, %574 : vector<8x128xf32>
    %576 = tpu.reciprocal %575 {approx = true} : vector<8x128xf32> -> vector<8x128xf32>
    %577 = arith.mulf %573, %576 : vector<8x128xf32>
    %578 = math.sqrt %577 : vector<8x128xf32>
    %579 = arith.mulf %568, %578 : vector<8x128xf32>
    %580 = arith.mulf %568, %555 : vector<8x128xf32>
    %cst_115 = arith.constant dense<0.000000e+00> : vector<128xf32>
    %581 = vector.multi_reduction <add>, %580, %cst_115 [0] : vector<8x128xf32> to vector<128xf32>
    %582 = vector.shape_cast %581 : vector<128xf32> to vector<1x128xf32>
    %583 = vector.extract_strided_slice %579 {offsets = [0, 0], sizes = [1, 128], strides = [1, 1]} : vector<8x128xf32> to vector<1x128xf32>
    %584 = vector.extract_strided_slice %545 {offsets = [0, 0], sizes = [16, 128], strides = [1, 1]} : vector<64x128xf32> to vector<16x128xf32>
    %585 = vector.broadcast %583 : vector<1x128xf32> to vector<16x128xf32>
    %586 = arith.mulf %585, %584 : vector<16x128xf32>
    %587 = vector.extract_strided_slice %579 {offsets = [1, 0], sizes = [1, 128], strides = [1, 1]} : vector<8x128xf32> to vector<1x128xf32>
    %588 = vector.extract_strided_slice %545 {offsets = [16, 0], sizes = [16, 128], strides = [1, 1]} : vector<64x128xf32> to vector<16x128xf32>
    %589 = vector.broadcast %587 : vector<1x128xf32> to vector<16x128xf32>
    %590 = arith.mulf %589, %588 : vector<16x128xf32>
    %591 = arith.addf %586, %590 : vector<16x128xf32>
    %592 = vector.extract_strided_slice %579 {offsets = [2, 0], sizes = [1, 128], strides = [1, 1]} : vector<8x128xf32> to vector<1x128xf32>
    %593 = vector.extract_strided_slice %545 {offsets = [32, 0], sizes = [16, 128], strides = [1, 1]} : vector<64x128xf32> to vector<16x128xf32>
    %594 = vector.broadcast %592 : vector<1x128xf32> to vector<16x128xf32>
    %595 = arith.mulf %594, %593 : vector<16x128xf32>
    %596 = arith.addf %591, %595 : vector<16x128xf32>
    %597 = vector.extract_strided_slice %579 {offsets = [3, 0], sizes = [1, 128], strides = [1, 1]} : vector<8x128xf32> to vector<1x128xf32>
    %598 = vector.extract_strided_slice %545 {offsets = [48, 0], sizes = [16, 128], strides = [1, 1]} : vector<64x128xf32> to vector<16x128xf32>
    %599 = vector.broadcast %597 : vector<1x128xf32> to vector<16x128xf32>
    %600 = arith.mulf %599, %598 : vector<16x128xf32>
    %601 = arith.addf %596, %600 : vector<16x128xf32>
    %602 = vector.shape_cast %582 : vector<1x128xf32> to vector<1x128xf32>
    %603 = vector.broadcast %602 : vector<1x128xf32> to vector<16x128xf32>
    %604 = arith.select %31, %603, %601 : vector<16x128xi1>, vector<16x128xf32>
    %605 = arith.mulf %604, %604 : vector<16x128xf32>
    %cst_116 = arith.constant dense<0.000000e+00> : vector<128xf32>
    %606 = vector.multi_reduction <add>, %605, %cst_116 [0] : vector<16x128xf32> to vector<128xf32>
    %607 = vector.shape_cast %606 : vector<128xf32> to vector<1x128xf32>
    %608 = vector.extract_strided_slice %604 {offsets = [0, 0], sizes = [1, 128], strides = [1, 1]} : vector<16x128xf32> to vector<1x128xf32>
    %cst_117 = arith.constant 2.000000e+00 : f32
    %609 = vector.broadcast %cst_117 : f32 to vector<1x128xf32>
    %610 = arith.mulf %609, %608 : vector<1x128xf32>
    %611 = vector.extract_strided_slice %604 {offsets = [0, 0], sizes = [1, 128], strides = [1, 1]} : vector<16x128xf32> to vector<1x128xf32>
    %612 = arith.mulf %610, %611 : vector<1x128xf32>
    %613 = arith.subf %607, %612 : vector<1x128xf32>
    %614 = math.absf %613 : vector<1x128xf32>
    %cst_118 = arith.constant 9.99999993E-9 : f32
    %615 = vector.broadcast %cst_118 : f32 to vector<1x128xf32>
    %616 = arith.maximumf %614, %615 : vector<1x128xf32>
    %617 = math.rsqrt %616 : vector<1x128xf32>
    %618 = vector.broadcast %617 : vector<1x128xf32> to vector<16x128xf32>
    %619 = arith.mulf %604, %618 : vector<16x128xf32>
    %620 = arith.addf %474, %619 : vector<16x128xf32>
    %c0_119 = arith.constant 0 : index
    %c512 = arith.constant 512 : index
    %621 = vector.load %arg2[%c0_119, %c512] : memref<8x1024xf32, #tpu.memory_space<vmem>>, vector<8x128xf32>
    %c4 = arith.constant 4 : index
    %c0_120 = arith.constant 0 : index
    %622 = vector.load %arg3[%c4, %c0_120] : memref<8x128xf32, #tpu.memory_space<vmem>>, vector<1x128xf32>
    %623 = arith.mulf %0, %621 : vector<8x128xf32>
    %cst_121 = arith.constant dense<0.000000e+00> : vector<128xf32>
    %624 = vector.multi_reduction <add>, %623, %cst_121 [0] : vector<8x128xf32> to vector<128xf32>
    %625 = vector.shape_cast %624 : vector<128xf32> to vector<1x128xf32>
    %626 = vector.extract_strided_slice %623 {offsets = [0, 0], sizes = [1, 128], strides = [1, 1]} : vector<8x128xf32> to vector<1x128xf32>
    %cst_122 = arith.constant 2.000000e+00 : f32
    %627 = vector.broadcast %cst_122 : f32 to vector<1x128xf32>
    %628 = arith.mulf %627, %626 : vector<1x128xf32>
    %629 = arith.subf %625, %628 : vector<1x128xf32>
    %cst_123 = arith.constant 0.000000e+00 : f32
    %630 = vector.broadcast %cst_123 : f32 to vector<1x128xf32>
    %631 = arith.subf %630, %629 : vector<1x128xf32>
    %cst_124 = arith.constant 1.00000012 : f32
    %632 = vector.broadcast %cst_124 : f32 to vector<1x128xf32>
    %633 = arith.maximumf %631, %632 : vector<1x128xf32>
    %634 = arith.mulf %633, %633 : vector<1x128xf32>
    %cst_125 = arith.constant 1.000000e+00 : f32
    %635 = vector.broadcast %cst_125 : f32 to vector<1x128xf32>
    %636 = arith.subf %634, %635 : vector<1x128xf32>
    %637 = math.sqrt %636 : vector<1x128xf32>
    %638 = arith.addf %633, %637 : vector<1x128xf32>
    %639 = math.log %638 : vector<1x128xf32>
    %640 = vector.broadcast %629 : vector<1x128xf32> to vector<8x128xf32>
    %641 = arith.mulf %640, %0 : vector<8x128xf32>
    %642 = arith.addf %621, %641 : vector<8x128xf32>
    %643 = arith.mulf %642, %642 : vector<8x128xf32>
    %cst_126 = arith.constant dense<0.000000e+00> : vector<128xf32>
    %644 = vector.multi_reduction <add>, %643, %cst_126 [0] : vector<8x128xf32> to vector<128xf32>
    %645 = vector.shape_cast %644 : vector<128xf32> to vector<1x128xf32>
    %646 = vector.extract_strided_slice %642 {offsets = [0, 0], sizes = [1, 128], strides = [1, 1]} : vector<8x128xf32> to vector<1x128xf32>
    %cst_127 = arith.constant 2.000000e+00 : f32
    %647 = vector.broadcast %cst_127 : f32 to vector<1x128xf32>
    %648 = arith.mulf %647, %646 : vector<1x128xf32>
    %649 = vector.extract_strided_slice %642 {offsets = [0, 0], sizes = [1, 128], strides = [1, 1]} : vector<8x128xf32> to vector<1x128xf32>
    %650 = arith.mulf %648, %649 : vector<1x128xf32>
    %651 = arith.subf %645, %650 : vector<1x128xf32>
    %cst_128 = arith.constant 9.99999993E-9 : f32
    %652 = vector.broadcast %cst_128 : f32 to vector<1x128xf32>
    %653 = arith.maximumf %651, %652 : vector<1x128xf32>
    %654 = math.rsqrt %653 : vector<1x128xf32>
    %655 = arith.mulf %639, %654 : vector<1x128xf32>
    %656 = vector.broadcast %655 : vector<1x128xf32> to vector<8x128xf32>
    %657 = arith.mulf %656, %642 : vector<8x128xf32>
    %658 = vector.extract_strided_slice %657 {offsets = [0, 0], sizes = [1, 128], strides = [1, 1]} : vector<8x128xf32> to vector<1x128xf32>
    %659 = arith.mulf %658, %35 : vector<1x128xf32>
    %660 = vector.broadcast %659 : vector<1x128xf32> to vector<8x128xf32>
    %661 = arith.mulf %660, %0 : vector<8x128xf32>
    %662 = arith.subf %657, %661 : vector<8x128xf32>
    %663 = arith.mulf %662, %662 : vector<8x128xf32>
    %cst_129 = arith.constant dense<0.000000e+00> : vector<128xf32>
    %664 = vector.multi_reduction <add>, %663, %cst_129 [0] : vector<8x128xf32> to vector<128xf32>
    %665 = vector.shape_cast %664 : vector<128xf32> to vector<1x128xf32>
    %666 = vector.extract_strided_slice %662 {offsets = [0, 0], sizes = [1, 128], strides = [1, 1]} : vector<8x128xf32> to vector<1x128xf32>
    %667 = vector.extract_strided_slice %662 {offsets = [0, 0], sizes = [1, 128], strides = [1, 1]} : vector<8x128xf32> to vector<1x128xf32>
    %668 = arith.mulf %666, %667 : vector<1x128xf32>
    %669 = arith.subf %665, %668 : vector<1x128xf32>
    %cst_130 = arith.constant 9.99999993E-9 : f32
    %670 = vector.broadcast %cst_130 : f32 to vector<1x128xf32>
    %671 = arith.maximumf %669, %670 : vector<1x128xf32>
    %672 = math.rsqrt %671 : vector<1x128xf32>
    %673 = arith.mulf %669, %672 : vector<1x128xf32>
    %674 = math.exp %673 : vector<1x128xf32>
    %675 = tpu.reciprocal %674 {approx = true} : vector<1x128xf32> -> vector<1x128xf32>
    %676 = arith.subf %674, %675 : vector<1x128xf32>
    %cst_131 = arith.constant 5.000000e-01 : f32
    %677 = vector.broadcast %cst_131 : f32 to vector<1x128xf32>
    %678 = arith.mulf %677, %676 : vector<1x128xf32>
    %679 = arith.addf %674, %675 : vector<1x128xf32>
    %cst_132 = arith.constant 5.000000e-01 : f32
    %680 = vector.broadcast %cst_132 : f32 to vector<1x128xf32>
    %681 = arith.mulf %680, %679 : vector<1x128xf32>
    %682 = arith.mulf %678, %672 : vector<1x128xf32>
    %683 = vector.broadcast %682 : vector<1x128xf32> to vector<8x128xf32>
    %684 = arith.mulf %683, %662 : vector<8x128xf32>
    %685 = vector.shape_cast %681 : vector<1x128xf32> to vector<1x128xf32>
    %686 = vector.broadcast %685 : vector<1x128xf32> to vector<8x128xf32>
    %687 = arith.select %28, %686, %684 : vector<8x128xi1>, vector<8x128xf32>
    %688 = tpu.concatenate %687, %7 in 0 : vector<8x128xf32>, vector<8x128xf32> -> vector<16x128xf32>
    %cst_133 = arith.constant dense<0.000000e+00> : vector<80x128xf32>
    %689 = tpu.matmul %1, %688, %cst_133 {dimension_numbers = #tpu.dot_dimension_numbers<[1], [0], [0], [1], [0, 0, 1, 1], [], []>} : vector<80x16xf32>, vector<16x128xf32>, vector<80x128xf32> -> vector<80x128xf32>
    %690 = vector.extract_strided_slice %689 {offsets = [0, 0], sizes = [8, 128], strides = [1, 1]} : vector<80x128xf32> to vector<8x128xf32>
    %691 = vector.extract_strided_slice %689 {offsets = [8, 0], sizes = [64, 128], strides = [1, 1]} : vector<80x128xf32> to vector<64x128xf32>
    %692 = vector.extract_strided_slice %689 {offsets = [72, 0], sizes = [8, 128], strides = [1, 1]} : vector<80x128xf32> to vector<8x128xf32>
    %693 = arith.negf %690 : vector<8x128xf32>
    %694 = math.exp %693 : vector<8x128xf32>
    %cst_134 = arith.constant 1.000000e+00 : f32
    %695 = vector.broadcast %cst_134 : f32 to vector<8x128xf32>
    %696 = arith.addf %695, %694 : vector<8x128xf32>
    %697 = arith.divf %695, %696 : vector<8x128xf32>
    %698 = vector.broadcast %2 : vector<8x1xf32> to vector<8x128xf32>
    %699 = arith.mulf %697, %698 : vector<8x128xf32>
    %cst_135 = arith.constant 1.000100e+00 : f32
    %700 = vector.broadcast %cst_135 : f32 to vector<8x128xf32>
    %701 = arith.addf %699, %700 : vector<8x128xf32>
    %cst_136 = arith.constant 0.000000e+00 : f32
    %702 = vector.broadcast %cst_136 : f32 to vector<8x128xf32>
    %703 = arith.subf %702, %692 : vector<8x128xf32>
    %cst_137 = arith.constant 1.00000012 : f32
    %704 = vector.broadcast %cst_137 : f32 to vector<8x128xf32>
    %705 = arith.maximumf %703, %704 : vector<8x128xf32>
    %706 = arith.mulf %705, %705 : vector<8x128xf32>
    %cst_138 = arith.constant 1.000000e+00 : f32
    %707 = vector.broadcast %cst_138 : f32 to vector<8x128xf32>
    %708 = arith.subf %706, %707 : vector<8x128xf32>
    %709 = math.sqrt %708 : vector<8x128xf32>
    %710 = arith.addf %705, %709 : vector<8x128xf32>
    %711 = math.log %710 : vector<8x128xf32>
    %712 = vector.broadcast %622 : vector<1x128xf32> to vector<8x128xf32>
    %713 = arith.mulf %712, %12 : vector<8x128xf32>
    %714 = arith.mulf %711, %713 : vector<8x128xf32>
    %715 = arith.mulf %691, %691 : vector<64x128xf32>
    %cst_139 = arith.constant dense<0.000000e+00> : vector<8x128xf32>
    %716 = tpu.matmul %25, %715, %cst_139 {dimension_numbers = #tpu.dot_dimension_numbers<[1], [0], [0], [1], [0, 0, 1, 1], [], []>} : vector<8x64xf32>, vector<64x128xf32>, vector<8x128xf32> -> vector<8x128xf32>
    %717 = arith.mulf %701, %701 : vector<8x128xf32>
    %cst_140 = arith.constant 1.000000e+00 : f32
    %718 = vector.broadcast %cst_140 : f32 to vector<8x128xf32>
    %719 = arith.subf %717, %718 : vector<8x128xf32>
    %cst_141 = arith.constant 9.99999993E-9 : f32
    %720 = vector.broadcast %cst_141 : f32 to vector<8x128xf32>
    %721 = arith.maximumf %716, %720 : vector<8x128xf32>
    %722 = tpu.reciprocal %721 {approx = true} : vector<8x128xf32> -> vector<8x128xf32>
    %723 = arith.mulf %719, %722 : vector<8x128xf32>
    %724 = math.sqrt %723 : vector<8x128xf32>
    %725 = arith.mulf %714, %724 : vector<8x128xf32>
    %726 = arith.mulf %714, %701 : vector<8x128xf32>
    %cst_142 = arith.constant dense<0.000000e+00> : vector<128xf32>
    %727 = vector.multi_reduction <add>, %726, %cst_142 [0] : vector<8x128xf32> to vector<128xf32>
    %728 = vector.shape_cast %727 : vector<128xf32> to vector<1x128xf32>
    %729 = vector.extract_strided_slice %725 {offsets = [0, 0], sizes = [1, 128], strides = [1, 1]} : vector<8x128xf32> to vector<1x128xf32>
    %730 = vector.extract_strided_slice %691 {offsets = [0, 0], sizes = [16, 128], strides = [1, 1]} : vector<64x128xf32> to vector<16x128xf32>
    %731 = vector.broadcast %729 : vector<1x128xf32> to vector<16x128xf32>
    %732 = arith.mulf %731, %730 : vector<16x128xf32>
    %733 = vector.extract_strided_slice %725 {offsets = [1, 0], sizes = [1, 128], strides = [1, 1]} : vector<8x128xf32> to vector<1x128xf32>
    %734 = vector.extract_strided_slice %691 {offsets = [16, 0], sizes = [16, 128], strides = [1, 1]} : vector<64x128xf32> to vector<16x128xf32>
    %735 = vector.broadcast %733 : vector<1x128xf32> to vector<16x128xf32>
    %736 = arith.mulf %735, %734 : vector<16x128xf32>
    %737 = arith.addf %732, %736 : vector<16x128xf32>
    %738 = vector.extract_strided_slice %725 {offsets = [2, 0], sizes = [1, 128], strides = [1, 1]} : vector<8x128xf32> to vector<1x128xf32>
    %739 = vector.extract_strided_slice %691 {offsets = [32, 0], sizes = [16, 128], strides = [1, 1]} : vector<64x128xf32> to vector<16x128xf32>
    %740 = vector.broadcast %738 : vector<1x128xf32> to vector<16x128xf32>
    %741 = arith.mulf %740, %739 : vector<16x128xf32>
    %742 = arith.addf %737, %741 : vector<16x128xf32>
    %743 = vector.extract_strided_slice %725 {offsets = [3, 0], sizes = [1, 128], strides = [1, 1]} : vector<8x128xf32> to vector<1x128xf32>
    %744 = vector.extract_strided_slice %691 {offsets = [48, 0], sizes = [16, 128], strides = [1, 1]} : vector<64x128xf32> to vector<16x128xf32>
    %745 = vector.broadcast %743 : vector<1x128xf32> to vector<16x128xf32>
    %746 = arith.mulf %745, %744 : vector<16x128xf32>
    %747 = arith.addf %742, %746 : vector<16x128xf32>
    %748 = vector.shape_cast %728 : vector<1x128xf32> to vector<1x128xf32>
    %749 = vector.broadcast %748 : vector<1x128xf32> to vector<16x128xf32>
    %750 = arith.select %31, %749, %747 : vector<16x128xi1>, vector<16x128xf32>
    %751 = arith.mulf %750, %750 : vector<16x128xf32>
    %cst_143 = arith.constant dense<0.000000e+00> : vector<128xf32>
    %752 = vector.multi_reduction <add>, %751, %cst_143 [0] : vector<16x128xf32> to vector<128xf32>
    %753 = vector.shape_cast %752 : vector<128xf32> to vector<1x128xf32>
    %754 = vector.extract_strided_slice %750 {offsets = [0, 0], sizes = [1, 128], strides = [1, 1]} : vector<16x128xf32> to vector<1x128xf32>
    %cst_144 = arith.constant 2.000000e+00 : f32
    %755 = vector.broadcast %cst_144 : f32 to vector<1x128xf32>
    %756 = arith.mulf %755, %754 : vector<1x128xf32>
    %757 = vector.extract_strided_slice %750 {offsets = [0, 0], sizes = [1, 128], strides = [1, 1]} : vector<16x128xf32> to vector<1x128xf32>
    %758 = arith.mulf %756, %757 : vector<1x128xf32>
    %759 = arith.subf %753, %758 : vector<1x128xf32>
    %760 = math.absf %759 : vector<1x128xf32>
    %cst_145 = arith.constant 9.99999993E-9 : f32
    %761 = vector.broadcast %cst_145 : f32 to vector<1x128xf32>
    %762 = arith.maximumf %760, %761 : vector<1x128xf32>
    %763 = math.rsqrt %762 : vector<1x128xf32>
    %764 = vector.broadcast %763 : vector<1x128xf32> to vector<16x128xf32>
    %765 = arith.mulf %750, %764 : vector<16x128xf32>
    %766 = arith.addf %620, %765 : vector<16x128xf32>
    %c0_146 = arith.constant 0 : index
    %c640 = arith.constant 640 : index
    %767 = vector.load %arg2[%c0_146, %c640] : memref<8x1024xf32, #tpu.memory_space<vmem>>, vector<8x128xf32>
    %c5 = arith.constant 5 : index
    %c0_147 = arith.constant 0 : index
    %768 = vector.load %arg3[%c5, %c0_147] : memref<8x128xf32, #tpu.memory_space<vmem>>, vector<1x128xf32>
    %769 = arith.mulf %0, %767 : vector<8x128xf32>
    %cst_148 = arith.constant dense<0.000000e+00> : vector<128xf32>
    %770 = vector.multi_reduction <add>, %769, %cst_148 [0] : vector<8x128xf32> to vector<128xf32>
    %771 = vector.shape_cast %770 : vector<128xf32> to vector<1x128xf32>
    %772 = vector.extract_strided_slice %769 {offsets = [0, 0], sizes = [1, 128], strides = [1, 1]} : vector<8x128xf32> to vector<1x128xf32>
    %cst_149 = arith.constant 2.000000e+00 : f32
    %773 = vector.broadcast %cst_149 : f32 to vector<1x128xf32>
    %774 = arith.mulf %773, %772 : vector<1x128xf32>
    %775 = arith.subf %771, %774 : vector<1x128xf32>
    %cst_150 = arith.constant 0.000000e+00 : f32
    %776 = vector.broadcast %cst_150 : f32 to vector<1x128xf32>
    %777 = arith.subf %776, %775 : vector<1x128xf32>
    %cst_151 = arith.constant 1.00000012 : f32
    %778 = vector.broadcast %cst_151 : f32 to vector<1x128xf32>
    %779 = arith.maximumf %777, %778 : vector<1x128xf32>
    %780 = arith.mulf %779, %779 : vector<1x128xf32>
    %cst_152 = arith.constant 1.000000e+00 : f32
    %781 = vector.broadcast %cst_152 : f32 to vector<1x128xf32>
    %782 = arith.subf %780, %781 : vector<1x128xf32>
    %783 = math.sqrt %782 : vector<1x128xf32>
    %784 = arith.addf %779, %783 : vector<1x128xf32>
    %785 = math.log %784 : vector<1x128xf32>
    %786 = vector.broadcast %775 : vector<1x128xf32> to vector<8x128xf32>
    %787 = arith.mulf %786, %0 : vector<8x128xf32>
    %788 = arith.addf %767, %787 : vector<8x128xf32>
    %789 = arith.mulf %788, %788 : vector<8x128xf32>
    %cst_153 = arith.constant dense<0.000000e+00> : vector<128xf32>
    %790 = vector.multi_reduction <add>, %789, %cst_153 [0] : vector<8x128xf32> to vector<128xf32>
    %791 = vector.shape_cast %790 : vector<128xf32> to vector<1x128xf32>
    %792 = vector.extract_strided_slice %788 {offsets = [0, 0], sizes = [1, 128], strides = [1, 1]} : vector<8x128xf32> to vector<1x128xf32>
    %cst_154 = arith.constant 2.000000e+00 : f32
    %793 = vector.broadcast %cst_154 : f32 to vector<1x128xf32>
    %794 = arith.mulf %793, %792 : vector<1x128xf32>
    %795 = vector.extract_strided_slice %788 {offsets = [0, 0], sizes = [1, 128], strides = [1, 1]} : vector<8x128xf32> to vector<1x128xf32>
    %796 = arith.mulf %794, %795 : vector<1x128xf32>
    %797 = arith.subf %791, %796 : vector<1x128xf32>
    %cst_155 = arith.constant 9.99999993E-9 : f32
    %798 = vector.broadcast %cst_155 : f32 to vector<1x128xf32>
    %799 = arith.maximumf %797, %798 : vector<1x128xf32>
    %800 = math.rsqrt %799 : vector<1x128xf32>
    %801 = arith.mulf %785, %800 : vector<1x128xf32>
    %802 = vector.broadcast %801 : vector<1x128xf32> to vector<8x128xf32>
    %803 = arith.mulf %802, %788 : vector<8x128xf32>
    %804 = vector.extract_strided_slice %803 {offsets = [0, 0], sizes = [1, 128], strides = [1, 1]} : vector<8x128xf32> to vector<1x128xf32>
    %805 = arith.mulf %804, %35 : vector<1x128xf32>
    %806 = vector.broadcast %805 : vector<1x128xf32> to vector<8x128xf32>
    %807 = arith.mulf %806, %0 : vector<8x128xf32>
    %808 = arith.subf %803, %807 : vector<8x128xf32>
    %809 = arith.mulf %808, %808 : vector<8x128xf32>
    %cst_156 = arith.constant dense<0.000000e+00> : vector<128xf32>
    %810 = vector.multi_reduction <add>, %809, %cst_156 [0] : vector<8x128xf32> to vector<128xf32>
    %811 = vector.shape_cast %810 : vector<128xf32> to vector<1x128xf32>
    %812 = vector.extract_strided_slice %808 {offsets = [0, 0], sizes = [1, 128], strides = [1, 1]} : vector<8x128xf32> to vector<1x128xf32>
    %813 = vector.extract_strided_slice %808 {offsets = [0, 0], sizes = [1, 128], strides = [1, 1]} : vector<8x128xf32> to vector<1x128xf32>
    %814 = arith.mulf %812, %813 : vector<1x128xf32>
    %815 = arith.subf %811, %814 : vector<1x128xf32>
    %cst_157 = arith.constant 9.99999993E-9 : f32
    %816 = vector.broadcast %cst_157 : f32 to vector<1x128xf32>
    %817 = arith.maximumf %815, %816 : vector<1x128xf32>
    %818 = math.rsqrt %817 : vector<1x128xf32>
    %819 = arith.mulf %815, %818 : vector<1x128xf32>
    %820 = math.exp %819 : vector<1x128xf32>
    %821 = tpu.reciprocal %820 {approx = true} : vector<1x128xf32> -> vector<1x128xf32>
    %822 = arith.subf %820, %821 : vector<1x128xf32>
    %cst_158 = arith.constant 5.000000e-01 : f32
    %823 = vector.broadcast %cst_158 : f32 to vector<1x128xf32>
    %824 = arith.mulf %823, %822 : vector<1x128xf32>
    %825 = arith.addf %820, %821 : vector<1x128xf32>
    %cst_159 = arith.constant 5.000000e-01 : f32
    %826 = vector.broadcast %cst_159 : f32 to vector<1x128xf32>
    %827 = arith.mulf %826, %825 : vector<1x128xf32>
    %828 = arith.mulf %824, %818 : vector<1x128xf32>
    %829 = vector.broadcast %828 : vector<1x128xf32> to vector<8x128xf32>
    %830 = arith.mulf %829, %808 : vector<8x128xf32>
    %831 = vector.shape_cast %827 : vector<1x128xf32> to vector<1x128xf32>
    %832 = vector.broadcast %831 : vector<1x128xf32> to vector<8x128xf32>
    %833 = arith.select %28, %832, %830 : vector<8x128xi1>, vector<8x128xf32>
    %834 = tpu.concatenate %833, %7 in 0 : vector<8x128xf32>, vector<8x128xf32> -> vector<16x128xf32>
    %cst_160 = arith.constant dense<0.000000e+00> : vector<80x128xf32>
    %835 = tpu.matmul %1, %834, %cst_160 {dimension_numbers = #tpu.dot_dimension_numbers<[1], [0], [0], [1], [0, 0, 1, 1], [], []>} : vector<80x16xf32>, vector<16x128xf32>, vector<80x128xf32> -> vector<80x128xf32>
    %836 = vector.extract_strided_slice %835 {offsets = [0, 0], sizes = [8, 128], strides = [1, 1]} : vector<80x128xf32> to vector<8x128xf32>
    %837 = vector.extract_strided_slice %835 {offsets = [8, 0], sizes = [64, 128], strides = [1, 1]} : vector<80x128xf32> to vector<64x128xf32>
    %838 = vector.extract_strided_slice %835 {offsets = [72, 0], sizes = [8, 128], strides = [1, 1]} : vector<80x128xf32> to vector<8x128xf32>
    %839 = arith.negf %836 : vector<8x128xf32>
    %840 = math.exp %839 : vector<8x128xf32>
    %cst_161 = arith.constant 1.000000e+00 : f32
    %841 = vector.broadcast %cst_161 : f32 to vector<8x128xf32>
    %842 = arith.addf %841, %840 : vector<8x128xf32>
    %843 = arith.divf %841, %842 : vector<8x128xf32>
    %844 = vector.broadcast %2 : vector<8x1xf32> to vector<8x128xf32>
    %845 = arith.mulf %843, %844 : vector<8x128xf32>
    %cst_162 = arith.constant 1.000100e+00 : f32
    %846 = vector.broadcast %cst_162 : f32 to vector<8x128xf32>
    %847 = arith.addf %845, %846 : vector<8x128xf32>
    %cst_163 = arith.constant 0.000000e+00 : f32
    %848 = vector.broadcast %cst_163 : f32 to vector<8x128xf32>
    %849 = arith.subf %848, %838 : vector<8x128xf32>
    %cst_164 = arith.constant 1.00000012 : f32
    %850 = vector.broadcast %cst_164 : f32 to vector<8x128xf32>
    %851 = arith.maximumf %849, %850 : vector<8x128xf32>
    %852 = arith.mulf %851, %851 : vector<8x128xf32>
    %cst_165 = arith.constant 1.000000e+00 : f32
    %853 = vector.broadcast %cst_165 : f32 to vector<8x128xf32>
    %854 = arith.subf %852, %853 : vector<8x128xf32>
    %855 = math.sqrt %854 : vector<8x128xf32>
    %856 = arith.addf %851, %855 : vector<8x128xf32>
    %857 = math.log %856 : vector<8x128xf32>
    %858 = vector.broadcast %768 : vector<1x128xf32> to vector<8x128xf32>
    %859 = arith.mulf %858, %12 : vector<8x128xf32>
    %860 = arith.mulf %857, %859 : vector<8x128xf32>
    %861 = arith.mulf %837, %837 : vector<64x128xf32>
    %cst_166 = arith.constant dense<0.000000e+00> : vector<8x128xf32>
    %862 = tpu.matmul %25, %861, %cst_166 {dimension_numbers = #tpu.dot_dimension_numbers<[1], [0], [0], [1], [0, 0, 1, 1], [], []>} : vector<8x64xf32>, vector<64x128xf32>, vector<8x128xf32> -> vector<8x128xf32>
    %863 = arith.mulf %847, %847 : vector<8x128xf32>
    %cst_167 = arith.constant 1.000000e+00 : f32
    %864 = vector.broadcast %cst_167 : f32 to vector<8x128xf32>
    %865 = arith.subf %863, %864 : vector<8x128xf32>
    %cst_168 = arith.constant 9.99999993E-9 : f32
    %866 = vector.broadcast %cst_168 : f32 to vector<8x128xf32>
    %867 = arith.maximumf %862, %866 : vector<8x128xf32>
    %868 = tpu.reciprocal %867 {approx = true} : vector<8x128xf32> -> vector<8x128xf32>
    %869 = arith.mulf %865, %868 : vector<8x128xf32>
    %870 = math.sqrt %869 : vector<8x128xf32>
    %871 = arith.mulf %860, %870 : vector<8x128xf32>
    %872 = arith.mulf %860, %847 : vector<8x128xf32>
    %cst_169 = arith.constant dense<0.000000e+00> : vector<128xf32>
    %873 = vector.multi_reduction <add>, %872, %cst_169 [0] : vector<8x128xf32> to vector<128xf32>
    %874 = vector.shape_cast %873 : vector<128xf32> to vector<1x128xf32>
    %875 = vector.extract_strided_slice %871 {offsets = [0, 0], sizes = [1, 128], strides = [1, 1]} : vector<8x128xf32> to vector<1x128xf32>
    %876 = vector.extract_strided_slice %837 {offsets = [0, 0], sizes = [16, 128], strides = [1, 1]} : vector<64x128xf32> to vector<16x128xf32>
    %877 = vector.broadcast %875 : vector<1x128xf32> to vector<16x128xf32>
    %878 = arith.mulf %877, %876 : vector<16x128xf32>
    %879 = vector.extract_strided_slice %871 {offsets = [1, 0], sizes = [1, 128], strides = [1, 1]} : vector<8x128xf32> to vector<1x128xf32>
    %880 = vector.extract_strided_slice %837 {offsets = [16, 0], sizes = [16, 128], strides = [1, 1]} : vector<64x128xf32> to vector<16x128xf32>
    %881 = vector.broadcast %879 : vector<1x128xf32> to vector<16x128xf32>
    %882 = arith.mulf %881, %880 : vector<16x128xf32>
    %883 = arith.addf %878, %882 : vector<16x128xf32>
    %884 = vector.extract_strided_slice %871 {offsets = [2, 0], sizes = [1, 128], strides = [1, 1]} : vector<8x128xf32> to vector<1x128xf32>
    %885 = vector.extract_strided_slice %837 {offsets = [32, 0], sizes = [16, 128], strides = [1, 1]} : vector<64x128xf32> to vector<16x128xf32>
    %886 = vector.broadcast %884 : vector<1x128xf32> to vector<16x128xf32>
    %887 = arith.mulf %886, %885 : vector<16x128xf32>
    %888 = arith.addf %883, %887 : vector<16x128xf32>
    %889 = vector.extract_strided_slice %871 {offsets = [3, 0], sizes = [1, 128], strides = [1, 1]} : vector<8x128xf32> to vector<1x128xf32>
    %890 = vector.extract_strided_slice %837 {offsets = [48, 0], sizes = [16, 128], strides = [1, 1]} : vector<64x128xf32> to vector<16x128xf32>
    %891 = vector.broadcast %889 : vector<1x128xf32> to vector<16x128xf32>
    %892 = arith.mulf %891, %890 : vector<16x128xf32>
    %893 = arith.addf %888, %892 : vector<16x128xf32>
    %894 = vector.shape_cast %874 : vector<1x128xf32> to vector<1x128xf32>
    %895 = vector.broadcast %894 : vector<1x128xf32> to vector<16x128xf32>
    %896 = arith.select %31, %895, %893 : vector<16x128xi1>, vector<16x128xf32>
    %897 = arith.mulf %896, %896 : vector<16x128xf32>
    %cst_170 = arith.constant dense<0.000000e+00> : vector<128xf32>
    %898 = vector.multi_reduction <add>, %897, %cst_170 [0] : vector<16x128xf32> to vector<128xf32>
    %899 = vector.shape_cast %898 : vector<128xf32> to vector<1x128xf32>
    %900 = vector.extract_strided_slice %896 {offsets = [0, 0], sizes = [1, 128], strides = [1, 1]} : vector<16x128xf32> to vector<1x128xf32>
    %cst_171 = arith.constant 2.000000e+00 : f32
    %901 = vector.broadcast %cst_171 : f32 to vector<1x128xf32>
    %902 = arith.mulf %901, %900 : vector<1x128xf32>
    %903 = vector.extract_strided_slice %896 {offsets = [0, 0], sizes = [1, 128], strides = [1, 1]} : vector<16x128xf32> to vector<1x128xf32>
    %904 = arith.mulf %902, %903 : vector<1x128xf32>
    %905 = arith.subf %899, %904 : vector<1x128xf32>
    %906 = math.absf %905 : vector<1x128xf32>
    %cst_172 = arith.constant 9.99999993E-9 : f32
    %907 = vector.broadcast %cst_172 : f32 to vector<1x128xf32>
    %908 = arith.maximumf %906, %907 : vector<1x128xf32>
    %909 = math.rsqrt %908 : vector<1x128xf32>
    %910 = vector.broadcast %909 : vector<1x128xf32> to vector<16x128xf32>
    %911 = arith.mulf %896, %910 : vector<16x128xf32>
    %912 = arith.addf %766, %911 : vector<16x128xf32>
    %c0_173 = arith.constant 0 : index
    %c768 = arith.constant 768 : index
    %913 = vector.load %arg2[%c0_173, %c768] : memref<8x1024xf32, #tpu.memory_space<vmem>>, vector<8x128xf32>
    %c6 = arith.constant 6 : index
    %c0_174 = arith.constant 0 : index
    %914 = vector.load %arg3[%c6, %c0_174] : memref<8x128xf32, #tpu.memory_space<vmem>>, vector<1x128xf32>
    %915 = arith.mulf %0, %913 : vector<8x128xf32>
    %cst_175 = arith.constant dense<0.000000e+00> : vector<128xf32>
    %916 = vector.multi_reduction <add>, %915, %cst_175 [0] : vector<8x128xf32> to vector<128xf32>
    %917 = vector.shape_cast %916 : vector<128xf32> to vector<1x128xf32>
    %918 = vector.extract_strided_slice %915 {offsets = [0, 0], sizes = [1, 128], strides = [1, 1]} : vector<8x128xf32> to vector<1x128xf32>
    %cst_176 = arith.constant 2.000000e+00 : f32
    %919 = vector.broadcast %cst_176 : f32 to vector<1x128xf32>
    %920 = arith.mulf %919, %918 : vector<1x128xf32>
    %921 = arith.subf %917, %920 : vector<1x128xf32>
    %cst_177 = arith.constant 0.000000e+00 : f32
    %922 = vector.broadcast %cst_177 : f32 to vector<1x128xf32>
    %923 = arith.subf %922, %921 : vector<1x128xf32>
    %cst_178 = arith.constant 1.00000012 : f32
    %924 = vector.broadcast %cst_178 : f32 to vector<1x128xf32>
    %925 = arith.maximumf %923, %924 : vector<1x128xf32>
    %926 = arith.mulf %925, %925 : vector<1x128xf32>
    %cst_179 = arith.constant 1.000000e+00 : f32
    %927 = vector.broadcast %cst_179 : f32 to vector<1x128xf32>
    %928 = arith.subf %926, %927 : vector<1x128xf32>
    %929 = math.sqrt %928 : vector<1x128xf32>
    %930 = arith.addf %925, %929 : vector<1x128xf32>
    %931 = math.log %930 : vector<1x128xf32>
    %932 = vector.broadcast %921 : vector<1x128xf32> to vector<8x128xf32>
    %933 = arith.mulf %932, %0 : vector<8x128xf32>
    %934 = arith.addf %913, %933 : vector<8x128xf32>
    %935 = arith.mulf %934, %934 : vector<8x128xf32>
    %cst_180 = arith.constant dense<0.000000e+00> : vector<128xf32>
    %936 = vector.multi_reduction <add>, %935, %cst_180 [0] : vector<8x128xf32> to vector<128xf32>
    %937 = vector.shape_cast %936 : vector<128xf32> to vector<1x128xf32>
    %938 = vector.extract_strided_slice %934 {offsets = [0, 0], sizes = [1, 128], strides = [1, 1]} : vector<8x128xf32> to vector<1x128xf32>
    %cst_181 = arith.constant 2.000000e+00 : f32
    %939 = vector.broadcast %cst_181 : f32 to vector<1x128xf32>
    %940 = arith.mulf %939, %938 : vector<1x128xf32>
    %941 = vector.extract_strided_slice %934 {offsets = [0, 0], sizes = [1, 128], strides = [1, 1]} : vector<8x128xf32> to vector<1x128xf32>
    %942 = arith.mulf %940, %941 : vector<1x128xf32>
    %943 = arith.subf %937, %942 : vector<1x128xf32>
    %cst_182 = arith.constant 9.99999993E-9 : f32
    %944 = vector.broadcast %cst_182 : f32 to vector<1x128xf32>
    %945 = arith.maximumf %943, %944 : vector<1x128xf32>
    %946 = math.rsqrt %945 : vector<1x128xf32>
    %947 = arith.mulf %931, %946 : vector<1x128xf32>
    %948 = vector.broadcast %947 : vector<1x128xf32> to vector<8x128xf32>
    %949 = arith.mulf %948, %934 : vector<8x128xf32>
    %950 = vector.extract_strided_slice %949 {offsets = [0, 0], sizes = [1, 128], strides = [1, 1]} : vector<8x128xf32> to vector<1x128xf32>
    %951 = arith.mulf %950, %35 : vector<1x128xf32>
    %952 = vector.broadcast %951 : vector<1x128xf32> to vector<8x128xf32>
    %953 = arith.mulf %952, %0 : vector<8x128xf32>
    %954 = arith.subf %949, %953 : vector<8x128xf32>
    %955 = arith.mulf %954, %954 : vector<8x128xf32>
    %cst_183 = arith.constant dense<0.000000e+00> : vector<128xf32>
    %956 = vector.multi_reduction <add>, %955, %cst_183 [0] : vector<8x128xf32> to vector<128xf32>
    %957 = vector.shape_cast %956 : vector<128xf32> to vector<1x128xf32>
    %958 = vector.extract_strided_slice %954 {offsets = [0, 0], sizes = [1, 128], strides = [1, 1]} : vector<8x128xf32> to vector<1x128xf32>
    %959 = vector.extract_strided_slice %954 {offsets = [0, 0], sizes = [1, 128], strides = [1, 1]} : vector<8x128xf32> to vector<1x128xf32>
    %960 = arith.mulf %958, %959 : vector<1x128xf32>
    %961 = arith.subf %957, %960 : vector<1x128xf32>
    %cst_184 = arith.constant 9.99999993E-9 : f32
    %962 = vector.broadcast %cst_184 : f32 to vector<1x128xf32>
    %963 = arith.maximumf %961, %962 : vector<1x128xf32>
    %964 = math.rsqrt %963 : vector<1x128xf32>
    %965 = arith.mulf %961, %964 : vector<1x128xf32>
    %966 = math.exp %965 : vector<1x128xf32>
    %967 = tpu.reciprocal %966 {approx = true} : vector<1x128xf32> -> vector<1x128xf32>
    %968 = arith.subf %966, %967 : vector<1x128xf32>
    %cst_185 = arith.constant 5.000000e-01 : f32
    %969 = vector.broadcast %cst_185 : f32 to vector<1x128xf32>
    %970 = arith.mulf %969, %968 : vector<1x128xf32>
    %971 = arith.addf %966, %967 : vector<1x128xf32>
    %cst_186 = arith.constant 5.000000e-01 : f32
    %972 = vector.broadcast %cst_186 : f32 to vector<1x128xf32>
    %973 = arith.mulf %972, %971 : vector<1x128xf32>
    %974 = arith.mulf %970, %964 : vector<1x128xf32>
    %975 = vector.broadcast %974 : vector<1x128xf32> to vector<8x128xf32>
    %976 = arith.mulf %975, %954 : vector<8x128xf32>
    %977 = vector.shape_cast %973 : vector<1x128xf32> to vector<1x128xf32>
    %978 = vector.broadcast %977 : vector<1x128xf32> to vector<8x128xf32>
    %979 = arith.select %28, %978, %976 : vector<8x128xi1>, vector<8x128xf32>
    %980 = tpu.concatenate %979, %7 in 0 : vector<8x128xf32>, vector<8x128xf32> -> vector<16x128xf32>
    %cst_187 = arith.constant dense<0.000000e+00> : vector<80x128xf32>
    %981 = tpu.matmul %1, %980, %cst_187 {dimension_numbers = #tpu.dot_dimension_numbers<[1], [0], [0], [1], [0, 0, 1, 1], [], []>} : vector<80x16xf32>, vector<16x128xf32>, vector<80x128xf32> -> vector<80x128xf32>
    %982 = vector.extract_strided_slice %981 {offsets = [0, 0], sizes = [8, 128], strides = [1, 1]} : vector<80x128xf32> to vector<8x128xf32>
    %983 = vector.extract_strided_slice %981 {offsets = [8, 0], sizes = [64, 128], strides = [1, 1]} : vector<80x128xf32> to vector<64x128xf32>
    %984 = vector.extract_strided_slice %981 {offsets = [72, 0], sizes = [8, 128], strides = [1, 1]} : vector<80x128xf32> to vector<8x128xf32>
    %985 = arith.negf %982 : vector<8x128xf32>
    %986 = math.exp %985 : vector<8x128xf32>
    %cst_188 = arith.constant 1.000000e+00 : f32
    %987 = vector.broadcast %cst_188 : f32 to vector<8x128xf32>
    %988 = arith.addf %987, %986 : vector<8x128xf32>
    %989 = arith.divf %987, %988 : vector<8x128xf32>
    %990 = vector.broadcast %2 : vector<8x1xf32> to vector<8x128xf32>
    %991 = arith.mulf %989, %990 : vector<8x128xf32>
    %cst_189 = arith.constant 1.000100e+00 : f32
    %992 = vector.broadcast %cst_189 : f32 to vector<8x128xf32>
    %993 = arith.addf %991, %992 : vector<8x128xf32>
    %cst_190 = arith.constant 0.000000e+00 : f32
    %994 = vector.broadcast %cst_190 : f32 to vector<8x128xf32>
    %995 = arith.subf %994, %984 : vector<8x128xf32>
    %cst_191 = arith.constant 1.00000012 : f32
    %996 = vector.broadcast %cst_191 : f32 to vector<8x128xf32>
    %997 = arith.maximumf %995, %996 : vector<8x128xf32>
    %998 = arith.mulf %997, %997 : vector<8x128xf32>
    %cst_192 = arith.constant 1.000000e+00 : f32
    %999 = vector.broadcast %cst_192 : f32 to vector<8x128xf32>
    %1000 = arith.subf %998, %999 : vector<8x128xf32>
    %1001 = math.sqrt %1000 : vector<8x128xf32>
    %1002 = arith.addf %997, %1001 : vector<8x128xf32>
    %1003 = math.log %1002 : vector<8x128xf32>
    %1004 = vector.broadcast %914 : vector<1x128xf32> to vector<8x128xf32>
    %1005 = arith.mulf %1004, %12 : vector<8x128xf32>
    %1006 = arith.mulf %1003, %1005 : vector<8x128xf32>
    %1007 = arith.mulf %983, %983 : vector<64x128xf32>
    %cst_193 = arith.constant dense<0.000000e+00> : vector<8x128xf32>
    %1008 = tpu.matmul %25, %1007, %cst_193 {dimension_numbers = #tpu.dot_dimension_numbers<[1], [0], [0], [1], [0, 0, 1, 1], [], []>} : vector<8x64xf32>, vector<64x128xf32>, vector<8x128xf32> -> vector<8x128xf32>
    %1009 = arith.mulf %993, %993 : vector<8x128xf32>
    %cst_194 = arith.constant 1.000000e+00 : f32
    %1010 = vector.broadcast %cst_194 : f32 to vector<8x128xf32>
    %1011 = arith.subf %1009, %1010 : vector<8x128xf32>
    %cst_195 = arith.constant 9.99999993E-9 : f32
    %1012 = vector.broadcast %cst_195 : f32 to vector<8x128xf32>
    %1013 = arith.maximumf %1008, %1012 : vector<8x128xf32>
    %1014 = tpu.reciprocal %1013 {approx = true} : vector<8x128xf32> -> vector<8x128xf32>
    %1015 = arith.mulf %1011, %1014 : vector<8x128xf32>
    %1016 = math.sqrt %1015 : vector<8x128xf32>
    %1017 = arith.mulf %1006, %1016 : vector<8x128xf32>
    %1018 = arith.mulf %1006, %993 : vector<8x128xf32>
    %cst_196 = arith.constant dense<0.000000e+00> : vector<128xf32>
    %1019 = vector.multi_reduction <add>, %1018, %cst_196 [0] : vector<8x128xf32> to vector<128xf32>
    %1020 = vector.shape_cast %1019 : vector<128xf32> to vector<1x128xf32>
    %1021 = vector.extract_strided_slice %1017 {offsets = [0, 0], sizes = [1, 128], strides = [1, 1]} : vector<8x128xf32> to vector<1x128xf32>
    %1022 = vector.extract_strided_slice %983 {offsets = [0, 0], sizes = [16, 128], strides = [1, 1]} : vector<64x128xf32> to vector<16x128xf32>
    %1023 = vector.broadcast %1021 : vector<1x128xf32> to vector<16x128xf32>
    %1024 = arith.mulf %1023, %1022 : vector<16x128xf32>
    %1025 = vector.extract_strided_slice %1017 {offsets = [1, 0], sizes = [1, 128], strides = [1, 1]} : vector<8x128xf32> to vector<1x128xf32>
    %1026 = vector.extract_strided_slice %983 {offsets = [16, 0], sizes = [16, 128], strides = [1, 1]} : vector<64x128xf32> to vector<16x128xf32>
    %1027 = vector.broadcast %1025 : vector<1x128xf32> to vector<16x128xf32>
    %1028 = arith.mulf %1027, %1026 : vector<16x128xf32>
    %1029 = arith.addf %1024, %1028 : vector<16x128xf32>
    %1030 = vector.extract_strided_slice %1017 {offsets = [2, 0], sizes = [1, 128], strides = [1, 1]} : vector<8x128xf32> to vector<1x128xf32>
    %1031 = vector.extract_strided_slice %983 {offsets = [32, 0], sizes = [16, 128], strides = [1, 1]} : vector<64x128xf32> to vector<16x128xf32>
    %1032 = vector.broadcast %1030 : vector<1x128xf32> to vector<16x128xf32>
    %1033 = arith.mulf %1032, %1031 : vector<16x128xf32>
    %1034 = arith.addf %1029, %1033 : vector<16x128xf32>
    %1035 = vector.extract_strided_slice %1017 {offsets = [3, 0], sizes = [1, 128], strides = [1, 1]} : vector<8x128xf32> to vector<1x128xf32>
    %1036 = vector.extract_strided_slice %983 {offsets = [48, 0], sizes = [16, 128], strides = [1, 1]} : vector<64x128xf32> to vector<16x128xf32>
    %1037 = vector.broadcast %1035 : vector<1x128xf32> to vector<16x128xf32>
    %1038 = arith.mulf %1037, %1036 : vector<16x128xf32>
    %1039 = arith.addf %1034, %1038 : vector<16x128xf32>
    %1040 = vector.shape_cast %1020 : vector<1x128xf32> to vector<1x128xf32>
    %1041 = vector.broadcast %1040 : vector<1x128xf32> to vector<16x128xf32>
    %1042 = arith.select %31, %1041, %1039 : vector<16x128xi1>, vector<16x128xf32>
    %1043 = arith.mulf %1042, %1042 : vector<16x128xf32>
    %cst_197 = arith.constant dense<0.000000e+00> : vector<128xf32>
    %1044 = vector.multi_reduction <add>, %1043, %cst_197 [0] : vector<16x128xf32> to vector<128xf32>
    %1045 = vector.shape_cast %1044 : vector<128xf32> to vector<1x128xf32>
    %1046 = vector.extract_strided_slice %1042 {offsets = [0, 0], sizes = [1, 128], strides = [1, 1]} : vector<16x128xf32> to vector<1x128xf32>
    %cst_198 = arith.constant 2.000000e+00 : f32
    %1047 = vector.broadcast %cst_198 : f32 to vector<1x128xf32>
    %1048 = arith.mulf %1047, %1046 : vector<1x128xf32>
    %1049 = vector.extract_strided_slice %1042 {offsets = [0, 0], sizes = [1, 128], strides = [1, 1]} : vector<16x128xf32> to vector<1x128xf32>
    %1050 = arith.mulf %1048, %1049 : vector<1x128xf32>
    %1051 = arith.subf %1045, %1050 : vector<1x128xf32>
    %1052 = math.absf %1051 : vector<1x128xf32>
    %cst_199 = arith.constant 9.99999993E-9 : f32
    %1053 = vector.broadcast %cst_199 : f32 to vector<1x128xf32>
    %1054 = arith.maximumf %1052, %1053 : vector<1x128xf32>
    %1055 = math.rsqrt %1054 : vector<1x128xf32>
    %1056 = vector.broadcast %1055 : vector<1x128xf32> to vector<16x128xf32>
    %1057 = arith.mulf %1042, %1056 : vector<16x128xf32>
    %1058 = arith.addf %912, %1057 : vector<16x128xf32>
    %c0_200 = arith.constant 0 : index
    %c896 = arith.constant 896 : index
    %1059 = vector.load %arg2[%c0_200, %c896] : memref<8x1024xf32, #tpu.memory_space<vmem>>, vector<8x128xf32>
    %c7 = arith.constant 7 : index
    %c0_201 = arith.constant 0 : index
    %1060 = vector.load %arg3[%c7, %c0_201] : memref<8x128xf32, #tpu.memory_space<vmem>>, vector<1x128xf32>
    %1061 = arith.mulf %0, %1059 : vector<8x128xf32>
    %cst_202 = arith.constant dense<0.000000e+00> : vector<128xf32>
    %1062 = vector.multi_reduction <add>, %1061, %cst_202 [0] : vector<8x128xf32> to vector<128xf32>
    %1063 = vector.shape_cast %1062 : vector<128xf32> to vector<1x128xf32>
    %1064 = vector.extract_strided_slice %1061 {offsets = [0, 0], sizes = [1, 128], strides = [1, 1]} : vector<8x128xf32> to vector<1x128xf32>
    %cst_203 = arith.constant 2.000000e+00 : f32
    %1065 = vector.broadcast %cst_203 : f32 to vector<1x128xf32>
    %1066 = arith.mulf %1065, %1064 : vector<1x128xf32>
    %1067 = arith.subf %1063, %1066 : vector<1x128xf32>
    %cst_204 = arith.constant 0.000000e+00 : f32
    %1068 = vector.broadcast %cst_204 : f32 to vector<1x128xf32>
    %1069 = arith.subf %1068, %1067 : vector<1x128xf32>
    %cst_205 = arith.constant 1.00000012 : f32
    %1070 = vector.broadcast %cst_205 : f32 to vector<1x128xf32>
    %1071 = arith.maximumf %1069, %1070 : vector<1x128xf32>
    %1072 = arith.mulf %1071, %1071 : vector<1x128xf32>
    %cst_206 = arith.constant 1.000000e+00 : f32
    %1073 = vector.broadcast %cst_206 : f32 to vector<1x128xf32>
    %1074 = arith.subf %1072, %1073 : vector<1x128xf32>
    %1075 = math.sqrt %1074 : vector<1x128xf32>
    %1076 = arith.addf %1071, %1075 : vector<1x128xf32>
    %1077 = math.log %1076 : vector<1x128xf32>
    %1078 = vector.broadcast %1067 : vector<1x128xf32> to vector<8x128xf32>
    %1079 = arith.mulf %1078, %0 : vector<8x128xf32>
    %1080 = arith.addf %1059, %1079 : vector<8x128xf32>
    %1081 = arith.mulf %1080, %1080 : vector<8x128xf32>
    %cst_207 = arith.constant dense<0.000000e+00> : vector<128xf32>
    %1082 = vector.multi_reduction <add>, %1081, %cst_207 [0] : vector<8x128xf32> to vector<128xf32>
    %1083 = vector.shape_cast %1082 : vector<128xf32> to vector<1x128xf32>
    %1084 = vector.extract_strided_slice %1080 {offsets = [0, 0], sizes = [1, 128], strides = [1, 1]} : vector<8x128xf32> to vector<1x128xf32>
    %cst_208 = arith.constant 2.000000e+00 : f32
    %1085 = vector.broadcast %cst_208 : f32 to vector<1x128xf32>
    %1086 = arith.mulf %1085, %1084 : vector<1x128xf32>
    %1087 = vector.extract_strided_slice %1080 {offsets = [0, 0], sizes = [1, 128], strides = [1, 1]} : vector<8x128xf32> to vector<1x128xf32>
    %1088 = arith.mulf %1086, %1087 : vector<1x128xf32>
    %1089 = arith.subf %1083, %1088 : vector<1x128xf32>
    %cst_209 = arith.constant 9.99999993E-9 : f32
    %1090 = vector.broadcast %cst_209 : f32 to vector<1x128xf32>
    %1091 = arith.maximumf %1089, %1090 : vector<1x128xf32>
    %1092 = math.rsqrt %1091 : vector<1x128xf32>
    %1093 = arith.mulf %1077, %1092 : vector<1x128xf32>
    %1094 = vector.broadcast %1093 : vector<1x128xf32> to vector<8x128xf32>
    %1095 = arith.mulf %1094, %1080 : vector<8x128xf32>
    %1096 = vector.extract_strided_slice %1095 {offsets = [0, 0], sizes = [1, 128], strides = [1, 1]} : vector<8x128xf32> to vector<1x128xf32>
    %1097 = arith.mulf %1096, %35 : vector<1x128xf32>
    %1098 = vector.broadcast %1097 : vector<1x128xf32> to vector<8x128xf32>
    %1099 = arith.mulf %1098, %0 : vector<8x128xf32>
    %1100 = arith.subf %1095, %1099 : vector<8x128xf32>
    %1101 = arith.mulf %1100, %1100 : vector<8x128xf32>
    %cst_210 = arith.constant dense<0.000000e+00> : vector<128xf32>
    %1102 = vector.multi_reduction <add>, %1101, %cst_210 [0] : vector<8x128xf32> to vector<128xf32>
    %1103 = vector.shape_cast %1102 : vector<128xf32> to vector<1x128xf32>
    %1104 = vector.extract_strided_slice %1100 {offsets = [0, 0], sizes = [1, 128], strides = [1, 1]} : vector<8x128xf32> to vector<1x128xf32>
    %1105 = vector.extract_strided_slice %1100 {offsets = [0, 0], sizes = [1, 128], strides = [1, 1]} : vector<8x128xf32> to vector<1x128xf32>
    %1106 = arith.mulf %1104, %1105 : vector<1x128xf32>
    %1107 = arith.subf %1103, %1106 : vector<1x128xf32>
    %cst_211 = arith.constant 9.99999993E-9 : f32
    %1108 = vector.broadcast %cst_211 : f32 to vector<1x128xf32>
    %1109 = arith.maximumf %1107, %1108 : vector<1x128xf32>
    %1110 = math.rsqrt %1109 : vector<1x128xf32>
    %1111 = arith.mulf %1107, %1110 : vector<1x128xf32>
    %1112 = math.exp %1111 : vector<1x128xf32>
    %1113 = tpu.reciprocal %1112 {approx = true} : vector<1x128xf32> -> vector<1x128xf32>
    %1114 = arith.subf %1112, %1113 : vector<1x128xf32>
    %cst_212 = arith.constant 5.000000e-01 : f32
    %1115 = vector.broadcast %cst_212 : f32 to vector<1x128xf32>
    %1116 = arith.mulf %1115, %1114 : vector<1x128xf32>
    %1117 = arith.addf %1112, %1113 : vector<1x128xf32>
    %cst_213 = arith.constant 5.000000e-01 : f32
    %1118 = vector.broadcast %cst_213 : f32 to vector<1x128xf32>
    %1119 = arith.mulf %1118, %1117 : vector<1x128xf32>
    %1120 = arith.mulf %1116, %1110 : vector<1x128xf32>
    %1121 = vector.broadcast %1120 : vector<1x128xf32> to vector<8x128xf32>
    %1122 = arith.mulf %1121, %1100 : vector<8x128xf32>
    %1123 = vector.shape_cast %1119 : vector<1x128xf32> to vector<1x128xf32>
    %1124 = vector.broadcast %1123 : vector<1x128xf32> to vector<8x128xf32>
    %1125 = arith.select %28, %1124, %1122 : vector<8x128xi1>, vector<8x128xf32>
    %1126 = tpu.concatenate %1125, %7 in 0 : vector<8x128xf32>, vector<8x128xf32> -> vector<16x128xf32>
    %cst_214 = arith.constant dense<0.000000e+00> : vector<80x128xf32>
    %1127 = tpu.matmul %1, %1126, %cst_214 {dimension_numbers = #tpu.dot_dimension_numbers<[1], [0], [0], [1], [0, 0, 1, 1], [], []>} : vector<80x16xf32>, vector<16x128xf32>, vector<80x128xf32> -> vector<80x128xf32>
    %1128 = vector.extract_strided_slice %1127 {offsets = [0, 0], sizes = [8, 128], strides = [1, 1]} : vector<80x128xf32> to vector<8x128xf32>
    %1129 = vector.extract_strided_slice %1127 {offsets = [8, 0], sizes = [64, 128], strides = [1, 1]} : vector<80x128xf32> to vector<64x128xf32>
    %1130 = vector.extract_strided_slice %1127 {offsets = [72, 0], sizes = [8, 128], strides = [1, 1]} : vector<80x128xf32> to vector<8x128xf32>
    %1131 = arith.negf %1128 : vector<8x128xf32>
    %1132 = math.exp %1131 : vector<8x128xf32>
    %cst_215 = arith.constant 1.000000e+00 : f32
    %1133 = vector.broadcast %cst_215 : f32 to vector<8x128xf32>
    %1134 = arith.addf %1133, %1132 : vector<8x128xf32>
    %1135 = arith.divf %1133, %1134 : vector<8x128xf32>
    %1136 = vector.broadcast %2 : vector<8x1xf32> to vector<8x128xf32>
    %1137 = arith.mulf %1135, %1136 : vector<8x128xf32>
    %cst_216 = arith.constant 1.000100e+00 : f32
    %1138 = vector.broadcast %cst_216 : f32 to vector<8x128xf32>
    %1139 = arith.addf %1137, %1138 : vector<8x128xf32>
    %cst_217 = arith.constant 0.000000e+00 : f32
    %1140 = vector.broadcast %cst_217 : f32 to vector<8x128xf32>
    %1141 = arith.subf %1140, %1130 : vector<8x128xf32>
    %cst_218 = arith.constant 1.00000012 : f32
    %1142 = vector.broadcast %cst_218 : f32 to vector<8x128xf32>
    %1143 = arith.maximumf %1141, %1142 : vector<8x128xf32>
    %1144 = arith.mulf %1143, %1143 : vector<8x128xf32>
    %cst_219 = arith.constant 1.000000e+00 : f32
    %1145 = vector.broadcast %cst_219 : f32 to vector<8x128xf32>
    %1146 = arith.subf %1144, %1145 : vector<8x128xf32>
    %1147 = math.sqrt %1146 : vector<8x128xf32>
    %1148 = arith.addf %1143, %1147 : vector<8x128xf32>
    %1149 = math.log %1148 : vector<8x128xf32>
    %1150 = vector.broadcast %1060 : vector<1x128xf32> to vector<8x128xf32>
    %1151 = arith.mulf %1150, %12 : vector<8x128xf32>
    %1152 = arith.mulf %1149, %1151 : vector<8x128xf32>
    %1153 = arith.mulf %1129, %1129 : vector<64x128xf32>
    %cst_220 = arith.constant dense<0.000000e+00> : vector<8x128xf32>
    %1154 = tpu.matmul %25, %1153, %cst_220 {dimension_numbers = #tpu.dot_dimension_numbers<[1], [0], [0], [1], [0, 0, 1, 1], [], []>} : vector<8x64xf32>, vector<64x128xf32>, vector<8x128xf32> -> vector<8x128xf32>
    %1155 = arith.mulf %1139, %1139 : vector<8x128xf32>
    %cst_221 = arith.constant 1.000000e+00 : f32
    %1156 = vector.broadcast %cst_221 : f32 to vector<8x128xf32>
    %1157 = arith.subf %1155, %1156 : vector<8x128xf32>
    %cst_222 = arith.constant 9.99999993E-9 : f32
    %1158 = vector.broadcast %cst_222 : f32 to vector<8x128xf32>
    %1159 = arith.maximumf %1154, %1158 : vector<8x128xf32>
    %1160 = tpu.reciprocal %1159 {approx = true} : vector<8x128xf32> -> vector<8x128xf32>
    %1161 = arith.mulf %1157, %1160 : vector<8x128xf32>
    %1162 = math.sqrt %1161 : vector<8x128xf32>
    %1163 = arith.mulf %1152, %1162 : vector<8x128xf32>
    %1164 = arith.mulf %1152, %1139 : vector<8x128xf32>
    %cst_223 = arith.constant dense<0.000000e+00> : vector<128xf32>
    %1165 = vector.multi_reduction <add>, %1164, %cst_223 [0] : vector<8x128xf32> to vector<128xf32>
    %1166 = vector.shape_cast %1165 : vector<128xf32> to vector<1x128xf32>
    %1167 = vector.extract_strided_slice %1163 {offsets = [0, 0], sizes = [1, 128], strides = [1, 1]} : vector<8x128xf32> to vector<1x128xf32>
    %1168 = vector.extract_strided_slice %1129 {offsets = [0, 0], sizes = [16, 128], strides = [1, 1]} : vector<64x128xf32> to vector<16x128xf32>
    %1169 = vector.broadcast %1167 : vector<1x128xf32> to vector<16x128xf32>
    %1170 = arith.mulf %1169, %1168 : vector<16x128xf32>
    %1171 = vector.extract_strided_slice %1163 {offsets = [1, 0], sizes = [1, 128], strides = [1, 1]} : vector<8x128xf32> to vector<1x128xf32>
    %1172 = vector.extract_strided_slice %1129 {offsets = [16, 0], sizes = [16, 128], strides = [1, 1]} : vector<64x128xf32> to vector<16x128xf32>
    %1173 = vector.broadcast %1171 : vector<1x128xf32> to vector<16x128xf32>
    %1174 = arith.mulf %1173, %1172 : vector<16x128xf32>
    %1175 = arith.addf %1170, %1174 : vector<16x128xf32>
    %1176 = vector.extract_strided_slice %1163 {offsets = [2, 0], sizes = [1, 128], strides = [1, 1]} : vector<8x128xf32> to vector<1x128xf32>
    %1177 = vector.extract_strided_slice %1129 {offsets = [32, 0], sizes = [16, 128], strides = [1, 1]} : vector<64x128xf32> to vector<16x128xf32>
    %1178 = vector.broadcast %1176 : vector<1x128xf32> to vector<16x128xf32>
    %1179 = arith.mulf %1178, %1177 : vector<16x128xf32>
    %1180 = arith.addf %1175, %1179 : vector<16x128xf32>
    %1181 = vector.extract_strided_slice %1163 {offsets = [3, 0], sizes = [1, 128], strides = [1, 1]} : vector<8x128xf32> to vector<1x128xf32>
    %1182 = vector.extract_strided_slice %1129 {offsets = [48, 0], sizes = [16, 128], strides = [1, 1]} : vector<64x128xf32> to vector<16x128xf32>
    %1183 = vector.broadcast %1181 : vector<1x128xf32> to vector<16x128xf32>
    %1184 = arith.mulf %1183, %1182 : vector<16x128xf32>
    %1185 = arith.addf %1180, %1184 : vector<16x128xf32>
    %1186 = vector.shape_cast %1166 : vector<1x128xf32> to vector<1x128xf32>
    %1187 = vector.broadcast %1186 : vector<1x128xf32> to vector<16x128xf32>
    %1188 = arith.select %31, %1187, %1185 : vector<16x128xi1>, vector<16x128xf32>
    %1189 = arith.mulf %1188, %1188 : vector<16x128xf32>
    %cst_224 = arith.constant dense<0.000000e+00> : vector<128xf32>
    %1190 = vector.multi_reduction <add>, %1189, %cst_224 [0] : vector<16x128xf32> to vector<128xf32>
    %1191 = vector.shape_cast %1190 : vector<128xf32> to vector<1x128xf32>
    %1192 = vector.extract_strided_slice %1188 {offsets = [0, 0], sizes = [1, 128], strides = [1, 1]} : vector<16x128xf32> to vector<1x128xf32>
    %cst_225 = arith.constant 2.000000e+00 : f32
    %1193 = vector.broadcast %cst_225 : f32 to vector<1x128xf32>
    %1194 = arith.mulf %1193, %1192 : vector<1x128xf32>
    %1195 = vector.extract_strided_slice %1188 {offsets = [0, 0], sizes = [1, 128], strides = [1, 1]} : vector<16x128xf32> to vector<1x128xf32>
    %1196 = arith.mulf %1194, %1195 : vector<1x128xf32>
    %1197 = arith.subf %1191, %1196 : vector<1x128xf32>
    %1198 = math.absf %1197 : vector<1x128xf32>
    %cst_226 = arith.constant 9.99999993E-9 : f32
    %1199 = vector.broadcast %cst_226 : f32 to vector<1x128xf32>
    %1200 = arith.maximumf %1198, %1199 : vector<1x128xf32>
    %1201 = math.rsqrt %1200 : vector<1x128xf32>
    %1202 = vector.broadcast %1201 : vector<1x128xf32> to vector<16x128xf32>
    %1203 = arith.mulf %1188, %1202 : vector<16x128xf32>
    %1204 = arith.addf %1058, %1203 : vector<16x128xf32>
    %1205 = arith.mulf %1204, %1204 : vector<16x128xf32>
    %cst_227 = arith.constant dense<0.000000e+00> : vector<128xf32>
    %1206 = vector.multi_reduction <add>, %1205, %cst_227 [0] : vector<16x128xf32> to vector<128xf32>
    %1207 = vector.shape_cast %1206 : vector<128xf32> to vector<1x128xf32>
    %1208 = vector.extract_strided_slice %1204 {offsets = [0, 0], sizes = [1, 128], strides = [1, 1]} : vector<16x128xf32> to vector<1x128xf32>
    %cst_228 = arith.constant 2.000000e+00 : f32
    %1209 = vector.broadcast %cst_228 : f32 to vector<1x128xf32>
    %1210 = arith.mulf %1209, %1208 : vector<1x128xf32>
    %1211 = vector.extract_strided_slice %1204 {offsets = [0, 0], sizes = [1, 128], strides = [1, 1]} : vector<16x128xf32> to vector<1x128xf32>
    %1212 = arith.mulf %1210, %1211 : vector<1x128xf32>
    %1213 = arith.subf %1207, %1212 : vector<1x128xf32>
    %1214 = math.absf %1213 : vector<1x128xf32>
    %cst_229 = arith.constant 9.99999993E-9 : f32
    %1215 = vector.broadcast %cst_229 : f32 to vector<1x128xf32>
    %1216 = arith.maximumf %1214, %1215 : vector<1x128xf32>
    %1217 = math.rsqrt %1216 : vector<1x128xf32>
    %1218 = vector.broadcast %1217 : vector<1x128xf32> to vector<16x128xf32>
    %1219 = arith.mulf %1204, %1218 : vector<16x128xf32>
    %c0_230 = arith.constant 0 : index
    %c0_231 = arith.constant 0 : index
    %1220 = vector.load %arg6[%c0_230, %c0_231] : memref<16x128xf32, #tpu.memory_space<vmem>>, vector<16x128xf32>
    tpu.vector_store %arg6[%c0_230, %c0_231], %1219 {strides = array<i32>} : memref<16x128xf32, #tpu.memory_space<vmem>>, vector<16x128xf32>,
    return
  }
  func.func @transform_0(%arg0: i32) -> (i32, i32) {
    %c0_i32 = arith.constant 0 : i32
    %c0_i32_0 = arith.constant 0 : i32
    return %c0_i32, %arg0 : i32, i32
  }
  func.func @transform_1(%arg0: i32) -> (i32, i32) {
    %c0_i32 = arith.constant 0 : i32
    %c0_i32_0 = arith.constant 0 : i32
    return %c0_i32, %arg0 : i32, i32
  }
  func.func @transform_2(%arg0: i32) -> (i32, i32) {
    %c0_i32 = arith.constant 0 : i32
    %c0_i32_0 = arith.constant 0 : i32
    return %c0_i32, %arg0 : i32, i32
  }
  func.func @transform_3(%arg0: i32) -> (i32, i32) {
    %c0_i32 = arith.constant 0 : i32
    %c0_i32_0 = arith.constant 0 : i32
    %c0_i32_1 = arith.constant 0 : i32
    return %c0_i32, %c0_i32_0 : i32, i32
  }
  func.func @transform_4(%arg0: i32) -> (i32, i32) {
    %c0_i32 = arith.constant 0 : i32
    %c0_i32_0 = arith.constant 0 : i32
    %c0_i32_1 = arith.constant 0 : i32
    return %c0_i32, %c0_i32_0 : i32, i32
  }
  func.func @transform_5(%arg0: i32) -> (i32, i32) {
    %c0_i32 = arith.constant 0 : i32
    %c0_i32_0 = arith.constant 0 : i32
    return %c0_i32, %arg0 : i32, i32
  }
}

</mosaic_0001>

<bundles_post_ra>
// kernel: tpu_custom_call.1
= control target key start
LH: loop header
LB: loop body
LE: loop exit
PB: predicated region body
PF: predicated region fallthrough
CT: control target
= control target key end

     0   :  { %10 = vsyncpa [#allocation3], 0  ;;  %s6060_s0 = inlined_call_operand.vmem [shape: f32[8,512], index: 0, kind: input, shape index: {}]   ;;  %s6061_s1 = inlined_call_operand.hbm [shape: f32[8,4096], index: 1, kind: input, shape index: {}]   ;;  %s6062_s2 = inlined_call_operand.vmem [shape: f32[8,512], index: 2, kind: input, shape index: {}]   ;;  %s6063_s3 = inlined_call_operand.vmem [shape: f32[80,16], index: 3, kind: input, shape index: {}]   ;;  %s6064_s4 = inlined_call_operand.vmem [shape: f32[8,1], index: 4, kind: input, shape index: {}]   ;;  %s6065_s5 = inlined_call_operand.hbm [shape: f32[16,512], index: 5, kind: output, shape index: {}]  }
   0x1   :  { %12 = vsyncpa [#allocation3 + $0x1], 0 }
   0x2   :  { %13 = vsyncpa [#allocation4], 0 }
   0x3   :  { %15 = vsyncpa [#allocation4 + $0x1], 0  ;;  %s4731_s18 = smov 0   ;;  %s4733_s19 = smov 0  }
   0x4   :  { %s4735_s20 = smov 0   ;;  %s4737_s21 = smov 0  }
   0x5 LB: > { %s4752_s22 = sadd.s32 4294967295, %s4688_s21   ;;  %s3531_s23 = sadd.s32 4294967294, %s4688_s21   ;;  %s4688_s21 = sphi %s4737_s21, %s6085_s21   ;;  %s4684_s20 = sphi %s4735_s20, %s6084_s20   ;;  %s4680_s19 = sphi %s4733_s19, %s6083_s19   ;;  %s4676_s18 = sphi %s4731_s18, %s6082_s18  }
   0x6   : > { %s4756_s24 = sadd.s32 1, %s4688_s21   ;;  %s54_s25 = sadd.s32 1, %s4684_s20 }
   0x7   : > { %s51_s26 = ssub.s32 %s4688_s21, %s4756_s24  ;;  %p61_p0 = scmp.ne.s32.totalorder %s4684_s20, %s4680_s19 }
   0x8   : > { %p52_p1 = scmp.eq.s32.totalorder %s51_s26, 0  ;;  %p62_p2 = scmp.eq.s32.totalorder %s4688_s21, 0 }
   0x9   : > { %p67_p3 = scmp.ne.s32.totalorder %s4680_s19, %s4676_s18  ;;  %p68_p4 = scmp.eq.s32.totalorder %s4752_s22, 0 }
   0xa   : > { %s4768_s27 = scalar_select %p52_p1, %s4684_s20, %s54_s25  }
   0xb   : > { %p4770_p5 = por %p62_p2, %p61_p0  ;;  %p4774_p6 = por %p68_p4, %p67_p3 }
   0xc   : > { %p159_p7 = scmp.eq.s32.totalorder %s4752_s22, 3  ;;  %p165_p8 = scmp.eq.s32.totalorder %s3531_s23, 3 }
   0xd   : > { %p4314_p9 = scmp.lt.s32.totalorder %s4688_s21, 4  ;;  %s198_s7 = sand.u32 1, %s4684_s20  }
   0xe   : > { %p4780_p10 = por %p159_p7, %p61_p0  ;;  %p4784_p11 = por %p165_p8, %p67_p3 }
   0xf   : > { %s3685_s8 = sshll.u32 %s4688_s21, 10  ;;  %s3534_s9 = sshll.u32 %s198_s7, 6 }
  0x10   : > { %s6069_s30 = scalar_select %p4780_p10, 1, 0 }
  0x11   : > { %s6070_s6 = scalar_select %p4784_p11, 1, 0 }
  0x12   : > { %s4793_s12 = scalar_lea.hbm %s6061_s1, %s3685_s8  ;;  %s202_s13 = scalar_lea.vmem [#allocation2], %s3534_s9 }
  0x13   : > { %s210_s14 = sshll.u32 %s202_s13, 4  ;;  %p4797_p12 = pnand %p4314_p9, %p4770_p5  ;;  %s4801_s14 = int_to_ptr.vmem [resolvable:$true] %s210_s14 }
  0x14   : > { %s199_s16 = scalar_lea.sflag [#allocation3], %s198_s7  ;;  %s4592_s17 = scalar_lea.hbm %s4793_s12, 1024 }
  0x15   : > { %p4593_p1 = scmp.ne.s32.totalorder %s4793_s12, %s4592_s17  ;;  %p4594_p2 = pneg %p4797_p12 }
  0x16   : > { %s4597_s26 = scalar_lea.hbm %s6061_s1, 4096  ;;  %p4598_p5 = scmp.lt.u32.totalorder %s4793_s12, %s6061_s1 }
  0x17   : > { %p4595_p3 = pnand %p4594_p2, %p4593_p1  ;;  %p4599_p7 = scmp.lt.u32.totalorder %s4597_s26, %s4592_s17 }
  0x18   : > { %p4601_p9 = scmp.lt.u32.totalorder %s4592_s17, %s4793_s12 }
  0x19   : > { %p4596_p4 = pneg %p4595_p3  ;;  %p4600_p8 = por %p4599_p7, %p4598_p5 }
  0x1b   : > { %p4602_p13 = por %p4601_p9, %p4600_p8 }
  0x1d   : > { %p4603_p0 = pnand %p4602_p13, %p4596_p4 }
  0x1f   : > { %4606 = shalt.err (!%p4603_p0)
}
  0x20   : > { %s4607_s7 = scalar_lea.vmem %s4801_s14, 1024  ;;  %s4690_s9 = smov [#allocation2]  }
  0x21   : > { %p4608_p1 = scmp.ne.s32.totalorder %s4801_s14, %s4607_s7  ;;  %s4612_s10 = sshll.u32 %s4690_s9, 4  ;;  %s4613_s10 = int_to_ptr.vmem [resolvable:$false] %s4612_s10 }
  0x22   : > { %s4614_s11 = scalar_lea.vmem %s4613_s10, 2048  ;;  %p4615_p10 = scmp.lt.s32.totalorder %s4801_s14, %s4613_s10 }
  0x23   : > { %p4610_p3 = pnand %p4608_p1, %p4594_p2  ;;  %p4616_p5 = scmp.lt.s32.totalorder %s4614_s11, %s4607_s7 }
  0x25   : > { %p4611_p11 = pneg %p4610_p3  ;;  %p4617_p7 = por %p4616_p5, %p4615_p10 }
  0x27   : > { %p4618_p8 = pnand %p4617_p7, %p4611_p11 }
  0x29   : > { %4621 = shalt.err (!%p4618_p8)
}
  0x2a   : > { %4309 = dma.hbm_to_vmem [thread:$0]  (!%p4797_p12), %s4793_s12, 1024, %s4801_s14, %s199_s16  }
  0x2b   : > { %p6072_p13 = scmp.lt.s32.totalorder %s4688_s21, 5  ;;  %p6073_p0 = scmp.ge.s32.totalorder %s4688_s21, 1 }
  0x2d   : > { %p223_p2 = pnand %p6073_p0, %p6072_p13 }
  0x2e   : > { %s4835_s13 = sand.u32 (!%p223_p2), 1, %s4680_s19  }
  0x2f   : > { %226 = sbr.rel (%p223_p2) target bundleno = 2465 (0x9a1), region = 40  ;;  %s3538_s17 = sshll.u32 (!%p223_p2), %s4835_s13, 6 }
  0x30   : > { %s229_s23 = scalar_lea.sflag (!%p223_p2), [#allocation3], %s4835_s13  ;;  %s4839_s25 = scalar_lea.vmem (!%p223_p2), [#allocation2], %s3538_s17 }
  0x36   : > { %4667 = dma.done.wait (%p4774_p6), %s229_s23, 1024  }
  0x37   : > { %4669 = vsyncadd (%p4774_p6), %s229_s23, 4294966272  ;;  %p267_p10 = scmp.lt.s32.totalorder %s4752_s22, 3  ;;  %v310_v1 = vld [vmem:[%s4839_s25] sm:$0xff]  ;;  %v288_v4 = vlaneseq  ;;  %vm395_vm0 = vcmask 130048   ;;  %v4691_v28 = vmov 0   ;;  %vm4692_vm4 = vmmov 1  }
  0x38   : > { %v4868_v9 = vld [vmem:[%s6063_s3] sm:$0xff]  ;;  %4357 = vset.pattern.permute.xlu0 %v4691_v28  ;;  %vm4695_vm8 = vmmov 0   ;;  %vm582_vm12 = vcmask 523264   ;;  %p6080_p11 = scmp.ne.s32.totalorder %s6069_s30, 0  ;;  %s4697_s23 = smov [#allocation5]  }
  0x39   : > { %s4847_s12 = scalar_select %p267_p10, %s4752_s22, 3  ;;  %v4863_v7 = vshrl.u32 %v288_v4, 7  ;;  %3858 = vmatprep.mubr.msk.f32.mxu0 %vm395_vm0, %v4868_v9  ;;  %v287_v25 = vld [vmem:[%s6064_s4] sm:$0xff] }
  0x3a   : > { %549 = vperm.xlu0 %4357, %v287_v25  }
  0x3b   : > { %s3540_s14 = sshll.u32 %s4847_s12, 3  ;;  %v4873_v13 = vsub.s32 0, %v4863_v7  ;;  %vm290_vm3 = vcmp.eq.s32.totalorder %v4863_v7, 0  ;;  %vm293_vm15 = vcmp.lt.s32.totalorder %v4863_v7, 4 }
  0x3c   : > { %s4855_s26 = scalar_lea.vmem %s6060_s0, %s3540_s14  ;;  %vm4894_vm5 = vmpackc.low %vm290_vm3, %vm4692_vm4  ;;  %s5070_s8 = scalar_lea.vmem %s6062_s2, %s3540_s14 }
  0x3d   : > { %v4858_v0 = vld [vmem:[%s4855_s26] sm:$0xff]  ;;  %s3682_s14 = sshll.u32 %s4752_s22, 7  ;;  %s3422_s22 = scalar_lea.sflag [#allocation4], %s4835_s13 }
  0x3e   : > { %v312_v2 = vmul.f32 %v310_v1, %v4858_v0  ;;  %v308_v41 = vadd.f32 1.0, %v4858_v0  ;;  %s6015_s11 = scalar_lea.hbm %s6065_s5, %s3682_s14 }
  0x40   : > { %v313_v3 = vrot.slane %v312_v2, 4  ;;  %v319_v11 = vmul.f32 2.0, %v312_v2 }
  0x42   : > { %v314_v5 = vadd.f32 %v313_v3, %v312_v2 }
  0x44   : > { %v315_v6 = vrot.slane %v314_v5, 2 }
  0x46   : > { %v316_v8 = vadd.f32 %v315_v6, %v314_v5 }
  0x48   : > { %v317_v10 = vrot.slane %v316_v8, 1 }
  0x4a   : > { %v318_v12 = vadd.f32 %v317_v10, %v316_v8 }
  0x4c   : > { %v320_v14 = vsub.f32 %v318_v12, %v319_v11 }
  0x4e   : > { %v321_v15 = vsub.f32 0.0, %v320_v14  ;;  %v338_v16 = vrot.slane %v320_v14, %v4873_v13 }
  0x50   : > { %v322_v17 = vmax.f32 %v321_v15, 1.0000001  ;;  %v339_v18 = vmul.f32 %v338_v16, %v4858_v0 }
  0x52   : > { %v323_v19 = vmul.f32 %v322_v17, %v322_v17  ;;  %v340_v20 = vadd.f32 %v339_v18, %v310_v1  ;;  %v4693_v18 = vmov 1.0  }
  0x54   : > { %v3545_v21 = vadd.f32 -1.0, %v323_v19  ;;  %v341_v22 = vmul.f32 %v340_v20, %v340_v20  ;;  %v348_v27 = vmul.f32 2.0, %v340_v20 }
  0x56   : > { %4358 = vrsqrt.f32 %v3545_v21  ;;  %v342_v23 = vrot.slane %v341_v22, 4  ;;  %v349_v31 = vmul.f32 %v348_v27, %v340_v20  ;;  %vm327_vm1 = vcmp.eq.f32.partialorder %v3545_v21, inf  ;;  %v4941_v27 = vld [vmem:[%s6063_s3 + $0x30] sm:$0xff] }
  0x57   : > { %v330_v33 = vand.u32 2147483648, %v3545_v21  ;;  %vm329_vm2 = vcmp.eq.f32.partialorder %v3545_v21, 0.0 }
  0x58   : > { %v343_v24 = vadd.f32 %v342_v23, %v341_v22  ;;  %v4920_v22 = vld [vmem:[%s6063_s3 + $0x18] sm:$0xff]  ;;  %v731_v23 = vld [vmem:[%s4839_s25 + $0x8] sm:$0xff] }
  0x59   : > { %v733_v25 = vmul.f32 %v731_v23, %v4858_v0 }
  0x5a   : > { %v344_v26 = vrot.slane %v343_v24, 2 }
  0x5b   : > { %v734_v28 = vrot.slane %v733_v25, 4 }
  0x5c   : > { %v345_v29 = vadd.f32 %v344_v26, %v343_v24  ;;  %v4926_v24 = vld [vmem:[%s6063_s3 + $0x20] sm:$0xff]  ;;  %v4936_v26 = vld [vmem:[%s6063_s3 + $0x28] sm:$0xff] }
  0x5e   : > { %v346_v30 = vrot.slane %v345_v29, 1 }
  0x60   : > { %v4359_v32 = vpop.eup %4358  ;;  %v347_v35 = vadd.f32 %v346_v30, %v345_v29  ;;  %v4950_v29 = vld [vmem:[%s6063_s3 + $0x38] sm:$0xff]  ;;  %v4955_v30 = vld [vmem:[%s6063_s3 + $0x40] sm:$0xff] }
  0x61   : > { %v326_v34 = vmul.f32 %v4359_v32, %v3545_v21  ;;  %v4964_v32 = vld [vmem:[%s6063_s3 + $0x48] sm:$0xff] }
  0x62   : > { %v350_v37 = vsub.f32 %v347_v35, %v349_v31  ;;  %v735_v31 = vadd.f32 %v734_v28, %v733_v25 }
  0x63   : > { %v328_v36 = vsel %vm327_vm1, %v3545_v21, %v326_v34  ;;  %v4911_v21 = vld [vmem:[%s6063_s3 + $0x10] sm:$0xff] }
  0x64   : > { %v331_v38 = vsel %vm329_vm2, %v330_v33, %v328_v36  ;;  %v351_v40 = vmax.f32 %v350_v37, 1e-08  ;;  %v736_v33 = vrot.slane %v735_v31, 2  ;;  %v740_v37 = vmul.f32 2.0, %v733_v25 }
  0x65   : > { %v332_v39 = vadd.f32 %v331_v38, %v322_v17 }
  0x66   : > { %v737_v34 = vadd.f32 %v736_v33, %v735_v31 }
  0x67   : > { %4360 = vlog2.f32 %v332_v39 }
  0x68   : > { %4362 = vrsqrt.f32 %v351_v40  ;;  %v738_v35 = vrot.slane %v737_v34, 1 }
  0x69   : > { %4364 = vrcp.f32 %v308_v41 }
  0x6a   : > { %v739_v36 = vadd.f32 %v738_v35, %v737_v34 }
  0x6c   : > { %v741_v38 = vsub.f32 %v739_v36, %v740_v37 }
  0x6e   : > { %v759_v39 = vrot.slane %v741_v38, %v4873_v13  ;;  %v742_v40 = vsub.f32 0.0, %v741_v38 }
  0x70   : > { %v760_v41 = vmul.f32 %v759_v39, %v4858_v0 }
  0x71   : > { %v4361_v42 = vpop.eup %4360 }
  0x72   : > { %v4363_v43 = vpop.eup %4362  ;;  %v334_v44 = vmul.f32 0.6931472, %v4361_v42  ;;  %v743_v42 = vmax.f32 %v742_v40, 1.0000001 }
  0x73   : > { %v4882_v47 = vpop.eup %4364 }
  0x74   : > { %v353_v45 = vmul.f32 %v4363_v43, %v334_v44  ;;  %v761_v43 = vadd.f32 %v760_v41, %v731_v23  ;;  %v744_v44 = vmul.f32 %v743_v42, %v743_v42 }
  0x76   : > { %v357_v46 = vrot.slane %v353_v45, %v4873_v13  ;;  %v762_v45 = vmul.f32 %v761_v43, %v761_v43 }
  0x78   : > { %v358_v48 = vmul.f32 %v357_v46, %v340_v20  ;;  %v4906_v20 = vld [vmem:[%s6063_s3 + $0x8] sm:$0xff]  ;;  %v3562_v46 = vadd.f32 -1.0, %v744_v44 }
  0x7a   : > { %v359_v49 = vmul.f32 %v4882_v47, %v358_v48  ;;  %vm748_vm6 = vcmp.eq.f32.partialorder %v3562_v46, inf  ;;  %vm750_vm7 = vcmp.eq.f32.partialorder %v3562_v46, 0.0 }
  0x7c   : > { %v363_v50 = vrot.slane %v359_v49, %v4873_v13 }
  0x7e   : > { %v364_v51 = vmul.f32 %v363_v50, %v4858_v0 }
  0x80   : > { %v365_v52 = vsub.f32 %v358_v48, %v364_v51  ;;  %v763_v48 = vrot.slane %v762_v45, 4 }
  0x82   : > { %v366_v53 = vmul.f32 %v365_v52, %v365_v52  ;;  %v764_v49 = vadd.f32 %v763_v48, %v762_v45 }
  0x84   : > { %v367_v54 = vrot.slane %v366_v53, 4  ;;  %v765_v50 = vrot.slane %v764_v49, 2 }
  0x86   : > { %v368_v55 = vadd.f32 %v367_v54, %v366_v53 }
  0x88   : > { %v369_v56 = vrot.slane %v368_v55, 2 }
  0x8a   : > { %v370_v57 = vadd.f32 %v369_v56, %v368_v55  ;;  %v769_v55 = vmul.f32 2.0, %v761_v43  ;;  %v751_v56 = vand.u32 2147483648, %v3562_v46 }
  0x8c   : > { %v371_v58 = vrot.slane %v370_v57, 1 }
  0x8e   : > { %v372_v59 = vadd.f32 %v371_v58, %v370_v57 }
  0x90   : > { %v373_v60 = vsub.f32 %v372_v59, %v366_v53  ;;  %v770_v59 = vmul.f32 %v769_v55, %v761_v43  ;;  %v300_v55 = vadd.s32 1, %v4863_v7 }
  0x92   : > { %v374_v61 = vmax.f32 %v373_v60, 1e-08 }
  0x94   : > { %4366 = vrsqrt.f32 %v374_v61 }
  0x9e   : > { %v4367_v62 = vpop.eup %4366 }
  0x9f   : > { %v376_v63 = vmul.f32 %v4367_v62, %v373_v60 }
  0xa1   : > { %v377_v1 = vmul.f32 1.442695, %v376_v63 }
  0xa3   : > { %4368 = vpow2.f32 %v377_v1 }
  0xad   : > { %v4369_v2 = vpop.eup %4368 }
  0xae   : > { %4370 = vrcp.f32 %v4369_v2 }
  0xaf   : > { %4372 = vrsqrt.f32 %v3562_v46 }
  0xb8   : > { %v4371_v3 = vpop.eup %4370 }
  0xb9   : > { %v380_v5 = vsub.f32 %v4369_v2, %v4371_v3  ;;  %v382_v6 = vadd.f32 %v4371_v3, %v4369_v2  ;;  %v4373_v51 = vpop.eup %4372  ;;  %v4694_v2 = vmov 0.0|0.0  }
  0xba   : > { %v747_v53 = vmul.f32 %v4373_v51, %v3562_v46  ;;  %4164 = vmatprep.subr.bf16.mxu1 %v4694_v2 }
  0xbb   : > { %v381_v8 = vmul.f32 0.5, %v380_v5  ;;  %v383_v10 = vmul.f32 0.5, %v382_v6 }
  0xbc   : > { %v749_v57 = vsel %vm748_vm6, %v3562_v46, %v747_v53 }
  0xbd   : > { %v384_v11 = vmul.f32 %v4367_v62, %v381_v8  ;;  %v393_v14 = vrot.slane %v383_v10, %v4873_v13  ;;  %v752_v60 = vsel %vm750_vm7, %v751_v56, %v749_v57 }
  0xbe   : > { %v753_v61 = vadd.f32 %v752_v60, %v743_v42 }
  0xbf   : > { %v388_v12 = vrot.slane %v384_v11, %v4873_v13  ;;  %v4696_v11 = vmov 0.0  }
  0xc0   : > { %4374 = vlog2.f32 %v753_v61  ;;  %3889 = vmatprep.mubr.msk.f32.mxu1 %vm4695_vm8, %v4696_v11  ;;  %v297_v61 = vand.u32 127, %v288_v4 }
  0xc1   : > { %v389_v15 = vmul.f32 %v388_v12, %v365_v52  ;;  %v766_v52 = vadd.f32 %v765_v50, %v764_v49 }
  0xc3   : > { %v394_v16 = vsel %vm290_vm3, %v393_v14, %v389_v15  ;;  %v767_v54 = vrot.slane %v766_v52, 1 }
  0xc4   : > { %v4158_v19 = vpack.c.bf16 %v4693_v18, %v394_v16 }
  0xc5   : > { %v768_v58 = vadd.f32 %v767_v54, %v766_v52 }
  0xc6   : > { %4160 = vmatprep.subr.msk.bf16.mxu0 %vm4894_vm5, %v4158_v19 }
  0xc7   : > { %4163 = vmatpush3.bf16.msk.msra.mxu0 %vm4894_vm5, %v4158_v19  ;;  %v771_v62 = vsub.f32 %v768_v58, %v770_v59 }
  0xc8   : > { %4182 = vmatprep.subr.bf16.mxu0 %v4694_v2 }
  0xc9   : > { %v772_v63 = vmax.f32 %v771_v62, 1e-08  ;;  %v298_v62 = vmul.u32 16, %v4863_v7 }
  0xca   : > { %3859 = vmatmul.mubr.msk.f32.vlgmr.msra.gmra.mrb[0].mxu0 %vm395_vm0, %v4906_v20  ;;  %v4375_v1 = vpop.eup %4374 }
  0xcb   : > { %3861 = vmatprep.mubr.msk.f32.mxu0 %vm395_vm0, %v4911_v21  ;;  %4376 = vrsqrt.f32 %v772_v63  ;;  %v755_v3 = vmul.f32 0.6931472, %v4375_v1  ;;  %vm5013_vm9 = vcmp.ge.s32.totalorder %v297_v61, %v298_v62  ;;  %v5081_v62 = vpop.permute.xlu0 %549 }
  0xce   : > { %3862 = vmatmul.mubr.msk.f32.gmra.mrb[2].mxu0 %vm395_vm0, %v4920_v22 }
  0xcf   : > { %3864 = vmatprep.mubr.msk.f32.mxu0 %vm395_vm0, %v4926_v24 }
  0xd2   : > { %3865 = vmatmul.mubr.msk.f32.gmra.mrb[4].mxu0 %vm395_vm0, %v4936_v26 }
  0xd3   : > { %3867 = vmatprep.mubr.msk.f32.mxu0 %vm395_vm0, %v4941_v27 }
  0xd5   : > { %v4377_v5 = vpop.eup %4376 }
  0xd6   : > { %3868 = vmatmul.mubr.msk.f32.gmra.mrb[6].mxu0 %vm395_vm0, %v4950_v29  ;;  %v774_v6 = vmul.f32 %v4377_v5, %v755_v3  ;;  %v301_v3 = vmul.u32 16, %v300_v55 }
  0xd7   : > { %3870 = vmatprep.mubr.msk.f32.mxu0 %vm395_vm0, %v4955_v30 }
  0xd8   : > { %v778_v8 = vrot.slane %v774_v6, %v4873_v13  ;;  %vm5017_vm10 = vcmp.lt.s32.totalorder %v297_v61, %v301_v3  ;;  %v3559_v61 = vld [vmem:[%s5070_s8] ss:$0 sm:$0xff] }
  0xd9   : > { %vm303_vm11 = vmand %vm5013_vm9, %vm5017_vm10 }
  0xda   : > { %3871 = vmatmul.mubr.msk.f32.gmra.mrb[8].mxu0 %vm395_vm0, %v4964_v32  ;;  %v779_v10 = vmul.f32 %v778_v8, %v761_v43 }
  0xdb   : > { %3927 = vmatprep.mubr.msk.f32.mxu0 %vm4695_vm8, %v4696_v11 }
  0xdc   : > { %v780_v12 = vmul.f32 %v4882_v47, %v779_v10 }
  0xde   : > { %v784_v14 = vrot.slane %v780_v12, %v4873_v13 }
  0xe0   : > { %v785_v15 = vmul.f32 %v784_v14, %v4858_v0 }
  0xe2   : > { %v786_v16 = vsub.f32 %v779_v10, %v785_v15 }
  0xe4   : > { %v787_v19 = vmul.f32 %v786_v16, %v786_v16 }
  0xe6   : > { %v788_v23 = vrot.slane %v787_v19, 4 }
  0xe8   : > { %v789_v25 = vadd.f32 %v788_v23, %v787_v19 }
  0xea   : > { %v790_v28 = vrot.slane %v789_v25, 2 }
  0xec   : > { %v791_v31 = vadd.f32 %v790_v28, %v789_v25 }
  0xee   : > { %v792_v33 = vrot.slane %v791_v31, 1 }
  0xf0   : > { %v793_v34 = vadd.f32 %v792_v33, %v791_v31 }
  0xf2   : > { %v794_v35 = vsub.f32 %v793_v34, %v787_v19 }
  0xf4   : > { %v795_v36 = vmax.f32 %v794_v35, 1e-08 }
  0xf6   : > { %4378 = vrsqrt.f32 %v795_v36 }
 0x100   : > { %v4379_v37 = vpop.eup %4378 }
 0x101   : > { %v797_v38 = vmul.f32 %v4379_v37, %v794_v35 }
 0x103   : > { %v798_v39 = vmul.f32 1.442695, %v797_v38  ;;  %v5036_v38 = vsel %vm303_vm11, 1.0, %v4696_v11 }
 0x105   : > { %4380 = vpow2.f32 %v798_v39 }
 0x10f   : > { %v4381_v40 = vpop.eup %4380 }
 0x110   : > { %4382 = vrcp.f32 %v4381_v40 }
 0x11a   : > { %v4383_v41 = vpop.eup %4382 }
 0x11b   : > { %v801_v42 = vsub.f32 %v4381_v40, %v4383_v41  ;;  %v803_v48 = vadd.f32 %v4383_v41, %v4381_v40  ;;  %v1112_v41 = vld [vmem:[%s4839_s25 + $0x10] sm:$0xff] }
 0x11d   : > { %v802_v44 = vmul.f32 0.5, %v801_v42  ;;  %v804_v56 = vmul.f32 0.5, %v803_v48 }
 0x11f   : > { %v805_v49 = vmul.f32 %v4379_v37, %v802_v44  ;;  %v814_v6 = vrot.slane %v804_v56, %v4873_v13  ;;  %v1114_v44 = vmul.f32 %v1112_v41, %v4858_v0 }
 0x121   : > { %v809_v57 = vrot.slane %v805_v49, %v4873_v13 }
 0x123   : > { %v810_v5 = vmul.f32 %v809_v57, %v786_v16 }
 0x125   : > { %v815_v19 = vsel %vm290_vm3, %v814_v6, %v810_v5 }
 0x126   : > { %v4176_v35 = vpack.c.bf16 %v4693_v18, %v815_v19  ;;  %v1121_v19 = vmul.f32 2.0, %v1114_v44 }
 0x19d   : > { %v4980_v43 = vpop.f32.mrb[0].mxu0 }
 0x19e   : > { %v492_v45 = vpop.f32.mrb[1].mxu0  ;;  %v574_v51 = vmul.f32 %v4980_v43, %v4980_v43 }
 0x19f   : > { %v3557_v23 = vmul.f32 -1.442695, %v492_v45 }
 0x1a1   : > { %v4982_v46 = vpop.f32.mrb[2].mxu0  ;;  %4384 = vpow2.f32 %v3557_v23 }
 0x1a2   : > { %v4984_v50 = vpop.f32.mrb[3].mxu0  ;;  %v576_v59 = vmul.f32 %v4982_v46, %v4982_v46 }
 0x1a3   : > { %v575_v52 = vmul.f32 %v4984_v50, %v4984_v50 }
 0x1a5   : > { %v4990_v53 = vpop.f32.mrb[4].mxu0  ;;  %v4165_v54 = vpack.c.bf16 %v575_v52, %v574_v51  ;;  %v1115_v52 = vrot.slane %v1114_v44, 4 }
 0x1a6   : > { %v4994_v58 = vpop.f32.mrb[5].mxu0  ;;  %v578_v10 = vmul.f32 %v4990_v53, %v4990_v53 }
 0x1a7   : > { %v577_v60 = vmul.f32 %v4994_v58, %v4994_v58  ;;  %4166 = vmatpush3.bf16.msra.mxu1 %v4165_v54  ;;  %v1116_v56 = vadd.f32 %v1115_v52, %v1114_v44 }
 0x1a8   : > { %4167 = vmatprep.subr.bf16.mxu1 %v4694_v2 }
 0x1a9   : > { %v4168_v63 = vpack.c.bf16 %v577_v60, %v576_v59  ;;  %v5003_v1 = vpop.f32.mrb[6].mxu0  ;;  %v1117_v57 = vrot.slane %v1116_v56, 2  ;;  %v5078_v60 = vsel %vm293_vm15, 1.0, %v4696_v11 }
 0x1aa   : > { %v5006_v8 = vpop.f32.mrb[7].mxu0  ;;  %v580_v31 = vmul.f32 %v5003_v1, %v5003_v1  ;;  %v572_v3 = vmul.f32 %v3559_v61, %v5078_v60 }
 0x1ab   : > { %v579_v12 = vmul.f32 %v5006_v8, %v5006_v8  ;;  %4169 = vmatpush3.bf16.msra.mxu1 %v4168_v63  ;;  %v4385_v40 = vpop.eup %4384  ;;  %v1118_v63 = vadd.f32 %v1117_v57, %v1116_v56 }
 0x1ac   : > { %4170 = vmatprep.subr.bf16.mxu1 %v4694_v2  ;;  %v544_v42 = vadd.f32 1.0, %v4385_v40 }
 0x1ad   : > { %v4171_v4 = vpack.c.bf16 %v579_v12, %v578_v10  ;;  %v3872_v14 = vpop.f32.mrb[8].mxu0  ;;  %v1119_v12 = vrot.slane %v1118_v63, 1 }
 0x1ae   : > { %v554_v25 = vsub.f32 0.0, %v3872_v14  ;;  %v5023_v28 = vpop.f32.mrb[9].mxu0 }
 0x1af   : > { %v581_v33 = vmul.f32 %v5023_v28, %v5023_v28  ;;  %4172 = vmatpush3.bf16.msra.mxu1 %v4171_v4  ;;  %v1120_v16 = vadd.f32 %v1119_v12, %v1118_v63 }
 0x1b0   : > { %v555_v34 = vmax.f32 %v554_v25, 1.0000001  ;;  %4173 = vmatprep.subr.bf16.mxu1 %v4694_v2 }
 0x1b1   : > { %v4174_v36 = vpack.c.bf16 %v581_v33, %v580_v31  ;;  %v1122_v23 = vsub.f32 %v1120_v16, %v1121_v19 }
 0x1b2   : > { %v556_v37 = vmul.f32 %v555_v34, %v555_v34 }
 0x1b3   : > { %4175 = vmatpush3.bf16.msra.mxu1 %v4174_v36  ;;  %v1140_v25 = vrot.slane %v1122_v23, %v4873_v13  ;;  %v1123_v31 = vsub.f32 0.0, %v1122_v23 }
 0x1b4   : > { %v3558_v39 = vadd.f32 -1.0, %v556_v37  ;;  %4178 = vmatprep.subr.msk.bf16.mxu1 %vm4894_vm5, %v4176_v35 }
 0x1b5   : > { %v1141_v33 = vmul.f32 %v1140_v25, %v4858_v0 }
 0x1b6   : > { %4386 = vrsqrt.f32 %v3558_v39  ;;  %3890 = vmatmul.mubr.msk.f32.vlgmr.msra.gmra.mrb[0].mxu1 %vm582_vm12, %v5036_v38  ;;  %vm560_vm13 = vcmp.eq.f32.partialorder %v3558_v39, inf  ;;  %v563_v49 = vand.u32 2147483648, %v3558_v39  ;;  %vm562_vm14 = vcmp.eq.f32.partialorder %v3558_v39, 0.0 }
 0x1b7   : > { %4181 = vmatpush3.bf16.msk.msra.mxu1 %vm4894_vm5, %v4176_v35  ;;  %3896 = vmatprep.mubr.msk.f32.mxu1 %vm395_vm0, %v4868_v9  ;;  %4388 = vrcp.f32 %v544_v42  ;;  %v1142_v35 = vadd.f32 %v1141_v33, %v1112_v41 }
 0x1b8   : > { %4200 = vmatprep.subr.bf16.mxu1 %v4694_v2 }
 0x1b9   : > { %v1143_v37 = vmul.f32 %v1142_v35, %v1142_v35  ;;  %v1150_v52 = vmul.f32 2.0, %v1142_v35 }
 0x1ba   : > { %3897 = vmatmul.mubr.msk.f32.vlgmr.msra.gmra.mrb[2].mxu1 %vm395_vm0, %v4906_v20 }
 0x1bb   : > { %3899 = vmatprep.mubr.msk.f32.mxu1 %vm395_vm0, %v4911_v21  ;;  %v1144_v40 = vrot.slane %v1143_v37, 4  ;;  %v1151_v57 = vmul.f32 %v1150_v52, %v1142_v35 }
 0x1bd   : > { %v1145_v42 = vadd.f32 %v1144_v40, %v1143_v37 }
 0x1be   : > { %3900 = vmatmul.mubr.msk.f32.gmra.mrb[4].mxu1 %vm395_vm0, %v4920_v22 }
 0x1bf   : > { %3902 = vmatprep.mubr.msk.f32.mxu1 %vm395_vm0, %v4926_v24 }
 0x1c0   : > { %v4387_v45 = vpop.eup %4386 }
 0x1c1   : > { %v559_v48 = vmul.f32 %v4387_v45, %v3558_v39  ;;  %v4389_v59 = vpop.eup %4388  ;;  %v1146_v45 = vrot.slane %v1145_v42, 2 }
 0x1c2   : > { %3903 = vmatmul.mubr.msk.f32.gmra.mrb[6].mxu1 %vm395_vm0, %v4936_v26  ;;  %v552_v5 = vmul.f32 %v4389_v59, %v5081_v62 }
 0x1c3   : > { %v561_v51 = vsel %vm560_vm13, %v3558_v39, %v559_v48  ;;  %3905 = vmatprep.mubr.msk.f32.mxu1 %vm395_vm0, %v4941_v27 }
 0x1c4   : > { %v564_v54 = vsel %vm562_vm14, %v563_v49, %v561_v51  ;;  %v5087_v14 = vadd.f32 1.0001, %v552_v5  ;;  %v1147_v49 = vadd.f32 %v1146_v45, %v1145_v42 }
 0x1c5   : > { %v565_v55 = vadd.f32 %v564_v54, %v555_v34  ;;  %v1124_v34 = vmax.f32 %v1123_v31, 1.0000001 }
 0x1c6   : > { %3906 = vmatmul.mubr.msk.f32.gmra.mrb[8].mxu1 %vm395_vm0, %v4950_v29  ;;  %v1148_v44 = vrot.slane %v1147_v49, 1 }
 0x1c7   : > { %4390 = vlog2.f32 %v565_v55  ;;  %3908 = vmatprep.mubr.msk.f32.mxu1 %vm395_vm0, %v4955_v30  ;;  %v1125_v36 = vmul.f32 %v1124_v34, %v1124_v34 }
 0x1c8   : > { %v1149_v56 = vadd.f32 %v1148_v44, %v1147_v49 }
 0x1c9   : > { %v3579_v39 = vadd.f32 -1.0, %v1125_v36 }
 0x1ca   : > { %3909 = vmatmul.mubr.msk.f32.gmra.mrb[10].mxu1 %vm395_vm0, %v4964_v32  ;;  %v1152_v61 = vsub.f32 %v1149_v56, %v1151_v57 }
 0x1cb   : > { %3965 = vmatprep.mubr.msk.f32.mxu1 %vm4695_vm8, %v4696_v11  ;;  %4392 = vrsqrt.f32 %v3579_v39  ;;  %vm1129_vm1 = vcmp.eq.f32.partialorder %v3579_v39, inf  ;;  %v1132_v54 = vand.u32 2147483648, %v3579_v39  ;;  %vm1131_vm2 = vcmp.eq.f32.partialorder %v3579_v39, 0.0 }
 0x1cc   : > { %v1153_v63 = vmax.f32 %v1152_v61, 1e-08 }
 0x1d1   : > { %v4391_v6 = vpop.eup %4390 }
 0x1d2   : > { %v567_v10 = vmul.f32 0.6931472, %v4391_v6 }
 0x1d4   : > { %v5085_v4 = vmul.f32 %v572_v3, %v567_v10 }
 0x1d5   : > { %v4393_v48 = vpop.eup %4392 }
 0x1d6   : > { %v5091_v15 = vmul.f32 %v5085_v4, %v5087_v14  ;;  %v1128_v51 = vmul.f32 %v4393_v48, %v3579_v39 }
 0x1d8   : > { %v1130_v55 = vsel %vm1129_vm1, %v3579_v39, %v1128_v51 }
 0x1d9   : > { %v1133_v59 = vsel %vm1131_vm2, %v1132_v54, %v1130_v55 }
 0x1da   : > { %v1134_v41 = vadd.f32 %v1133_v59, %v1124_v34 }
 0x1dc   : > { %4394 = vlog2.f32 %v1134_v41 }
 0x1dd   : > { %4396 = vrsqrt.f32 %v1153_v63  ;;  %v656_v63 = vmul.f32 %v5087_v14, %v5087_v14 }
 0x1e6   : > { %v4395_v3 = vpop.eup %4394 }
 0x1e7   : > { %v1136_v5 = vmul.f32 0.6931472, %v4395_v3  ;;  %v4397_v6 = vpop.eup %4396 }
 0x1e9   : > { %v1155_v10 = vmul.f32 %v4397_v6, %v1136_v5 }
 0x1eb   : > { %v1159_v12 = vrot.slane %v1155_v10, %v4873_v13 }
 0x1ed   : > { %v1160_v16 = vmul.f32 %v1159_v12, %v1142_v35 }
 0x1ef   : > { %v1161_v19 = vmul.f32 %v4882_v47, %v1160_v16 }
 0x1f1   : > { %v1165_v23 = vrot.slane %v1161_v19, %v4873_v13  ;;  %v3561_v19 = vadd.f32 -1.0, %v656_v63 }
 0x1f3   : > { %v1166_v25 = vmul.f32 %v1165_v23, %v4858_v0 }
 0x1f5   : > { %v1167_v31 = vsub.f32 %v1160_v16, %v1166_v25 }
 0x1f7   : > { %v1168_v33 = vmul.f32 %v1167_v31, %v1167_v31 }
 0x1f9   : > { %v1169_v34 = vrot.slane %v1168_v33, 4 }
 0x1fb   : > { %v1170_v36 = vadd.f32 %v1169_v34, %v1168_v33 }
 0x1fd   : > { %v1171_v37 = vrot.slane %v1170_v36, 2 }
 0x1ff   : > { %v1172_v39 = vadd.f32 %v1171_v37, %v1170_v36 }
 0x201   : > { %v1173_v40 = vrot.slane %v1172_v39, 1 }
 0x203   : > { %v1174_v42 = vadd.f32 %v1173_v40, %v1172_v39 }
 0x205   : > { %v1175_v45 = vsub.f32 %v1174_v42, %v1168_v33 }
 0x207   : > { %v1176_v48 = vmax.f32 %v1175_v45, 1e-08 }
 0x209   : > { %4398 = vrsqrt.f32 %v1176_v48 }
 0x213   : > { %v4399_v49 = vpop.eup %4398 }
 0x214   : > { %v1178_v51 = vmul.f32 %v4399_v49, %v1175_v45 }
 0x216   : > { %v1179_v35 = vmul.f32 1.442695, %v1178_v51 }
 0x218   : > { %4400 = vpow2.f32 %v1179_v35 }
 0x222   : > { %v4401_v44 = vpop.eup %4400 }
 0x223   : > { %4402 = vrcp.f32 %v4401_v44 }
 0x22d   : > { %v4403_v52 = vpop.eup %4402 }
 0x22e   : > { %v1182_v57 = vsub.f32 %v4401_v44, %v4403_v52  ;;  %v1184_v6 = vadd.f32 %v4403_v52, %v4401_v44 }
 0x230   : > { %v1183_v61 = vmul.f32 0.5, %v1182_v57  ;;  %v1185_v14 = vmul.f32 0.5, %v1184_v6 }
 0x232   : > { %v1186_v10 = vmul.f32 %v4399_v49, %v1183_v61  ;;  %v1195_v51 = vrot.slane %v1185_v14, %v4873_v13  ;;  %v670_v61 = vrot.slane %v5091_v15, 4 }
 0x234   : > { %v1190_v36 = vrot.slane %v1186_v10, %v4873_v13 }
 0x236   : > { %v1191_v49 = vmul.f32 %v1190_v36, %v1167_v31 }
 0x238   : > { %v1196_v31 = vsel %vm290_vm3, %v1195_v51, %v1191_v49  ;;  %v5156_v49 = vsub.s32 3, %v4863_v7 }
 0x289   : > { %v652_v54 = vpop.f32.mrb[0].mxu1 }
 0x28a   : > { %v658_v55 = vmax.f32 %v652_v54, 1e-08  ;;  %v3891_v56 = vpop.f32.mrb[1].mxu1 }
 0x28c   : > { %4404 = vrcp.f32 %v658_v55 }
 0x28d   : > { %v5099_v59 = vpop.f32.mrb[2].mxu1 }
 0x28e   : > { %v882_v41 = vpop.f32.mrb[3].mxu1  ;;  %v959_v12 = vmul.f32 %v5099_v59, %v5099_v59 }
 0x28f   : > { %v3574_v55 = vmul.f32 -1.442695, %v882_v41  ;;  %v4194_v41 = vpack.c.bf16 %v4693_v18, %v1196_v31 }
 0x291   : > { %v5103_v3 = vpop.f32.mrb[4].mxu1 }
 0x292   : > { %v5105_v5 = vpop.f32.mrb[5].mxu1  ;;  %v961_v40 = vmul.f32 %v5103_v3, %v5103_v3 }
 0x293   : > { %v960_v16 = vmul.f32 %v5105_v5, %v5105_v5 }
 0x295   : > { %v4183_v23 = vpack.c.bf16 %v960_v16, %v959_v12  ;;  %v5111_v25 = vpop.f32.mrb[6].mxu1 }
 0x296   : > { %v4405_v33 = vpop.eup %4404  ;;  %v5113_v34 = vpop.f32.mrb[7].mxu1  ;;  %v963_v35 = vmul.f32 %v5111_v25, %v5111_v25 }
 0x297   : > { %v660_v37 = vmul.f32 %v4405_v33, %v3561_v19  ;;  %v962_v39 = vmul.f32 %v5113_v34, %v5113_v34  ;;  %4184 = vmatpush3.bf16.msra.mxu0 %v4183_v23  ;;  %v671_v23 = vadd.f32 %v670_v61, %v5091_v15 }
 0x298   : > { %4185 = vmatprep.subr.bf16.mxu0 %v4694_v2 }
 0x299   : > { %4406 = vrsqrt.f32 %v660_v37  ;;  %v5121_v42 = vpop.f32.mrb[8].mxu1  ;;  %v4186_v45 = vpack.c.bf16 %v962_v39, %v961_v40  ;;  %vm663_vm4 = vcmp.eq.f32.partialorder %v660_v37, inf  ;;  %v666_v36 = vand.u32 2147483648, %v660_v37 }
 0x29a   : > { %v5123_v48 = vpop.f32.mrb[9].mxu1  ;;  %v965_v63 = vmul.f32 %v5121_v42, %v5121_v42  ;;  %4408 = vpow2.f32 %v3574_v55  ;;  %v5148_v39 = vsub.s32 1, %v4863_v7  ;;  %v5151_v40 = vsub.s32 2, %v4863_v7 }
 0x29b   : > { %v964_v44 = vmul.f32 %v5123_v48, %v5123_v48  ;;  %4187 = vmatpush3.bf16.msra.mxu0 %v4186_v45  ;;  %vm665_vm6 = vcmp.eq.f32.partialorder %v660_v37, 0.0  ;;  %v672_v15 = vrot.slane %v671_v23, 2 }
 0x29c   : > { %4188 = vmatprep.subr.bf16.mxu0 %v4694_v2 }
 0x29d   : > { %v4189_v52 = vpack.c.bf16 %v964_v44, %v963_v35  ;;  %v3910_v54 = vpop.f32.mrb[10].mxu1  ;;  %v673_v55 = vadd.f32 %v672_v15, %v671_v23 }
 0x29e   : > { %v939_v56 = vsub.f32 0.0, %v3910_v54  ;;  %v5131_v57 = vpop.f32.mrb[11].mxu1 }
 0x29f   : > { %v966_v6 = vmul.f32 %v5131_v57, %v5131_v57  ;;  %4190 = vmatpush3.bf16.msra.mxu0 %v4189_v52 }
 0x2a0   : > { %v5140_v10 = vmax.f32 %v939_v56, 1.0000001  ;;  %4191 = vmatprep.subr.bf16.mxu0 %v4694_v2 }
 0x2a1   : > { %v4192_v12 = vpack.c.bf16 %v966_v6, %v965_v63 }
 0x2a2   : > { %v941_v16 = vmul.f32 %v5140_v10, %v5140_v10 }
 0x2a3   : > { %v4407_v19 = vpop.eup %4406  ;;  %4193 = vmatpush3.bf16.msra.mxu0 %v4192_v12 }
 0x2a4   : > { %v662_v33 = vmul.f32 %v4407_v19, %v660_v37  ;;  %v3575_v14 = vadd.f32 -1.0, %v941_v16  ;;  %4196 = vmatprep.subr.msk.bf16.mxu0 %vm4894_vm5, %v4194_v41 }
 0x2a6   : > { %v664_v45 = vsel %vm663_vm4, %v660_v37, %v662_v33  ;;  %4410 = vrsqrt.f32 %v3575_v14  ;;  %3928 = vmatmul.mubr.msk.f32.vlgmr.msra.gmra.mrb[10].mxu0 %vm582_vm12, %v5036_v38  ;;  %vm945_vm7 = vcmp.eq.f32.partialorder %v3575_v14, inf  ;;  %vm947_vm9 = vcmp.eq.f32.partialorder %v3575_v14, 0.0 }
 0x2a7   : > { %v667_v51 = vsel %vm665_vm6, %v666_v36, %v664_v45  ;;  %4199 = vmatpush3.bf16.msk.msra.mxu0 %vm4894_vm5, %v4194_v41  ;;  %3934 = vmatprep.mubr.msk.f32.mxu0 %vm395_vm0, %v4868_v9  ;;  %v5183_v41 = vld [vmem:[%s4839_s25 + $0x18] sm:$0xff] }
 0x2a8   : > { %v668_v35 = vmul.f32 %v667_v51, %v5085_v4  ;;  %4218 = vmatprep.subr.bf16.mxu0 %v4694_v2  ;;  %v4409_v4 = vpop.eup %4408 }
 0x2aa   : > { %v679_v37 = vrot.slane %v668_v35, %v4873_v13  ;;  %v685_v44 = vrot.slane %v668_v35, %v5148_v39  ;;  %v693_v52 = vrot.slane %v668_v35, %v5151_v40  ;;  %v701_v54 = vrot.slane %v668_v35, %v5156_v49  ;;  %3935 = vmatmul.mubr.msk.f32.vlgmr.msra.gmra.mrb[12].mxu0 %vm395_vm0, %v4906_v20 }
 0x2ab   : > { %3937 = vmatprep.mubr.msk.f32.mxu0 %vm395_vm0, %v4911_v21  ;;  %v1495_v21 = vmul.f32 %v5183_v41, %v4858_v0 }
 0x2ac   : > { %v680_v56 = vmul.f32 %v4980_v43, %v679_v37  ;;  %v681_v9 = vmul.f32 %v679_v37, %v4984_v50  ;;  %v686_v31 = vmul.f32 %v4982_v46, %v685_v44  ;;  %v687_v61 = vmul.f32 %v685_v44, %v4994_v58  ;;  %v3576_v44 = vld [vmem:[%s5070_s8 + $0x1] ss:$0 sm:$0xff] }
 0x2ad   : > { %v694_v63 = vmul.f32 %v4990_v53, %v693_v52  ;;  %v695_v6 = vmul.f32 %v693_v52, %v5006_v8  ;;  %v702_v12 = vmul.f32 %v5003_v1, %v701_v54  ;;  %v703_v20 = vmul.f32 %v701_v54, %v5023_v28 }
 0x2ae   : > { %v688_v43 = vadd.f32 %v686_v31, %v680_v56  ;;  %v689_v16 = vadd.f32 %v687_v61, %v681_v9  ;;  %v934_v50 = vadd.f32 1.0, %v4409_v4  ;;  %3938 = vmatmul.mubr.msk.f32.gmra.mrb[14].mxu0 %vm395_vm0, %v4920_v22  ;;  %v674_v58 = vrot.slane %v673_v55, 1 }
 0x2af   : > { %3940 = vmatprep.mubr.msk.f32.mxu0 %vm395_vm0, %v4926_v24  ;;  %v948_v28 = vand.u32 2147483648, %v3575_v14  ;;  %v1496_v24 = vrot.slane %v1495_v21, 4 }
 0x2b0   : > { %v4411_v46 = vpop.eup %4410  ;;  %v696_v19 = vadd.f32 %v694_v63, %v688_v43  ;;  %v697_v53 = vadd.f32 %v695_v6, %v689_v16  ;;  %4412 = vrcp.f32 %v934_v50  ;;  %v675_v22 = vadd.f32 %v674_v58, %v673_v55 }
 0x2b1   : > { %v944_v1 = vmul.f32 %v4411_v46, %v3575_v14  ;;  %v957_v55 = vmul.f32 %v3576_v44, %v5078_v60  ;;  %v1502_v46 = vmul.f32 2.0, %v1495_v21 }
 0x2b2   : > { %v704_v8 = vadd.f32 %v702_v12, %v696_v19  ;;  %v705_v23 = vadd.f32 %v703_v20, %v697_v53  ;;  %3941 = vmatmul.mubr.msk.f32.gmra.mrb[16].mxu0 %vm395_vm0, %v4936_v26  ;;  %v1497_v26 = vadd.f32 %v1496_v24, %v1495_v21 }
 0x2b3   : > { %v946_v33 = vsel %vm945_vm7, %v3575_v14, %v944_v1  ;;  %3943 = vmatprep.mubr.msk.f32.mxu0 %vm395_vm0, %v4941_v27 }
 0x2b4   : > { %v949_v36 = vsel %vm947_vm9, %v948_v28, %v946_v33  ;;  %v706_v15 = vsel %vm290_vm3, %v675_v22, %v704_v8  ;;  %v709_v51 = vmul.f32 %v705_v23, %v705_v23  ;;  %v1498_v37 = vrot.slane %v1497_v26, 2 }
 0x2b5   : > { %v950_v45 = vadd.f32 %v949_v36, %v5140_v10  ;;  %v708_v14 = vmul.f32 %v706_v15, %v706_v15  ;;  %v717_v9 = vmul.f32 2.0, %v706_v15 }
 0x2b6   : > { %3944 = vmatmul.mubr.msk.f32.gmra.mrb[18].mxu0 %vm395_vm0, %v4950_v29  ;;  %v1499_v4 = vadd.f32 %v1498_v37, %v1497_v26 }
 0x2b7   : > { %4414 = vlog2.f32 %v950_v45  ;;  %3946 = vmatprep.mubr.msk.f32.mxu0 %vm395_vm0, %v4955_v30  ;;  %v710_v35 = vadd.f32 %v709_v51, %v708_v14  ;;  %v718_v20 = vmul.f32 %v717_v9, %v706_v15 }
 0x2b8   : > { %v1500_v6 = vrot.slane %v1499_v4, 1 }
 0x2b9   : > { %v711_v27 = vrot.slane %v710_v35, 4 }
 0x2ba   : > { %3947 = vmatmul.mubr.msk.f32.gmra.mrb[20].mxu0 %vm395_vm0, %v4964_v32  ;;  %v4413_v10 = vpop.eup %4412  ;;  %v1501_v50 = vadd.f32 %v1500_v6, %v1499_v4 }
 0x2bb   : > { %4003 = vmatprep.mubr.msk.f32.mxu0 %vm4695_vm8, %v4696_v11  ;;  %v712_v52 = vadd.f32 %v711_v27, %v710_v35  ;;  %v937_v29 = vmul.f32 %v4413_v10, %v5081_v62 }
 0x2bc   : > { %v1503_v53 = vsub.f32 %v1501_v50, %v1502_v46  ;;  %v5229_v46 = vld [vmem:[%s4855_s26] sm:$0xff] }
 0x2bd   : > { %v713_v54 = vrot.slane %v712_v52, 2  ;;  %v5209_v32 = vadd.f32 1.0001, %v937_v29 }
 0x2be   : > { %v1521_v1 = vrot.slane %v1503_v53, %v4873_v13  ;;  %v1504_v8 = vsub.f32 0.0, %v1503_v53 }
 0x2bf   : > { %v714_v56 = vadd.f32 %v713_v54, %v712_v52 }
 0x2c0   : > { %v1522_v28 = vmul.f32 %v1521_v1, %v4858_v0  ;;  %v1505_v33 = vmax.f32 %v1504_v8, 1.0000001 }
 0x2c1   : > { %v4415_v30 = vpop.eup %4414  ;;  %v715_v61 = vrot.slane %v714_v56, 1 }
 0x2c2   : > { %v952_v31 = vmul.f32 0.6931472, %v4415_v30  ;;  %v1523_v36 = vadd.f32 %v1522_v28, %v5183_v41  ;;  %v1506_v24 = vmul.f32 %v1505_v33, %v1505_v33 }
 0x2c3   : > { %v716_v12 = vadd.f32 %v715_v61, %v714_v56 }
 0x2c4   : > { %v5211_v63 = vmul.f32 %v957_v55, %v952_v31  ;;  %v1524_v21 = vmul.f32 %v1523_v36, %v1523_v36  ;;  %v3596_v26 = vadd.f32 -1.0, %v1506_v24  ;;  %v1531_v54 = vmul.f32 2.0, %v1523_v36 }
 0x2c5   : > { %v719_v16 = vsub.f32 %v716_v12, %v718_v20 }
 0x2c6   : > { %v5215_v43 = vmul.f32 %v5211_v63, %v5209_v32  ;;  %v1525_v35 = vrot.slane %v1524_v21, 4  ;;  %vm1510_vm10 = vcmp.eq.f32.partialorder %v3596_v26, inf  ;;  %v1513_v41 = vand.u32 2147483648, %v3596_v26 }
 0x2c7   : > { %v720_v58 = vand.u32 2147483647, %v719_v16  ;;  %vm1512_vm11 = vcmp.eq.f32.partialorder %v3596_v26, 0.0 }
 0x2c8   : > { %v1526_v27 = vadd.f32 %v1525_v35, %v1524_v21 }
 0x2c9   : > { %v721_v19 = vmax.f32 %v720_v58, 1e-08 }
 0x2ca   : > { %v1527_v37 = vrot.slane %v1526_v27, 2 }
 0x2cb   : > { %4416 = vrsqrt.f32 %v721_v19 }
 0x2cc   : > { %4418 = vrsqrt.f32 %v3596_v26  ;;  %v1528_v44 = vadd.f32 %v1527_v37, %v1526_v27 }
 0x2ce   : > { %v1529_v52 = vrot.slane %v1528_v44, 1 }
 0x2d0   : > { %v1530_v55 = vadd.f32 %v1529_v52, %v1528_v44 }
 0x2d5   : > { %v4417_v22 = vpop.eup %4416 }
 0x2d6   : > { %v726_v45 = vrot.slane %v4417_v22, %v4873_v13  ;;  %v4419_v10 = vpop.eup %4418 }
 0x2d7   : > { %v1509_v0 = vmul.f32 %v4419_v10, %v3596_v26 }
 0x2d8   : > { %v5221_v51 = vmul.f32 %v726_v45, %v706_v15  ;;  %v5223_v14 = vmul.f32 %v726_v45, %v705_v23  ;;  %v1532_v15 = vmul.f32 %v1531_v54, %v1523_v36 }
 0x2d9   : > { %v1511_v29 = vsel %vm1510_vm10, %v3596_v26, %v1509_v0 }
 0x2da   : > { %v1514_v23 = vsel %vm1512_vm11, %v1513_v41, %v1511_v29  ;;  %v1533_v30 = vsub.f32 %v1530_v55, %v1532_v15  ;;  %v1037_v55 = vmul.f32 %v5209_v32, %v5209_v32 }
 0x2db   : > { %v1515_v4 = vadd.f32 %v1514_v23, %v1505_v33 }
 0x2dc   : > { %v1534_v56 = vmax.f32 %v1533_v30, 1e-08 }
 0x2dd   : > { %4420 = vlog2.f32 %v1515_v4 }
 0x2de   : > { %4422 = vrsqrt.f32 %v1534_v56 }
 0x2e7   : > { %v4421_v9 = vpop.eup %4420 }
 0x2e8   : > { %v1517_v31 = vmul.f32 0.6931472, %v4421_v9  ;;  %v4423_v61 = vpop.eup %4422 }
 0x2ea   : > { %v1536_v6 = vmul.f32 %v4423_v61, %v1517_v31  ;;  %v3578_v31 = vadd.f32 -1.0, %v1037_v55 }
 0x2ec   : > { %v1540_v12 = vrot.slane %v1536_v6, %v4873_v13 }
 0x2ee   : > { %v1541_v20 = vmul.f32 %v1540_v12, %v1523_v36 }
 0x2f0   : > { %v1542_v16 = vmul.f32 %v4882_v47, %v1541_v20 }
 0x2f2   : > { %v1546_v50 = vrot.slane %v1542_v16, %v4873_v13 }
 0x2f4   : > { %v1547_v58 = vmul.f32 %v5229_v46, %v1546_v50 }
 0x2f6   : > { %v1548_v19 = vsub.f32 %v1541_v20, %v1547_v58 }
 0x2f8   : > { %v1549_v53 = vmul.f32 %v1548_v19, %v1548_v19 }
 0x2fa   : > { %v1550_v1 = vrot.slane %v1549_v53, 4 }
 0x2fc   : > { %v1551_v8 = vadd.f32 %v1550_v1, %v1549_v53 }
 0x2fe   : > { %v1552_v28 = vrot.slane %v1551_v8, 2 }
 0x300   : > { %v1553_v33 = vadd.f32 %v1552_v28, %v1551_v8 }
 0x302   : > { %v1554_v22 = vrot.slane %v1553_v33, 1 }
 0x304   : > { %v1555_v24 = vadd.f32 %v1554_v22, %v1553_v33 }
 0x306   : > { %v1556_v45 = vsub.f32 %v1555_v24, %v1549_v53 }
 0x308   : > { %v1557_v21 = vmax.f32 %v1556_v45, 1e-08 }
 0x30a   : > { %4424 = vrsqrt.f32 %v1557_v21 }
 0x314   : > { %v4425_v36 = vpop.eup %4424 }
 0x315   : > { %v1559_v26 = vmul.f32 %v4425_v36, %v1556_v45 }
 0x317   : > { %v1560_v35 = vmul.f32 1.442695, %v1559_v26 }
 0x319   : > { %4426 = vpow2.f32 %v1560_v35 }
 0x323   : > { %v4427_v27 = vpop.eup %4426 }
 0x324   : > { %4428 = vrcp.f32 %v4427_v27 }
 0x32e   : > { %v4429_v37 = vpop.eup %4428 }
 0x32f   : > { %v1563_v52 = vsub.f32 %v4427_v27, %v4429_v37  ;;  %v1565_v4 = vadd.f32 %v4429_v37, %v4427_v27  ;;  %v1051_v37 = vrot.slane %v5215_v43, 4 }
 0x331   : > { %v1564_v29 = vmul.f32 0.5, %v1563_v52  ;;  %v1566_v32 = vmul.f32 0.5, %v1565_v4  ;;  %v1052_v4 = vadd.f32 %v1051_v37, %v5215_v43  ;;  %v5290_v43 = vld [vmem:[%s6063_s3] sm:$0xff] }
 0x333   : > { %v1567_v30 = vmul.f32 %v4425_v36, %v1564_v29  ;;  %v1576_v22 = vrot.slane %v1566_v32, %v4873_v13 }
 0x335   : > { %v1571_v16 = vrot.slane %v1567_v30, %v4873_v13 }
 0x337   : > { %v1572_v33 = vmul.f32 %v1571_v16, %v1548_v19 }
 0x339   : > { %v1577_v19 = vsel %vm290_vm3, %v1576_v22, %v1572_v33 }
 0x379   : > { %v1033_v10 = vpop.f32.mrb[10].mxu0 }
 0x37a   : > { %v1039_v44 = vmax.f32 %v1033_v10, 1e-08  ;;  %v3929_v0 = vpop.f32.mrb[11].mxu0 }
 0x37c   : > { %4430 = vrcp.f32 %v1039_v44 }
 0x37d   : > { %v5232_v54 = vpop.f32.mrb[12].mxu0 }
 0x37e   : > { %v1263_v41 = vpop.f32.mrb[13].mxu0  ;;  %v1340_v56 = vmul.f32 %v5232_v54, %v5232_v54 }
 0x37f   : > { %v3591_v26 = vmul.f32 -1.442695, %v1263_v41  ;;  %v4212_v41 = vpack.c.bf16 %v4693_v18, %v1577_v19  ;;  %v5322_v19 = vld [vmem:[%s4839_s25 + $0x20] sm:$0xff] }
 0x381   : > { %v5236_v15 = vpop.f32.mrb[14].mxu0 }
 0x382   : > { %v5238_v23 = vpop.f32.mrb[15].mxu0  ;;  %v1342_v53 = vmul.f32 %v5236_v15, %v5236_v15 }
 0x383   : > { %v1341_v9 = vmul.f32 %v5238_v23, %v5238_v23 }
 0x385   : > { %v4201_v61 = vpack.c.bf16 %v1341_v9, %v1340_v56  ;;  %v5244_v6 = vpop.f32.mrb[16].mxu0 }
 0x386   : > { %v4431_v12 = vpop.eup %4430  ;;  %v5246_v20 = vpop.f32.mrb[17].mxu0  ;;  %v1344_v24 = vmul.f32 %v5244_v6, %v5244_v6 }
 0x387   : > { %v1041_v50 = vmul.f32 %v4431_v12, %v3578_v31  ;;  %v1343_v58 = vmul.f32 %v5246_v20, %v5246_v20  ;;  %4202 = vmatpush3.bf16.msra.mxu1 %v4201_v61  ;;  %v1053_v61 = vrot.slane %v1052_v4, 2 }
 0x388   : > { %4203 = vmatprep.subr.bf16.mxu1 %v4694_v2 }
 0x389   : > { %4432 = vrsqrt.f32 %v1041_v50  ;;  %v5254_v1 = vpop.f32.mrb[18].mxu0  ;;  %v4204_v8 = vpack.c.bf16 %v1343_v58, %v1342_v53  ;;  %vm1044_vm13 = vcmp.eq.f32.partialorder %v1041_v50, inf  ;;  %v1047_v9 = vand.u32 2147483648, %v1041_v50 }
 0x38a   : > { %v5256_v28 = vpop.f32.mrb[19].mxu0  ;;  %v1346_v10 = vmul.f32 %v5254_v1, %v5254_v1  ;;  %4434 = vpow2.f32 %v3591_v26  ;;  %vm1046_vm14 = vcmp.eq.f32.partialorder %v1041_v50, 0.0  ;;  %v1054_v53 = vadd.f32 %v1053_v61, %v1052_v4 }
 0x38b   : > { %v1345_v45 = vmul.f32 %v5256_v28, %v5256_v28  ;;  %4205 = vmatpush3.bf16.msra.mxu1 %v4204_v8  ;;  %v5302_v8 = vld [vmem:[%s6063_s3 + $0x8] sm:$0xff] }
 0x38c   : > { %4206 = vmatprep.subr.bf16.mxu1 %v4694_v2 }
 0x38d   : > { %v4207_v21 = vpack.c.bf16 %v1345_v45, %v1344_v24  ;;  %v3948_v36 = vpop.f32.mrb[20].mxu0 }
 0x38e   : > { %v1320_v35 = vsub.f32 0.0, %v3948_v36  ;;  %v5264_v27 = vpop.f32.mrb[21].mxu0  ;;  %v5313_v36 = vld [vmem:[%s6063_s3 + $0x10] sm:$0xff] }
 0x38f   : > { %v1347_v44 = vmul.f32 %v5264_v27, %v5264_v27  ;;  %4208 = vmatpush3.bf16.msra.mxu1 %v4207_v21 }
 0x390   : > { %v5273_v0 = vmax.f32 %v1320_v35, 1.0000001  ;;  %4209 = vmatprep.subr.bf16.mxu1 %v4694_v2 }
 0x391   : > { %v4210_v52 = vpack.c.bf16 %v1347_v44, %v1346_v10  ;;  %v5327_v10 = vld [vmem:[%s6063_s3 + $0x18] sm:$0xff]  ;;  %v1055_v44 = vrot.slane %v1054_v53, 1 }
 0x392   : > { %v1322_v29 = vmul.f32 %v5273_v0, %v5273_v0 }
 0x393   : > { %v4433_v55 = vpop.eup %4432  ;;  %4211 = vmatpush3.bf16.msra.mxu1 %v4210_v52 }
 0x394   : > { %v1043_v30 = vmul.f32 %v4433_v55, %v1041_v50  ;;  %v3592_v56 = vadd.f32 -1.0, %v1322_v29  ;;  %4214 = vmatprep.subr.msk.bf16.mxu1 %vm4894_vm5, %v4212_v41  ;;  %v4435_v33 = vpop.eup %4434 }
 0x395   : > { %v1315_v37 = vadd.f32 1.0, %v4435_v33 }
 0x396   : > { %v1045_v31 = vsel %vm1044_vm13, %v1041_v50, %v1043_v30  ;;  %4436 = vrsqrt.f32 %v3592_v56  ;;  %3966 = vmatmul.mubr.msk.f32.vlgmr.msra.gmra.mrb[12].mxu1 %vm582_vm12, %v5036_v38  ;;  %vm1326_vm15 = vcmp.eq.f32.partialorder %v3592_v56, inf  ;;  %v1329_v55 = vand.u32 2147483648, %v3592_v56 }
 0x397   : > { %v1048_v12 = vsel %vm1046_vm14, %v1047_v9, %v1045_v31  ;;  %4217 = vmatpush3.bf16.msk.msra.mxu1 %vm4894_vm5, %v4212_v41  ;;  %3972 = vmatprep.mubr.msk.f32.mxu1 %vm395_vm0, %v5290_v43  ;;  %4438 = vrcp.f32 %v1315_v37  ;;  %vm1328_vm1 = vcmp.eq.f32.partialorder %v3592_v56, 0.0  ;;  %v5343_v9 = vld [vmem:[%s6063_s3 + $0x28] sm:$0xff]  ;;  %v1056_v31 = vadd.f32 %v1055_v44, %v1054_v53  ;;  %v5367_v53 = vld [vmem:[%s6063_s3 + $0x40] sm:$0xff] }
 0x398   : > { %v1049_v32 = vmul.f32 %v1048_v12, %v5211_v63  ;;  %4236 = vmatprep.subr.bf16.mxu1 %v4694_v2  ;;  %v5350_v12 = vld [vmem:[%s6063_s3 + $0x30] sm:$0xff] }
 0x39a   : > { %v1060_v16 = vrot.slane %v1049_v32, %v4873_v13  ;;  %v1066_v50 = vrot.slane %v1049_v32, %v5148_v39  ;;  %v1074_v58 = vrot.slane %v1049_v32, %v5151_v40  ;;  %v1082_v63 = vrot.slane %v1049_v32, %v5156_v49  ;;  %3973 = vmatmul.mubr.msk.f32.vlgmr.msra.gmra.mrb[14].mxu1 %vm395_vm0, %v5302_v8 }
 0x39b   : > { %3975 = vmatprep.mubr.msk.f32.mxu1 %vm395_vm0, %v5313_v36 }
 0x39c   : > { %v1061_v22 = vmul.f32 %v5099_v59, %v1060_v16  ;;  %v1062_v24 = vmul.f32 %v1060_v16, %v5105_v5  ;;  %v1067_v45 = vmul.f32 %v5103_v3, %v1066_v50  ;;  %v1068_v21 = vmul.f32 %v1066_v50, %v5113_v34 }
 0x39d   : > { %v1075_v26 = vmul.f32 %v5111_v25, %v1074_v58  ;;  %v1076_v35 = vmul.f32 %v1074_v58, %v5123_v48  ;;  %v1083_v59 = vmul.f32 %v5121_v42, %v1082_v63  ;;  %v1084_v5 = vmul.f32 %v1082_v63, %v5131_v57  ;;  %v5334_v42 = vld [vmem:[%s6063_s3 + $0x20] sm:$0xff]  ;;  %v5360_v58 = vld [vmem:[%s6063_s3 + $0x38] sm:$0xff] }
 0x39e   : > { %v1069_v3 = vadd.f32 %v1067_v45, %v1061_v22  ;;  %v1070_v34 = vadd.f32 %v1068_v21, %v1062_v24  ;;  %3976 = vmatmul.mubr.msk.f32.gmra.mrb[16].mxu1 %vm395_vm0, %v5327_v10  ;;  %v1876_v57 = vmul.f32 %v5229_v46, %v5322_v19  ;;  %v5374_v22 = vld [vmem:[%s6063_s3 + $0x48] sm:$0xff] }
 0x39f   : > { %3978 = vmatprep.mubr.msk.f32.mxu1 %vm395_vm0, %v5334_v42 }
 0x3a0   : > { %v4437_v25 = vpop.eup %4436  ;;  %v1077_v48 = vadd.f32 %v1075_v26, %v1069_v3  ;;  %v1078_v52 = vadd.f32 %v1076_v35, %v1070_v34  ;;  %v1877_v32 = vrot.slane %v1876_v57, 4  ;;  %v3593_v26 = vld [vmem:[%s5070_s8 + $0x2] ss:$0 sm:$0xff] }
 0x3a1   : > { %v1325_v41 = vmul.f32 %v4437_v25, %v3592_v56  ;;  %v4439_v21 = vpop.eup %4438  ;;  %v1338_v3 = vmul.f32 %v3593_v26, %v5078_v60 }
 0x3a2   : > { %v1085_v29 = vadd.f32 %v1083_v59, %v1077_v48  ;;  %v1086_v4 = vadd.f32 %v1084_v5, %v1078_v52  ;;  %3979 = vmatmul.mubr.msk.f32.gmra.mrb[18].mxu1 %vm395_vm0, %v5343_v9  ;;  %v1318_v5 = vmul.f32 %v4439_v21, %v5081_v62 }
 0x3a3   : > { %v1327_v30 = vsel %vm1326_vm15, %v3592_v56, %v1325_v41  ;;  %3981 = vmatprep.mubr.msk.f32.mxu1 %vm395_vm0, %v5350_v12 }
 0x3a4   : > { %v1330_v61 = vsel %vm1328_vm1, %v1329_v55, %v1327_v30  ;;  %v1087_v16 = vsel %vm290_vm3, %v1056_v31, %v1085_v29  ;;  %v1090_v50 = vmul.f32 %v1086_v4, %v1086_v4  ;;  %v5383_v41 = vadd.f32 1.0001, %v1318_v5 }
 0x3a5   : > { %v1331_v56 = vadd.f32 %v1330_v61, %v5273_v0  ;;  %v1089_v63 = vmul.f32 %v1087_v16, %v1087_v16  ;;  %v1878_v0 = vadd.f32 %v1877_v32, %v1876_v57  ;;  %v1098_v44 = vmul.f32 2.0, %v1087_v16 }
 0x3a6   : > { %3982 = vmatmul.mubr.msk.f32.gmra.mrb[20].mxu1 %vm395_vm0, %v5360_v58 }
 0x3a7   : > { %4440 = vlog2.f32 %v1331_v56  ;;  %3984 = vmatprep.mubr.msk.f32.mxu1 %vm395_vm0, %v5367_v53  ;;  %v1091_v33 = vadd.f32 %v1090_v50, %v1089_v63  ;;  %v1879_v45 = vrot.slane %v1878_v0, 2  ;;  %v1099_v31 = vmul.f32 %v1098_v44, %v1087_v16 }
 0x3a8   : > { %v1883_v50 = vmul.f32 2.0, %v1876_v57 }
 0x3a9   : > { %v1092_v24 = vrot.slane %v1091_v33, 4  ;;  %v1880_v34 = vadd.f32 %v1879_v45, %v1878_v0 }
 0x3aa   : > { %3985 = vmatmul.mubr.msk.f32.gmra.mrb[22].mxu1 %vm395_vm0, %v5374_v22 }
 0x3ab   : > { %4041 = vmatprep.mubr.msk.f32.mxu1 %vm4695_vm8, %v4696_v11  ;;  %v1093_v35 = vadd.f32 %v1092_v24, %v1091_v33  ;;  %v1881_v55 = vrot.slane %v1880_v34, 1 }
 0x3ad   : > { %v1094_v59 = vrot.slane %v1093_v35, 2  ;;  %v1882_v56 = vadd.f32 %v1881_v55, %v1880_v34 }
 0x3af   : > { %v1095_v25 = vadd.f32 %v1094_v59, %v1093_v35  ;;  %v1884_v33 = vsub.f32 %v1882_v56, %v1883_v50 }
 0x3b1   : > { %v4441_v37 = vpop.eup %4440  ;;  %v1096_v52 = vrot.slane %v1095_v25, 1  ;;  %v1902_v24 = vrot.slane %v1884_v33, %v4873_v13  ;;  %v1885_v45 = vsub.f32 0.0, %v1884_v33 }
 0x3b2   : > { %v1333_v48 = vmul.f32 0.6931472, %v4441_v37 }
 0x3b3   : > { %v1097_v30 = vadd.f32 %v1096_v52, %v1095_v25  ;;  %v1903_v21 = vmul.f32 %v5229_v46, %v1902_v24  ;;  %v1886_v26 = vmax.f32 %v1885_v45, 1.0000001 }
 0x3b4   : > { %v5385_v29 = vmul.f32 %v1338_v3, %v1333_v48 }
 0x3b5   : > { %v1100_v32 = vsub.f32 %v1097_v30, %v1099_v31  ;;  %v1904_v59 = vadd.f32 %v1903_v21, %v5322_v19  ;;  %v1887_v5 = vmul.f32 %v1886_v26, %v1886_v26 }
 0x3b6   : > { %v5389_v61 = vmul.f32 %v5385_v29, %v5383_v41 }
 0x3b7   : > { %v1101_v63 = vand.u32 2147483647, %v1100_v32  ;;  %v1905_v34 = vmul.f32 %v1904_v59, %v1904_v59  ;;  %v3613_v57 = vadd.f32 -1.0, %v1887_v5  ;;  %v1912_v50 = vmul.f32 2.0, %v1904_v59 }
 0x3b9   : > { %v1102_v0 = vmax.f32 %v1101_v63, 1e-08  ;;  %v1906_v52 = vrot.slane %v1905_v34, 4  ;;  %vm1891_vm2 = vcmp.eq.f32.partialorder %v3613_v57, inf  ;;  %vm1893_vm4 = vcmp.eq.f32.partialorder %v3613_v57, 0.0 }
 0x3bb   : > { %4442 = vrsqrt.f32 %v1102_v0  ;;  %v1907_v55 = vadd.f32 %v1906_v52, %v1905_v34  ;;  %v1913_v0 = vmul.f32 %v1912_v50, %v1904_v59 }
 0x3bc   : > { %4444 = vrsqrt.f32 %v3613_v57 }
 0x3bd   : > { %v1908_v30 = vrot.slane %v1907_v55, 2 }
 0x3bf   : > { %v1909_v32 = vadd.f32 %v1908_v30, %v1907_v55 }
 0x3c1   : > { %v1910_v56 = vrot.slane %v1909_v32, 1 }
 0x3c3   : > { %v1911_v63 = vadd.f32 %v1910_v56, %v1909_v32 }
 0x3c5   : > { %v4443_v35 = vpop.eup %4442  ;;  %v1914_v24 = vsub.f32 %v1911_v63, %v1913_v0 }
 0x3c6   : > { %v1107_v3 = vrot.slane %v4443_v35, %v4873_v13  ;;  %v4445_v31 = vpop.eup %4444 }
 0x3c7   : > { %v1890_v19 = vmul.f32 %v4445_v31, %v3613_v57 }
 0x3c8   : > { %v1108_v37 = vmul.f32 %v1107_v3, %v1087_v16  ;;  %v1109_v25 = vmul.f32 %v1107_v3, %v1086_v4  ;;  %v1894_v16 = vand.u32 2147483648, %v3613_v57 }
 0x3c9   : > { %v1892_v4 = vsel %vm1891_vm2, %v3613_v57, %v1890_v19 }
 0x3ca   : > { %v5396_v44 = vadd.f32 %v1108_v37, %v5221_v51  ;;  %v5399_v48 = vadd.f32 %v1109_v25, %v5223_v14  ;;  %v1895_v51 = vsel %vm1893_vm4, %v1894_v16, %v1892_v4  ;;  %v1915_v14 = vmax.f32 %v1914_v24, 1e-08 }
 0x3cb   : > { %v1896_v33 = vadd.f32 %v1895_v51, %v1886_v26 }
 0x3cd   : > { %4446 = vlog2.f32 %v1896_v33 }
 0x3ce   : > { %4448 = vrsqrt.f32 %v1915_v14 }
 0x3d7   : > { %v4447_v45 = vpop.eup %4446 }
 0x3d8   : > { %v1898_v21 = vmul.f32 0.6931472, %v4447_v45  ;;  %v4449_v35 = vpop.eup %4448 }
 0x3da   : > { %v1917_v5 = vmul.f32 %v4449_v35, %v1898_v21 }
 0x3dc   : > { %v1921_v3 = vrot.slane %v1917_v5, %v4873_v13 }
 0x3de   : > { %v1922_v37 = vmul.f32 %v1921_v3, %v1904_v59  ;;  %v1418_v3 = vmul.f32 %v5383_v41, %v5383_v41 }
 0x3e0   : > { %v1923_v25 = vmul.f32 %v4882_v47, %v1922_v37 }
 0x3e2   : > { %v1927_v34 = vrot.slane %v1923_v25, %v4873_v13 }
 0x3e4   : > { %v1928_v57 = vmul.f32 %v5229_v46, %v1927_v34 }
 0x3e6   : > { %v1929_v52 = vsub.f32 %v1922_v37, %v1928_v57 }
 0x3e8   : > { %v1930_v55 = vmul.f32 %v1929_v52, %v1929_v52 }
 0x3ea   : > { %v1931_v26 = vrot.slane %v1930_v55, 4 }
 0x3ec   : > { %v1932_v30 = vadd.f32 %v1931_v26, %v1930_v55 }
 0x3ee   : > { %v1933_v31 = vrot.slane %v1932_v30, 2 }
 0x3f0   : > { %v1934_v32 = vadd.f32 %v1933_v31, %v1932_v30  ;;  %v3595_v30 = vadd.f32 -1.0, %v1418_v3 }
 0x3f2   : > { %v1935_v19 = vrot.slane %v1934_v32, 1 }
 0x3f4   : > { %v1936_v56 = vadd.f32 %v1935_v19, %v1934_v32 }
 0x3f6   : > { %v1937_v50 = vsub.f32 %v1936_v56, %v1930_v55 }
 0x3f8   : > { %v1938_v16 = vmax.f32 %v1937_v50, 1e-08 }
 0x3fa   : > { %4450 = vrsqrt.f32 %v1938_v16 }
 0x404   : > { %v4451_v4 = vpop.eup %4450 }
 0x405   : > { %v1940_v63 = vmul.f32 %v4451_v4, %v1937_v50 }
 0x407   : > { %v1941_v59 = vmul.f32 1.442695, %v1940_v63 }
 0x409   : > { %4452 = vpow2.f32 %v1941_v59 }
 0x413   : > { %v4453_v0 = vpop.eup %4452 }
 0x414   : > { %4454 = vrcp.f32 %v4453_v0 }
 0x41e   : > { %v4455_v51 = vpop.eup %4454 }
 0x41f   : > { %v1944_v45 = vsub.f32 %v4453_v0, %v4455_v51  ;;  %v1946_v34 = vadd.f32 %v4455_v51, %v4453_v0 }
 0x421   : > { %v1945_v5 = vmul.f32 0.5, %v1944_v45  ;;  %v1947_v41 = vmul.f32 0.5, %v1946_v34 }
 0x423   : > { %v1948_v57 = vmul.f32 %v4451_v4, %v1945_v5 }
 0x425   : > { %v1952_v50 = vrot.slane %v1948_v57, %v4873_v13 }
 0x469   : > { %v1414_v33 = vpop.f32.mrb[12].mxu1 }
 0x46a   : > { %v1420_v24 = vmax.f32 %v1414_v33, 1e-08  ;;  %v3967_v14 = vpop.f32.mrb[13].mxu1  ;;  %v1953_v33 = vmul.f32 %v1952_v50, %v1929_v52 }
 0x46c   : > { %4456 = vrcp.f32 %v1420_v24  ;;  %v1957_v24 = vrot.slane %v1947_v41, %v4873_v13 }
 0x46d   : > { %v5405_v21 = vpop.f32.mrb[14].mxu1 }
 0x46e   : > { %v1644_v35 = vpop.f32.mrb[15].mxu1  ;;  %v1721_v55 = vmul.f32 %v5405_v21, %v5405_v21  ;;  %v1958_v52 = vsel %vm290_vm3, %v1957_v24, %v1953_v33 }
 0x46f   : > { %v3608_v34 = vmul.f32 -1.442695, %v1644_v35  ;;  %v4230_v35 = vpack.c.bf16 %v4693_v18, %v1958_v52 }
 0x471   : > { %v5409_v37 = vpop.f32.mrb[16].mxu1 }
 0x472   : > { %v5411_v25 = vpop.f32.mrb[17].mxu1  ;;  %v1723_v63 = vmul.f32 %v5409_v37, %v5409_v37 }
 0x473   : > { %v1722_v26 = vmul.f32 %v5411_v25, %v5411_v25 }
 0x475   : > { %v4219_v31 = vpack.c.bf16 %v1722_v26, %v1721_v55  ;;  %v5417_v32 = vpop.f32.mrb[18].mxu1  ;;  %v1432_v26 = vrot.slane %v5389_v61, 4 }
 0x476   : > { %v4457_v19 = vpop.eup %4456  ;;  %v5419_v56 = vpop.f32.mrb[19].mxu1  ;;  %v1725_v14 = vmul.f32 %v5417_v32, %v5417_v32 }
 0x477   : > { %v1422_v16 = vmul.f32 %v4457_v19, %v3595_v30  ;;  %v1724_v4 = vmul.f32 %v5419_v56, %v5419_v56  ;;  %4220 = vmatpush3.bf16.msra.mxu0 %v4219_v31 }
 0x478   : > { %4221 = vmatprep.subr.bf16.mxu0 %v4694_v2 }
 0x479   : > { %4458 = vrsqrt.f32 %v1422_v16  ;;  %v5427_v59 = vpop.f32.mrb[20].mxu1  ;;  %v4222_v0 = vpack.c.bf16 %v1724_v4, %v1723_v63  ;;  %v1433_v63 = vadd.f32 %v1432_v26, %v5389_v61  ;;  %vm1425_vm6 = vcmp.eq.f32.partialorder %v1422_v16, inf }
 0x47a   : > { %v5429_v51 = vpop.f32.mrb[21].mxu1  ;;  %v1727_v30 = vmul.f32 %v5427_v59, %v5427_v59  ;;  %4460 = vpow2.f32 %v3608_v34  ;;  %v1428_v24 = vand.u32 2147483648, %v1422_v16  ;;  %vm1427_vm7 = vcmp.eq.f32.partialorder %v1422_v16, 0.0 }
 0x47b   : > { %v1726_v45 = vmul.f32 %v5429_v51, %v5429_v51  ;;  %4223 = vmatpush3.bf16.msra.mxu0 %v4222_v0 }
 0x47c   : > { %4224 = vmatprep.subr.bf16.mxu0 %v4694_v2 }
 0x47d   : > { %v4225_v5 = vpack.c.bf16 %v1726_v45, %v1725_v14  ;;  %v3986_v3 = vpop.f32.mrb[22].mxu1  ;;  %v1434_v45 = vrot.slane %v1433_v63, 2 }
 0x47e   : > { %v1701_v57 = vsub.f32 0.0, %v3986_v3  ;;  %v5437_v55 = vpop.f32.mrb[23].mxu1 }
 0x47f   : > { %v1728_v31 = vmul.f32 %v5437_v55, %v5437_v55  ;;  %4226 = vmatpush3.bf16.msra.mxu0 %v4225_v5  ;;  %v1435_v52 = vadd.f32 %v1434_v45, %v1433_v63  ;;  %v5479_v63 = vld [vmem:[%s4839_s25 + $0x28] sm:$0xff] }
 0x480   : > { %v5446_v19 = vmax.f32 %v1701_v57, 1.0000001  ;;  %4227 = vmatprep.subr.bf16.mxu0 %v4694_v2 }
 0x481   : > { %v4228_v41 = vpack.c.bf16 %v1728_v31, %v1727_v30 }
 0x482   : > { %v1703_v50 = vmul.f32 %v5446_v19, %v5446_v19 }
 0x483   : > { %v4459_v4 = vpop.eup %4458  ;;  %4229 = vmatpush3.bf16.msra.mxu0 %v4228_v41 }
 0x484   : > { %v1424_v0 = vmul.f32 %v4459_v4, %v1422_v16  ;;  %v3609_v33 = vadd.f32 -1.0, %v1703_v50  ;;  %4232 = vmatprep.subr.msk.bf16.mxu0 %vm4894_vm5, %v4230_v35 }
 0x486   : > { %v1426_v14 = vsel %vm1425_vm6, %v1422_v16, %v1424_v0  ;;  %4462 = vrsqrt.f32 %v3609_v33  ;;  %4004 = vmatmul.mubr.msk.f32.vlgmr.msra.gmra.mrb[22].mxu0 %vm582_vm12, %v5036_v38  ;;  %vm1707_vm9 = vcmp.eq.f32.partialorder %v3609_v33, inf  ;;  %vm1709_vm10 = vcmp.eq.f32.partialorder %v3609_v33, 0.0 }
 0x487   : > { %v1429_v5 = vsel %vm1427_vm7, %v1428_v24, %v1426_v14  ;;  %4235 = vmatpush3.bf16.msk.msra.mxu0 %vm4894_vm5, %v4230_v35  ;;  %4010 = vmatprep.mubr.msk.f32.mxu0 %vm395_vm0, %v5290_v43 }
 0x488   : > { %v1430_v3 = vmul.f32 %v1429_v5, %v5385_v29  ;;  %4254 = vmatprep.subr.bf16.mxu0 %v4694_v2  ;;  %v4461_v29 = vpop.eup %4460  ;;  %v1710_v5 = vand.u32 2147483648, %v3609_v33 }
 0x48a   : > { %v1441_v61 = vrot.slane %v1430_v3, %v4873_v13  ;;  %v1447_v16 = vrot.slane %v1430_v3, %v5148_v39  ;;  %v1455_v34 = vrot.slane %v1430_v3, %v5151_v40  ;;  %v1463_v57 = vrot.slane %v1430_v3, %v5156_v49  ;;  %4011 = vmatmul.mubr.msk.f32.vlgmr.msra.gmra.mrb[24].mxu0 %vm395_vm0, %v5302_v8 }
 0x48b   : > { %4013 = vmatprep.mubr.msk.f32.mxu0 %vm395_vm0, %v5313_v36 }
 0x48c   : > { %v1442_v26 = vmul.f32 %v5232_v54, %v1441_v61  ;;  %v1443_v30 = vmul.f32 %v1441_v61, %v5238_v23  ;;  %v1448_v31 = vmul.f32 %v5236_v15, %v1447_v16  ;;  %v1449_v41 = vmul.f32 %v1447_v16, %v5246_v20 }
 0x48d   : > { %v1456_v35 = vmul.f32 %v5244_v6, %v1455_v34  ;;  %v1457_v50 = vmul.f32 %v1455_v34, %v5256_v28  ;;  %v1464_v4 = vmul.f32 %v5254_v1, %v1463_v57  ;;  %v1465_v54 = vmul.f32 %v1463_v57, %v5264_v27 }
 0x48e   : > { %v1450_v0 = vadd.f32 %v1448_v31, %v1442_v26  ;;  %v1451_v24 = vadd.f32 %v1449_v41, %v1443_v30  ;;  %v1696_v23 = vadd.f32 1.0, %v4461_v29  ;;  %4014 = vmatmul.mubr.msk.f32.gmra.mrb[26].mxu0 %vm395_vm0, %v5327_v10  ;;  %v1436_v20 = vrot.slane %v1435_v52, 1 }
 0x48f   : > { %4016 = vmatprep.mubr.msk.f32.mxu0 %vm395_vm0, %v5334_v42  ;;  %v2257_v6 = vmul.f32 %v5229_v46, %v5479_v63 }
 0x490   : > { %v4463_v15 = vpop.eup %4462  ;;  %v1458_v14 = vadd.f32 %v1456_v35, %v1450_v0  ;;  %v1459_v1 = vadd.f32 %v1457_v50, %v1451_v24  ;;  %4464 = vrcp.f32 %v1696_v23  ;;  %v1437_v61 = vadd.f32 %v1436_v20, %v1435_v52  ;;  %v3610_v35 = vld [vmem:[%s5070_s8 + $0x3] ss:$0 sm:$0xff] }
 0x491   : > { %v1706_v28 = vmul.f32 %v4463_v15, %v3609_v33  ;;  %v2258_v34 = vrot.slane %v2257_v6, 4  ;;  %v1719_v24 = vmul.f32 %v3610_v35, %v5078_v60 }
 0x492   : > { %v1466_v45 = vadd.f32 %v1464_v4, %v1458_v14  ;;  %v1467_v3 = vadd.f32 %v1465_v54, %v1459_v1  ;;  %4017 = vmatmul.mubr.msk.f32.gmra.mrb[28].mxu0 %vm395_vm0, %v5343_v9 }
 0x493   : > { %v1708_v27 = vsel %vm1707_vm9, %v3609_v33, %v1706_v28  ;;  %4019 = vmatprep.mubr.msk.f32.mxu0 %vm395_vm0, %v5350_v12  ;;  %v2259_v52 = vadd.f32 %v2258_v34, %v2257_v6 }
 0x494   : > { %v1711_v16 = vsel %vm1709_vm10, %v1710_v5, %v1708_v27  ;;  %v1468_v29 = vsel %vm290_vm3, %v1437_v61, %v1466_v45  ;;  %v1471_v26 = vmul.f32 %v1467_v3, %v1467_v3 }
 0x495   : > { %v1712_v57 = vadd.f32 %v1711_v16, %v5446_v19  ;;  %v1470_v33 = vmul.f32 %v1468_v29, %v1468_v29  ;;  %v2260_v41 = vrot.slane %v2259_v52, 2  ;;  %v1479_v20 = vmul.f32 2.0, %v1468_v29 }
 0x496   : > { %4020 = vmatmul.mubr.msk.f32.gmra.mrb[30].mxu0 %vm395_vm0, %v5360_v58 }
 0x497   : > { %4466 = vlog2.f32 %v1712_v57  ;;  %4022 = vmatprep.mubr.msk.f32.mxu0 %vm395_vm0, %v5367_v53  ;;  %v1472_v30 = vadd.f32 %v1471_v26, %v1470_v33  ;;  %v2261_v54 = vadd.f32 %v2260_v41, %v2259_v52  ;;  %v1480_v61 = vmul.f32 %v1479_v20, %v1468_v29 }
 0x498   : > { %v2264_v26 = vmul.f32 2.0, %v2257_v6 }
 0x499   : > { %v1473_v31 = vrot.slane %v1472_v30, 4  ;;  %v2262_v5 = vrot.slane %v2261_v54, 1 }
 0x49a   : > { %4023 = vmatmul.mubr.msk.f32.gmra.mrb[32].mxu0 %vm395_vm0, %v5374_v22  ;;  %v4465_v19 = vpop.eup %4464 }
 0x49b   : > { %4079 = vmatprep.mubr.msk.f32.mxu0 %vm4695_vm8, %v4696_v11  ;;  %v1474_v50 = vadd.f32 %v1473_v31, %v1472_v30  ;;  %v1699_v0 = vmul.f32 %v4465_v19, %v5081_v62  ;;  %v2263_v57 = vadd.f32 %v2262_v5, %v2261_v54 }
 0x49d   : > { %v1475_v4 = vrot.slane %v1474_v50, 2  ;;  %v5506_v28 = vadd.f32 1.0001, %v1699_v0  ;;  %v2265_v30 = vsub.f32 %v2263_v57, %v2264_v26 }
 0x49f   : > { %v1476_v15 = vadd.f32 %v1475_v4, %v1474_v50  ;;  %v2283_v31 = vrot.slane %v2265_v30, %v4873_v13  ;;  %v2266_v41 = vsub.f32 0.0, %v2265_v30 }
 0x4a1   : > { %v4467_v23 = vpop.eup %4466  ;;  %v1477_v1 = vrot.slane %v1476_v15, 1  ;;  %v2284_v19 = vmul.f32 %v5229_v46, %v2283_v31  ;;  %v2267_v35 = vmax.f32 %v2266_v41, 1.0000001 }
 0x4a2   : > { %v1714_v14 = vmul.f32 0.6931472, %v4467_v23 }
 0x4a3   : > { %v1478_v27 = vadd.f32 %v1477_v1, %v1476_v15  ;;  %v2285_v4 = vadd.f32 %v2284_v19, %v5479_v63  ;;  %v2268_v0 = vmul.f32 %v2267_v35, %v2267_v35 }
 0x4a4   : > { %v5508_v45 = vmul.f32 %v1719_v24, %v1714_v14 }
 0x4a5   : > { %v1481_v34 = vsub.f32 %v1478_v27, %v1480_v61  ;;  %v2286_v54 = vmul.f32 %v2285_v4, %v2285_v4  ;;  %v3630_v6 = vadd.f32 -1.0, %v2268_v0  ;;  %v2293_v26 = vmul.f32 2.0, %v2285_v4 }
 0x4a6   : > { %v5512_v16 = vmul.f32 %v5508_v45, %v5506_v28 }
 0x4a7   : > { %v1482_v33 = vand.u32 2147483647, %v1481_v34  ;;  %v2287_v1 = vrot.slane %v2286_v54, 4  ;;  %vm2272_vm11 = vcmp.eq.f32.partialorder %v3630_v6, inf  ;;  %vm2274_vm13 = vcmp.eq.f32.partialorder %v3630_v6, 0.0 }
 0x4a9   : > { %v1483_v52 = vmax.f32 %v1482_v33, 1e-08  ;;  %v2288_v5 = vadd.f32 %v2287_v1, %v2286_v54 }
 0x4ab   : > { %4468 = vrsqrt.f32 %v1483_v52  ;;  %v2289_v27 = vrot.slane %v2288_v5, 2  ;;  %v2294_v52 = vmul.f32 %v2293_v26, %v2285_v4 }
 0x4ac   : > { %4470 = vrsqrt.f32 %v3630_v6 }
 0x4ad   : > { %v2290_v34 = vadd.f32 %v2289_v27, %v2288_v5 }
 0x4af   : > { %v2291_v57 = vrot.slane %v2290_v34, 1 }
 0x4b1   : > { %v2292_v33 = vadd.f32 %v2291_v57, %v2290_v34 }
 0x4b3   : > { %v2295_v31 = vsub.f32 %v2292_v33, %v2294_v52 }
 0x4b5   : > { %v4469_v50 = vpop.eup %4468 }
 0x4b6   : > { %v1488_v24 = vrot.slane %v4469_v50, %v4873_v13  ;;  %v4471_v61 = vpop.eup %4470 }
 0x4b7   : > { %v2271_v63 = vmul.f32 %v4471_v61, %v3630_v6 }
 0x4b8   : > { %v1489_v23 = vmul.f32 %v1488_v24, %v1468_v29  ;;  %v1490_v15 = vmul.f32 %v1488_v24, %v1467_v3  ;;  %v2275_v29 = vand.u32 2147483648, %v3630_v6 }
 0x4b9   : > { %v2273_v3 = vsel %vm2272_vm11, %v3630_v6, %v2271_v63 }
 0x4ba   : > { %v5519_v20 = vadd.f32 %v1489_v23, %v5396_v44  ;;  %v5522_v14 = vadd.f32 %v1490_v15, %v5399_v48  ;;  %v2276_v44 = vsel %vm2274_vm13, %v2275_v29, %v2273_v3  ;;  %v2296_v48 = vmax.f32 %v2295_v31, 1e-08 }
 0x4bb   : > { %v2277_v30 = vadd.f32 %v2276_v44, %v2267_v35 }
 0x4bd   : > { %4472 = vlog2.f32 %v2277_v30 }
 0x4be   : > { %4474 = vrsqrt.f32 %v2296_v48 }
 0x4c7   : > { %v4473_v41 = vpop.eup %4472 }
 0x4c8   : > { %v2279_v19 = vmul.f32 0.6931472, %v4473_v41  ;;  %v4475_v50 = vpop.eup %4474 }
 0x4ca   : > { %v2298_v0 = vmul.f32 %v4475_v50, %v2279_v19 }
 0x4cc   : > { %v2302_v24 = vrot.slane %v2298_v0, %v4873_v13  ;;  %v1799_v0 = vmul.f32 %v5506_v28, %v5506_v28 }
 0x4ce   : > { %v2303_v23 = vmul.f32 %v2302_v24, %v2285_v4 }
 0x4d0   : > { %v2304_v15 = vmul.f32 %v4882_v47, %v2303_v23 }
 0x4d2   : > { %v2308_v54 = vrot.slane %v2304_v15, %v4873_v13 }
 0x4d4   : > { %v2309_v6 = vmul.f32 %v5229_v46, %v2308_v54 }
 0x4d6   : > { %v2310_v1 = vsub.f32 %v2303_v23, %v2309_v6 }
 0x4d8   : > { %v2311_v5 = vmul.f32 %v2310_v1, %v2310_v1 }
 0x4da   : > { %v2312_v35 = vrot.slane %v2311_v5, 4 }
 0x4dc   : > { %v2313_v27 = vadd.f32 %v2312_v35, %v2311_v5  ;;  %v3612_v35 = vadd.f32 -1.0, %v1799_v0 }
 0x4de   : > { %v2314_v61 = vrot.slane %v2313_v27, 2 }
 0x4e0   : > { %v2315_v34 = vadd.f32 %v2314_v61, %v2313_v27 }
 0x4e2   : > { %v2316_v63 = vrot.slane %v2315_v34, 1 }
 0x4e4   : > { %v2317_v57 = vadd.f32 %v2316_v63, %v2315_v34 }
 0x4e6   : > { %v2318_v26 = vsub.f32 %v2317_v57, %v2311_v5 }
 0x4e8   : > { %v2319_v29 = vmax.f32 %v2318_v26, 1e-08 }
 0x4ea   : > { %4476 = vrsqrt.f32 %v2319_v29 }
 0x4f4   : > { %v4477_v3 = vpop.eup %4476 }
 0x4f5   : > { %v2321_v33 = vmul.f32 %v4477_v3, %v2318_v26 }
 0x4f7   : > { %v2322_v4 = vmul.f32 1.442695, %v2321_v33 }
 0x4f9   : > { %4478 = vpow2.f32 %v2322_v4 }
 0x503   : > { %v4479_v52 = vpop.eup %4478 }
 0x504   : > { %4480 = vrcp.f32 %v4479_v52 }
 0x50e   : > { %v4481_v44 = vpop.eup %4480 }
 0x50f   : > { %v2325_v48 = vsub.f32 %v4479_v52, %v4481_v44  ;;  %v2327_v15 = vadd.f32 %v4481_v44, %v4479_v52 }
 0x511   : > { %v2326_v50 = vmul.f32 0.5, %v2325_v48  ;;  %v2328_v28 = vmul.f32 0.5, %v2327_v15 }
 0x513   : > { %v2329_v54 = vmul.f32 %v4477_v3, %v2326_v50 }
 0x515   : > { %v2333_v57 = vrot.slane %v2329_v54, %v4873_v13 }
 0x517   : > { %v2334_v44 = vmul.f32 %v2333_v57, %v2310_v1 }
 0x559   : > { %v1795_v30 = vpop.f32.mrb[22].mxu0 }
 0x55a   : > { %v1801_v46 = vmax.f32 %v1795_v30, 1e-08  ;;  %v4005_v31 = vpop.f32.mrb[23].mxu0  ;;  %v2338_v30 = vrot.slane %v2328_v28, %v4873_v13 }
 0x55c   : > { %4482 = vrcp.f32 %v1801_v46  ;;  %v2339_v1 = vsel %vm290_vm3, %v2338_v30, %v2334_v44 }
 0x55d   : > { %v5528_v41 = vpop.f32.mrb[24].mxu0 }
 0x55e   : > { %v2025_v19 = vpop.f32.mrb[25].mxu0  ;;  %v2102_v6 = vmul.f32 %v5528_v41, %v5528_v41 }
 0x55f   : > { %v3625_v0 = vmul.f32 -1.442695, %v2025_v19  ;;  %v4248_v19 = vpack.c.bf16 %v4693_v18, %v2339_v1 }
 0x561   : > { %v5532_v24 = vpop.f32.mrb[26].mxu0 }
 0x562   : > { %v5534_v23 = vpop.f32.mrb[27].mxu0  ;;  %v2104_v3 = vmul.f32 %v5532_v24, %v5532_v24 }
 0x563   : > { %v2103_v5 = vmul.f32 %v5534_v23, %v5534_v23 }
 0x565   : > { %v4237_v27 = vpack.c.bf16 %v2103_v5, %v2102_v6  ;;  %v5540_v61 = vpop.f32.mrb[28].mxu0  ;;  %v1813_v6 = vrot.slane %v5512_v16, 4 }
 0x566   : > { %v4483_v34 = vpop.eup %4482  ;;  %v5542_v63 = vpop.f32.mrb[29].mxu0  ;;  %v2106_v46 = vmul.f32 %v5540_v61, %v5540_v61 }
 0x567   : > { %v1803_v26 = vmul.f32 %v4483_v34, %v3612_v35  ;;  %v2105_v29 = vmul.f32 %v5542_v63, %v5542_v63  ;;  %4238 = vmatpush3.bf16.msra.mxu1 %v4237_v27 }
 0x568   : > { %4239 = vmatprep.subr.bf16.mxu1 %v4694_v2 }
 0x569   : > { %4484 = vrsqrt.f32 %v1803_v26  ;;  %v5550_v33 = vpop.f32.mrb[30].mxu0  ;;  %v4240_v4 = vpack.c.bf16 %v2105_v29, %v2104_v3  ;;  %v1814_v29 = vadd.f32 %v1813_v6, %v5512_v16  ;;  %vm1806_vm14 = vcmp.eq.f32.partialorder %v1803_v26, inf }
 0x56a   : > { %v5552_v52 = vpop.f32.mrb[31].mxu0  ;;  %v2108_v5 = vmul.f32 %v5550_v33, %v5550_v33  ;;  %4486 = vpow2.f32 %v3625_v0  ;;  %v1809_v44 = vand.u32 2147483648, %v1803_v26  ;;  %vm1808_vm15 = vcmp.eq.f32.partialorder %v1803_v26, 0.0 }
 0x56b   : > { %v2107_v31 = vmul.f32 %v5552_v52, %v5552_v52  ;;  %4241 = vmatpush3.bf16.msra.mxu1 %v4240_v4 }
 0x56c   : > { %4242 = vmatprep.subr.bf16.mxu1 %v4694_v2 }
 0x56d   : > { %v4243_v48 = vpack.c.bf16 %v2107_v31, %v2106_v46  ;;  %v4024_v50 = vpop.f32.mrb[32].mxu0  ;;  %v1815_v46 = vrot.slane %v1814_v29, 2 }
 0x56e   : > { %v2082_v15 = vsub.f32 0.0, %v4024_v50  ;;  %v5560_v54 = vpop.f32.mrb[33].mxu0 }
 0x56f   : > { %v2109_v35 = vmul.f32 %v5560_v54, %v5560_v54  ;;  %4244 = vmatpush3.bf16.msra.mxu1 %v4243_v48 }
 0x570   : > { %v5569_v27 = vmax.f32 %v2082_v15, 1.0000001  ;;  %4245 = vmatprep.subr.bf16.mxu1 %v4694_v2  ;;  %v1816_v15 = vadd.f32 %v1815_v46, %v1814_v29 }
 0x571   : > { %v4246_v34 = vpack.c.bf16 %v2109_v35, %v2108_v5 }
 0x572   : > { %v2084_v28 = vmul.f32 %v5569_v27, %v5569_v27 }
 0x573   : > { %v4485_v57 = vpop.eup %4484  ;;  %4247 = vmatpush3.bf16.msra.mxu1 %v4246_v34 }
 0x574   : > { %v1805_v3 = vmul.f32 %v4485_v57, %v1803_v26  ;;  %v3626_v4 = vadd.f32 -1.0, %v2084_v28  ;;  %4250 = vmatprep.subr.msk.bf16.mxu1 %vm4894_vm5, %v4248_v19 }
 0x576   : > { %v1807_v30 = vsel %vm1806_vm14, %v1803_v26, %v1805_v3  ;;  %4488 = vrsqrt.f32 %v3626_v4  ;;  %4042 = vmatmul.mubr.msk.f32.vlgmr.msra.gmra.mrb[24].mxu1 %vm582_vm12, %v5036_v38  ;;  %vm2088_vm1 = vcmp.eq.f32.partialorder %v3626_v4, inf  ;;  %vm2090_vm2 = vcmp.eq.f32.partialorder %v3626_v4, 0.0 }
 0x577   : > { %v1810_v31 = vsel %vm1808_vm15, %v1809_v44, %v1807_v30  ;;  %4253 = vmatpush3.bf16.msk.msra.mxu1 %vm4894_vm5, %v4248_v19  ;;  %4048 = vmatprep.mubr.msk.f32.mxu1 %vm395_vm0, %v5290_v43  ;;  %v5601_v19 = vld [vmem:[%s4839_s25 + $0x30] sm:$0xff] }
 0x578   : > { %v1811_v48 = vmul.f32 %v1810_v31, %v5508_v45  ;;  %4272 = vmatprep.subr.bf16.mxu1 %v4694_v2  ;;  %v4487_v45 = vpop.eup %4486 }
 0x579   : > { %v2077_v57 = vadd.f32 1.0, %v4487_v45 }
 0x57a   : > { %v1822_v16 = vrot.slane %v1811_v48, %v4873_v13  ;;  %v1828_v26 = vrot.slane %v1811_v48, %v5148_v39  ;;  %v1836_v50 = vrot.slane %v1811_v48, %v5151_v40  ;;  %v1844_v0 = vrot.slane %v1811_v48, %v5156_v49  ;;  %4049 = vmatmul.mubr.msk.f32.vlgmr.msra.gmra.mrb[26].mxu1 %vm395_vm0, %v5302_v8 }
 0x57b   : > { %4051 = vmatprep.mubr.msk.f32.mxu1 %vm395_vm0, %v5313_v36  ;;  %v5610_v36 = vld [vmem:[%s4855_s26] sm:$0xff]  ;;  %4490 = vrcp.f32 %v2077_v57  ;;  %s4626_s26 = sshll.u32 %s4697_s23, 4  ;;  %s4627_s26 = int_to_ptr.vmem [resolvable:$false] %s4626_s26 }
 0x57c   : > { %v1823_v1 = vmul.f32 %v5405_v21, %v1822_v16  ;;  %v1824_v43 = vmul.f32 %v1822_v16, %v5411_v25  ;;  %v1829_v6 = vmul.f32 %v5409_v37, %v1828_v26  ;;  %v1830_v5 = vmul.f32 %v1828_v26, %v5419_v56  ;;  %s4628_s15 = scalar_lea.vmem %s4627_s26, 512 }
 0x57d   : > { %v1837_v35 = vmul.f32 %v5417_v32, %v1836_v50  ;;  %v1845_v34 = vmul.f32 %v5427_v59, %v1844_v0  ;;  %v1838_v21 = vmul.f32 %v1836_v50, %v5429_v51  ;;  %v1846_v25 = vmul.f32 %v1844_v0, %v5437_v55  ;;  %v3627_v0 = vld [vmem:[%s5070_s8 + $0x4] ss:$0 sm:$0xff] }
 0x57e   : > { %v1831_v8 = vadd.f32 %v1829_v6, %v1823_v1  ;;  %v1832_v28 = vadd.f32 %v1830_v5, %v1824_v43  ;;  %4052 = vmatmul.mubr.msk.f32.gmra.mrb[28].mxu1 %vm395_vm0, %v5327_v10  ;;  %v1817_v56 = vrot.slane %v1816_v15, 1  ;;  %v2638_v32 = vmul.f32 %v5610_v36, %v5601_v19 }
 0x57f   : > { %4054 = vmatprep.mubr.msk.f32.mxu1 %vm395_vm0, %v5334_v42  ;;  %v2091_v55 = vand.u32 2147483648, %v3626_v4  ;;  %v2100_v1 = vmul.f32 %v3627_v0, %v5078_v60 }
 0x580   : > { %v4489_v37 = vpop.eup %4488  ;;  %v1839_v29 = vadd.f32 %v1837_v35, %v1831_v8  ;;  %v1840_v59 = vadd.f32 %v1838_v21, %v1832_v28  ;;  %v1818_v10 = vadd.f32 %v1817_v56, %v1816_v15  ;;  %v2639_v42 = vrot.slane %v2638_v32, 4 }
 0x581   : > { %v2087_v3 = vmul.f32 %v4489_v37, %v3626_v4 }
 0x582   : > { %v1847_v51 = vadd.f32 %v1845_v34, %v1839_v29  ;;  %v1848_v44 = vadd.f32 %v1846_v25, %v1840_v59  ;;  %4055 = vmatmul.mubr.msk.f32.gmra.mrb[30].mxu1 %vm395_vm0, %v5343_v9  ;;  %v2640_v9 = vadd.f32 %v2639_v42, %v2638_v32  ;;  %v2645_v29 = vmul.f32 2.0, %v2638_v32 }
 0x583   : > { %v2089_v30 = vsel %vm2088_vm1, %v3626_v4, %v2087_v3  ;;  %4057 = vmatprep.mubr.msk.f32.mxu1 %vm395_vm0, %v5350_v12 }
 0x584   : > { %v2092_v46 = vsel %vm2090_vm2, %v2091_v55, %v2089_v30  ;;  %v1849_v48 = vsel %vm290_vm3, %v1818_v10, %v1847_v51  ;;  %v1852_v16 = vmul.f32 %v1848_v44, %v1848_v44  ;;  %v2641_v50 = vrot.slane %v2640_v9, 2 }
 0x585   : > { %v2093_v31 = vadd.f32 %v2092_v46, %v5569_v27  ;;  %v1851_v4 = vmul.f32 %v1849_v48, %v1849_v48  ;;  %v4491_v27 = vpop.eup %4490  ;;  %v1860_v5 = vmul.f32 2.0, %v1849_v48 }
 0x586   : > { %4058 = vmatmul.mubr.msk.f32.gmra.mrb[32].mxu1 %vm395_vm0, %v5360_v58  ;;  %v2080_v58 = vmul.f32 %v4491_v27, %v5081_v62  ;;  %v2642_v43 = vadd.f32 %v2641_v50, %v2640_v9 }
 0x587   : > { %4492 = vlog2.f32 %v2093_v31  ;;  %4060 = vmatprep.mubr.msk.f32.mxu1 %vm395_vm0, %v5367_v53  ;;  %v1853_v26 = vadd.f32 %v1852_v16, %v1851_v4  ;;  %v1861_v25 = vmul.f32 %v1860_v5, %v1849_v48 }
 0x588   : > { %v2643_v28 = vrot.slane %v2642_v43, 1 }
 0x589   : > { %v1854_v12 = vrot.slane %v1853_v26, 4 }
 0x58a   : > { %4061 = vmatmul.mubr.msk.f32.gmra.mrb[34].mxu1 %vm395_vm0, %v5374_v22  ;;  %v5632_v22 = vadd.f32 1.0001, %v2080_v58  ;;  %v2644_v56 = vadd.f32 %v2643_v28, %v2642_v43 }
 0x58b   : > { %4117 = vmatprep.mubr.msk.f32.mxu1 %vm4695_vm8, %v4696_v11  ;;  %v1855_v15 = vadd.f32 %v1854_v12, %v1853_v26 }
 0x58c   : > { %v2646_v51 = vsub.f32 %v2644_v56, %v2645_v29 }
 0x58d   : > { %v1856_v45 = vrot.slane %v1855_v15, 2 }
 0x58e   : > { %v2664_v55 = vrot.slane %v2646_v51, %v4873_v13  ;;  %v2647_v30 = vsub.f32 0.0, %v2646_v51 }
 0x58f   : > { %v1857_v6 = vadd.f32 %v1856_v45, %v1855_v15 }
 0x590   : > { %v2665_v10 = vmul.f32 %v5610_v36, %v2664_v55  ;;  %v2648_v46 = vmax.f32 %v2647_v30, 1.0000001 }
 0x591   : > { %v4493_v53 = vpop.eup %4492  ;;  %v1858_v34 = vrot.slane %v1857_v6, 1 }
 0x592   : > { %v2095_v35 = vmul.f32 0.6931472, %v4493_v53  ;;  %v2666_v31 = vadd.f32 %v2665_v10, %v5601_v19  ;;  %v2649_v16 = vmul.f32 %v2648_v46, %v2648_v46 }
 0x593   : > { %v1859_v21 = vadd.f32 %v1858_v34, %v1857_v6 }
 0x594   : > { %v5634_v8 = vmul.f32 %v2100_v1, %v2095_v35  ;;  %v2667_v12 = vmul.f32 %v2666_v31, %v2666_v31  ;;  %v3647_v32 = vadd.f32 -1.0, %v2649_v16  ;;  %v2674_v53 = vmul.f32 2.0, %v2666_v31 }
 0x595   : > { %v1862_v37 = vsub.f32 %v1859_v21, %v1861_v25 }
 0x596   : > { %v5638_v57 = vmul.f32 %v5634_v8, %v5632_v22  ;;  %v2668_v0 = vrot.slane %v2667_v12, 4  ;;  %vm2653_vm4 = vcmp.eq.f32.partialorder %v3647_v32, inf  ;;  %vm2655_vm6 = vcmp.eq.f32.partialorder %v3647_v32, 0.0 }
 0x597   : > { %v1863_v59 = vand.u32 2147483647, %v1862_v37  ;;  %v2675_v5 = vmul.f32 %v2674_v53, %v2666_v31 }
 0x598   : > { %v2669_v15 = vadd.f32 %v2668_v0, %v2667_v12 }
 0x599   : > { %v1864_v3 = vmax.f32 %v1863_v59, 1e-08 }
 0x59a   : > { %v2670_v45 = vrot.slane %v2669_v15, 2 }
 0x59b   : > { %4494 = vrsqrt.f32 %v1864_v3 }
 0x59c   : > { %4496 = vrsqrt.f32 %v3647_v32  ;;  %v2671_v1 = vadd.f32 %v2670_v45, %v2669_v15 }
 0x59e   : > { %v2672_v43 = vrot.slane %v2671_v1, 1 }
 0x5a0   : > { %v2673_v6 = vadd.f32 %v2672_v43, %v2671_v1 }
 0x5a2   : > { %v2676_v34 = vsub.f32 %v2673_v6, %v2675_v5  ;;  %v2180_v6 = vmul.f32 %v5632_v22, %v5632_v22 }
 0x5a5   : > { %v4495_v42 = vpop.eup %4494 }
 0x5a6   : > { %v1869_v4 = vrot.slane %v4495_v42, %v4873_v13  ;;  %v4497_v58 = vpop.eup %4496 }
 0x5a7   : > { %v2652_v19 = vmul.f32 %v4497_v58, %v3647_v32 }
 0x5a8   : > { %v1870_v9 = vmul.f32 %v1869_v4, %v1849_v48  ;;  %v1871_v26 = vmul.f32 %v1869_v4, %v1848_v44  ;;  %v2656_v48 = vand.u32 2147483648, %v3647_v32 }
 0x5a9   : > { %v2654_v44 = vsel %vm2653_vm4, %v3647_v32, %v2652_v19 }
 0x5aa   : > { %v5645_v50 = vadd.f32 %v1870_v9, %v5519_v20  ;;  %v5648_v27 = vadd.f32 %v1871_v26, %v5522_v14  ;;  %v2657_v20 = vsel %vm2655_vm6, %v2656_v48, %v2654_v44  ;;  %v2677_v14 = vmax.f32 %v2676_v34, 1e-08 }
 0x5ab   : > { %v2658_v35 = vadd.f32 %v2657_v20, %v2648_v46 }
 0x5ad   : > { %4498 = vlog2.f32 %v2658_v35 }
 0x5ae   : > { %4500 = vrsqrt.f32 %v2677_v14 }
 0x5b7   : > { %v4499_v28 = vpop.eup %4498 }
 0x5b8   : > { %v2660_v21 = vmul.f32 0.6931472, %v4499_v28  ;;  %v4501_v25 = vpop.eup %4500 }
 0x5ba   : > { %v2679_v37 = vmul.f32 %v4501_v25, %v2660_v21  ;;  %v3629_v21 = vadd.f32 -1.0, %v2180_v6 }
 0x5bc   : > { %v2683_v56 = vrot.slane %v2679_v37, %v4873_v13 }
 0x5be   : > { %v2684_v29 = vmul.f32 %v2683_v56, %v2666_v31 }
 0x5c0   : > { %v2685_v59 = vmul.f32 %v4882_v47, %v2684_v29 }
 0x5c2   : > { %v2689_v3 = vrot.slane %v2685_v59, %v4873_v13 }
 0x5c4   : > { %v2690_v51 = vmul.f32 %v5610_v36, %v2689_v3 }
 0x5c6   : > { %v2691_v55 = vsub.f32 %v2684_v29, %v2690_v51 }
 0x5c8   : > { %v2692_v30 = vmul.f32 %v2691_v55, %v2691_v55 }
 0x5ca   : > { %v2693_v10 = vrot.slane %v2692_v30, 4 }
 0x5cc   : > { %v2694_v46 = vadd.f32 %v2693_v10, %v2692_v30 }
 0x5ce   : > { %v2695_v42 = vrot.slane %v2694_v46, 2 }
 0x5d0   : > { %v2696_v16 = vadd.f32 %v2695_v42, %v2694_v46 }
 0x5d2   : > { %v2697_v4 = vrot.slane %v2696_v16, 1 }
 0x5d4   : > { %v2698_v9 = vadd.f32 %v2697_v4, %v2696_v16 }
 0x5d6   : > { %v2699_v26 = vsub.f32 %v2698_v9, %v2692_v30 }
 0x5d8   : > { %v2700_v12 = vmax.f32 %v2699_v26, 1e-08 }
 0x5da   : > { %4502 = vrsqrt.f32 %v2700_v12 }
 0x5e4   : > { %v4503_v32 = vpop.eup %4502 }
 0x5e5   : > { %v2702_v0 = vmul.f32 %v4503_v32, %v2699_v26 }
 0x5e7   : > { %v2703_v31 = vmul.f32 1.442695, %v2702_v0 }
 0x5e9   : > { %4504 = vpow2.f32 %v2703_v31 }
 0x5f3   : > { %v4505_v15 = vpop.eup %4504 }
 0x5f4   : > { %4506 = vrcp.f32 %v4505_v15 }
 0x5fe   : > { %v4507_v45 = vpop.eup %4506 }
 0x5ff   : > { %v2706_v43 = vsub.f32 %v4505_v15, %v4507_v45  ;;  %v2708_v35 = vadd.f32 %v4507_v45, %v4505_v15  ;;  %v2194_v45 = vrot.slane %v5638_v57, 4 }
 0x601   : > { %v2707_v44 = vmul.f32 0.5, %v2706_v43  ;;  %v2709_v22 = vmul.f32 0.5, %v2708_v35  ;;  %v2195_v35 = vadd.f32 %v2194_v45, %v5638_v57  ;;  %v5712_v57 = vld [vmem:[%s6063_s3] sm:$0xff] }
 0x603   : > { %v2710_v34 = vmul.f32 %v4503_v32, %v2707_v44  ;;  %v2719_v4 = vrot.slane %v2709_v22, %v4873_v13 }
 0x605   : > { %v2714_v59 = vrot.slane %v2710_v34, %v4873_v13 }
 0x607   : > { %v2715_v16 = vmul.f32 %v2714_v59, %v2691_v55 }
 0x609   : > { %v2720_v55 = vsel %vm290_vm3, %v2719_v4, %v2715_v16 }
 0x649   : > { %v2176_v58 = vpop.f32.mrb[24].mxu1 }
 0x64a   : > { %v2182_v1 = vmax.f32 %v2176_v58, 1e-08  ;;  %v4043_v19 = vpop.f32.mrb[25].mxu1 }
 0x64c   : > { %4508 = vrcp.f32 %v2182_v1 }
 0x64d   : > { %v5654_v53 = vpop.f32.mrb[26].mxu1 }
 0x64e   : > { %v2406_v48 = vpop.f32.mrb[27].mxu1  ;;  %v2483_v14 = vmul.f32 %v5654_v53, %v5654_v53 }
 0x64f   : > { %v3642_v0 = vmul.f32 -1.442695, %v2406_v48  ;;  %v4266_v48 = vpack.c.bf16 %v4693_v18, %v2720_v55 }
 0x651   : > { %v5658_v5 = vpop.f32.mrb[28].mxu1 }
 0x652   : > { %v5660_v20 = vpop.f32.mrb[29].mxu1  ;;  %v2485_v30 = vmul.f32 %v5658_v5, %v5658_v5 }
 0x653   : > { %v2484_v28 = vmul.f32 %v5660_v20, %v5660_v20 }
 0x655   : > { %v4255_v25 = vpack.c.bf16 %v2484_v28, %v2483_v14  ;;  %v5666_v37 = vpop.f32.mrb[30].mxu1 }
 0x656   : > { %v4509_v56 = vpop.eup %4508  ;;  %v5668_v29 = vpop.f32.mrb[31].mxu1  ;;  %v2487_v9 = vmul.f32 %v5666_v37, %v5666_v37 }
 0x657   : > { %v2184_v3 = vmul.f32 %v4509_v56, %v3629_v21  ;;  %v2486_v51 = vmul.f32 %v5668_v29, %v5668_v29  ;;  %4256 = vmatpush3.bf16.msra.mxu0 %v4255_v25  ;;  %v2196_v25 = vrot.slane %v2195_v35, 2 }
 0x658   : > { %4257 = vmatprep.subr.bf16.mxu0 %v4694_v2 }
 0x659   : > { %4510 = vrsqrt.f32 %v2184_v3  ;;  %v5676_v10 = vpop.f32.mrb[32].mxu1  ;;  %v4258_v46 = vpack.c.bf16 %v2486_v51, %v2485_v30  ;;  %vm2187_vm7 = vcmp.eq.f32.partialorder %v2184_v3, inf  ;;  %v2190_v28 = vand.u32 2147483648, %v2184_v3 }
 0x65a   : > { %v5678_v42 = vpop.f32.mrb[33].mxu1  ;;  %v2489_v58 = vmul.f32 %v5676_v10, %v5676_v10  ;;  %4512 = vpow2.f32 %v3642_v0  ;;  %vm2189_vm9 = vcmp.eq.f32.partialorder %v2184_v3, 0.0  ;;  %v2197_v30 = vadd.f32 %v2196_v25, %v2195_v35  ;;  %v5740_v0 = vld [vmem:[%s4839_s25 + $0x38] sm:$0xff] }
 0x65b   : > { %v2488_v26 = vmul.f32 %v5678_v42, %v5678_v42  ;;  %4259 = vmatpush3.bf16.msra.mxu0 %v4258_v46  ;;  %v5724_v46 = vld [vmem:[%s6063_s3 + $0x8] sm:$0xff] }
 0x65c   : > { %4260 = vmatprep.subr.bf16.mxu0 %v4694_v2 }
 0x65d   : > { %v4261_v12 = vpack.c.bf16 %v2488_v26, %v2487_v9  ;;  %v4062_v32 = vpop.f32.mrb[34].mxu1 }
 0x65e   : > { %v2463_v31 = vsub.f32 0.0, %v4062_v32  ;;  %v5686_v15 = vpop.f32.mrb[35].mxu1 }
 0x65f   : > { %v2490_v1 = vmul.f32 %v5686_v15, %v5686_v15  ;;  %4262 = vmatpush3.bf16.msra.mxu0 %v4261_v12  ;;  %v5734_v12 = vld [vmem:[%s6063_s3 + $0x10] sm:$0xff] }
 0x660   : > { %v5695_v19 = vmax.f32 %v2463_v31, 1.0000001  ;;  %4263 = vmatprep.subr.bf16.mxu0 %v4694_v2 }
 0x661   : > { %v4264_v43 = vpack.c.bf16 %v2490_v1, %v2489_v58  ;;  %v5749_v58 = vld [vmem:[%s6063_s3 + $0x18] sm:$0xff] }
 0x662   : > { %v2465_v44 = vmul.f32 %v5695_v19, %v5695_v19 }
 0x663   : > { %v4511_v6 = vpop.eup %4510  ;;  %4265 = vmatpush3.bf16.msra.mxu0 %v4264_v43  ;;  %v2198_v43 = vrot.slane %v2197_v30, 1 }
 0x664   : > { %v2186_v34 = vmul.f32 %v4511_v6, %v2184_v3  ;;  %v3643_v14 = vadd.f32 -1.0, %v2465_v44  ;;  %4268 = vmatprep.subr.msk.bf16.mxu0 %vm4894_vm5, %v4266_v48  ;;  %v4513_v16 = vpop.eup %4512 }
 0x665   : > { %v2458_v45 = vadd.f32 1.0, %v4513_v16 }
 0x666   : > { %v2188_v21 = vsel %vm2187_vm7, %v2184_v3, %v2186_v34  ;;  %4514 = vrsqrt.f32 %v3643_v14  ;;  %4080 = vmatmul.mubr.msk.f32.vlgmr.msra.gmra.mrb[34].mxu0 %vm582_vm12, %v5036_v38  ;;  %vm2469_vm10 = vcmp.eq.f32.partialorder %v3643_v14, inf  ;;  %v2472_v44 = vand.u32 2147483648, %v3643_v14  ;;  %v5765_v34 = vld [vmem:[%s6063_s3 + $0x28] sm:$0xff] }
 0x667   : > { %v2191_v56 = vsel %vm2189_vm9, %v2190_v28, %v2188_v21  ;;  %4271 = vmatpush3.bf16.msk.msra.mxu0 %vm4894_vm5, %v4266_v48  ;;  %4086 = vmatprep.mubr.msk.f32.mxu0 %vm395_vm0, %v5712_v57  ;;  %4516 = vrcp.f32 %v2458_v45  ;;  %vm2471_vm11 = vcmp.eq.f32.partialorder %v3643_v14, 0.0  ;;  %v2199_v21 = vadd.f32 %v2198_v43, %v2197_v30  ;;  %v5789_v30 = vld [vmem:[%s6063_s3 + $0x40] sm:$0xff] }
 0x668   : > { %v2192_v22 = vmul.f32 %v2191_v56, %v5634_v8  ;;  %4290 = vmatprep.subr.bf16.mxu0 %v4694_v2  ;;  %v5772_v56 = vld [vmem:[%s6063_s3 + $0x30] sm:$0xff] }
 0x66a   : > { %v2203_v59 = vrot.slane %v2192_v22, %v4873_v13  ;;  %v2209_v3 = vrot.slane %v2192_v22, %v5148_v39  ;;  %v2217_v8 = vrot.slane %v2192_v22, %v5151_v40  ;;  %v2225_v51 = vrot.slane %v2192_v22, %v5156_v49  ;;  %4087 = vmatmul.mubr.msk.f32.vlgmr.msra.gmra.mrb[36].mxu0 %vm395_vm0, %v5724_v46 }
 0x66b   : > { %4089 = vmatprep.mubr.msk.f32.mxu0 %vm395_vm0, %v5734_v12 }
 0x66c   : > { %v2204_v4 = vmul.f32 %v5528_v41, %v2203_v59  ;;  %v2210_v9 = vmul.f32 %v5532_v24, %v2209_v3  ;;  %v2218_v26 = vmul.f32 %v5540_v61, %v2217_v8  ;;  %v2205_v32 = vmul.f32 %v2203_v59, %v5534_v23 }
 0x66d   : > { %v2211_v31 = vmul.f32 %v2209_v3, %v5542_v63  ;;  %v2219_v41 = vmul.f32 %v2217_v8, %v5552_v52  ;;  %v2226_v24 = vmul.f32 %v5550_v33, %v2225_v51  ;;  %v2227_v61 = vmul.f32 %v2225_v51, %v5560_v54  ;;  %v5756_v52 = vld [vmem:[%s6063_s3 + $0x20] sm:$0xff]  ;;  %v5782_v8 = vld [vmem:[%s6063_s3 + $0x38] sm:$0xff] }
 0x66e   : > { %v2212_v55 = vadd.f32 %v2210_v9, %v2204_v4  ;;  %4090 = vmatmul.mubr.msk.f32.gmra.mrb[38].mxu0 %vm395_vm0, %v5749_v58  ;;  %v3019_v33 = vmul.f32 %v5610_v36, %v5740_v0  ;;  %v5796_v4 = vld [vmem:[%s6063_s3 + $0x48] sm:$0xff] }
 0x66f   : > { %v2213_v23 = vadd.f32 %v2211_v31, %v2205_v32  ;;  %4092 = vmatprep.mubr.msk.f32.mxu0 %vm395_vm0, %v5756_v52  ;;  %v3644_v31 = vld [vmem:[%s5070_s8 + $0x5] ss:$0 sm:$0xff] }
 0x670   : > { %v4515_v1 = vpop.eup %4514  ;;  %v2220_v63 = vadd.f32 %v2218_v26, %v2212_v55 }
 0x671   : > { %v2468_v54 = vmul.f32 %v4515_v1, %v3643_v14  ;;  %v2221_v48 = vadd.f32 %v2219_v41, %v2213_v23  ;;  %v4517_v32 = vpop.eup %4516 }
 0x672   : > { %v2228_v6 = vadd.f32 %v2226_v24, %v2220_v63  ;;  %4093 = vmatmul.mubr.msk.f32.gmra.mrb[40].mxu0 %vm395_vm0, %v5765_v34  ;;  %v2461_v24 = vmul.f32 %v4517_v32, %v5081_v62 }
 0x673   : > { %v2470_v35 = vsel %vm2469_vm10, %v3643_v14, %v2468_v54  ;;  %v2229_v28 = vadd.f32 %v2227_v61, %v2221_v48  ;;  %4095 = vmatprep.mubr.msk.f32.mxu0 %vm395_vm0, %v5772_v56  ;;  %v3020_v14 = vrot.slane %v3019_v33, 4  ;;  %v2481_v61 = vmul.f32 %v3644_v31, %v5078_v60 }
 0x674   : > { %v2473_v25 = vsel %vm2471_vm11, %v2472_v44, %v2470_v35  ;;  %v2230_v59 = vsel %vm290_vm3, %v2199_v21, %v2228_v6  ;;  %v5805_v48 = vadd.f32 1.0001, %v2461_v24 }
 0x675   : > { %v2474_v22 = vadd.f32 %v2473_v25, %v5695_v19  ;;  %v2233_v3 = vmul.f32 %v2229_v28, %v2229_v28  ;;  %v2232_v51 = vmul.f32 %v2230_v59, %v2230_v59  ;;  %v3021_v19 = vadd.f32 %v3020_v14, %v3019_v33 }
 0x676   : > { %4096 = vmatmul.mubr.msk.f32.gmra.mrb[42].mxu0 %vm395_vm0, %v5782_v8  ;;  %v2241_v43 = vmul.f32 2.0, %v2230_v59 }
 0x677   : > { %4518 = vlog2.f32 %v2474_v22  ;;  %4098 = vmatprep.mubr.msk.f32.mxu0 %vm395_vm0, %v5789_v30  ;;  %v2234_v16 = vadd.f32 %v2233_v3, %v2232_v51  ;;  %v3022_v26 = vrot.slane %v3021_v19, 2  ;;  %v3026_v22 = vmul.f32 2.0, %v3019_v33 }
 0x678   : > { %v2242_v35 = vmul.f32 %v2241_v43, %v2230_v59 }
 0x679   : > { %v2235_v9 = vrot.slane %v2234_v16, 4  ;;  %v3023_v45 = vadd.f32 %v3022_v26, %v3021_v19 }
 0x67a   : > { %4099 = vmatmul.mubr.msk.f32.gmra.mrb[44].mxu0 %vm395_vm0, %v5796_v4 }
 0x67b   : > { %4155 = vmatprep.mubr.msk.f32.mxu0 %vm4695_vm8, %v4696_v11  ;;  %v2236_v41 = vadd.f32 %v2235_v9, %v2234_v16  ;;  %v3024_v6 = vrot.slane %v3023_v45, 1 }
 0x67d   : > { %v2237_v55 = vrot.slane %v2236_v41, 2  ;;  %v3025_v14 = vadd.f32 %v3024_v6, %v3023_v45 }
 0x67f   : > { %v2238_v1 = vadd.f32 %v2237_v55, %v2236_v41  ;;  %v3027_v19 = vsub.f32 %v3025_v14, %v3026_v22 }
 0x681   : > { %v4519_v23 = vpop.eup %4518  ;;  %v2239_v54 = vrot.slane %v2238_v1, 1  ;;  %v3045_v16 = vrot.slane %v3027_v19, %v4873_v13  ;;  %v3028_v9 = vsub.f32 0.0, %v3027_v19 }
 0x682   : > { %v2476_v63 = vmul.f32 0.6931472, %v4519_v23 }
 0x683   : > { %v2240_v11 = vadd.f32 %v2239_v54, %v2238_v1  ;;  %v3046_v26 = vmul.f32 %v5610_v36, %v3045_v16  ;;  %v3029_v32 = vmax.f32 %v3028_v9, 1.0000001 }
 0x684   : > { %v5807_v44 = vmul.f32 %v2481_v61, %v2476_v63 }
 0x685   : > { %v2243_v25 = vsub.f32 %v2240_v11, %v2242_v35  ;;  %v3047_v41 = vadd.f32 %v3046_v26, %v5740_v0  ;;  %v3030_v55 = vmul.f32 %v3029_v32, %v3029_v32 }
 0x686   : > { %v5811_v21 = vmul.f32 %v5807_v44, %v5805_v48 }
 0x687   : > { %v2244_v3 = vand.u32 2147483647, %v2243_v25  ;;  %v3048_v45 = vmul.f32 %v3047_v41, %v3047_v41  ;;  %v3664_v33 = vadd.f32 -1.0, %v3030_v55  ;;  %v3055_v14 = vmul.f32 2.0, %v3047_v41 }
 0x689   : > { %v2245_v51 = vmax.f32 %v2244_v3, 1e-08  ;;  %v3049_v63 = vrot.slane %v3048_v45, 4  ;;  %vm3034_vm8 = vcmp.eq.f32.partialorder %v3664_v33, inf  ;;  %vm3036_vm13 = vcmp.eq.f32.partialorder %v3664_v33, 0.0 }
 0x68a   : > { %v3056_v3 = vmul.f32 %v3055_v14, %v3047_v41 }
 0x68b   : > { %4520 = vrsqrt.f32 %v2245_v51  ;;  %v3050_v54 = vadd.f32 %v3049_v63, %v3048_v45 }
 0x68c   : > { %4522 = vrsqrt.f32 %v3664_v33 }
 0x68d   : > { %v3051_v6 = vrot.slane %v3050_v54, 2 }
 0x68f   : > { %v3052_v35 = vadd.f32 %v3051_v6, %v3050_v54 }
 0x691   : > { %v3053_v25 = vrot.slane %v3052_v35, 1 }
 0x693   : > { %v3054_v22 = vadd.f32 %v3053_v25, %v3052_v35 }
 0x695   : > { %v4521_v31 = vpop.eup %4520  ;;  %v3057_v19 = vsub.f32 %v3054_v22, %v3056_v3 }
 0x696   : > { %v2250_v24 = vrot.slane %v4521_v31, %v4873_v13  ;;  %v4523_v11 = vpop.eup %4522 }
 0x697   : > { %v3033_v0 = vmul.f32 %v4523_v11, %v3664_v33 }
 0x698   : > { %v2251_v61 = vmul.f32 %v2250_v24, %v2230_v59  ;;  %v2252_v23 = vmul.f32 %v2250_v24, %v2229_v28  ;;  %v3037_v59 = vand.u32 2147483648, %v3664_v33 }
 0x699   : > { %v3035_v28 = vsel %vm3034_vm8, %v3664_v33, %v3033_v0 }
 0x69a   : > { %v5818_v1 = vadd.f32 %v2251_v61, %v5645_v50  ;;  %v5821_v43 = vadd.f32 %v2252_v23, %v5648_v27  ;;  %v3038_v50 = vsel %vm3036_vm13, %v3037_v59, %v3035_v28  ;;  %v3058_v27 = vmax.f32 %v3057_v19, 1e-08 }
 0x69b   : > { %v3039_v51 = vadd.f32 %v3038_v50, %v3029_v32 }
 0x69d   : > { %4524 = vlog2.f32 %v3039_v51 }
 0x69e   : > { %4526 = vrsqrt.f32 %v3058_v27 }
 0x6a7   : > { %v4525_v16 = vpop.eup %4524 }
 0x6a8   : > { %v3041_v9 = vmul.f32 0.6931472, %v4525_v16  ;;  %v4527_v26 = vpop.eup %4526 }
 0x6aa   : > { %v3060_v31 = vmul.f32 %v4527_v26, %v3041_v9  ;;  %v2561_v9 = vmul.f32 %v5805_v48, %v5805_v48 }
 0x6ac   : > { %v3064_v55 = vrot.slane %v3060_v31, %v4873_v13 }
 0x6ae   : > { %v3065_v24 = vmul.f32 %v3064_v55, %v3047_v41 }
 0x6b0   : > { %v3066_v61 = vmul.f32 %v4882_v47, %v3065_v24 }
 0x6b2   : > { %v3070_v23 = vrot.slane %v3066_v61, %v4873_v13 }
 0x6b4   : > { %v3071_v45 = vmul.f32 %v5610_v36, %v3070_v23 }
 0x6b6   : > { %v3072_v33 = vsub.f32 %v3065_v24, %v3071_v45  ;;  %v3646_v45 = vadd.f32 -1.0, %v2561_v9 }
 0x6b8   : > { %v3073_v63 = vmul.f32 %v3072_v33, %v3072_v33 }
 0x6ba   : > { %v3074_v32 = vrot.slane %v3073_v63, 4 }
 0x6bc   : > { %v3075_v54 = vadd.f32 %v3074_v32, %v3073_v63 }
 0x6be   : > { %v3076_v6 = vrot.slane %v3075_v54, 2 }
 0x6c0   : > { %v3077_v11 = vadd.f32 %v3076_v6, %v3075_v54 }
 0x6c2   : > { %v3078_v35 = vrot.slane %v3077_v11, 1 }
 0x6c4   : > { %v3079_v0 = vadd.f32 %v3078_v35, %v3077_v11 }
 0x6c6   : > { %v3080_v25 = vsub.f32 %v3079_v0, %v3073_v63 }
 0x6c8   : > { %v3081_v14 = vmax.f32 %v3080_v25, 1e-08 }
 0x6ca   : > { %4528 = vrsqrt.f32 %v3081_v14 }
 0x6d4   : > { %v4529_v59 = vpop.eup %4528 }
 0x6d5   : > { %v3083_v28 = vmul.f32 %v4529_v59, %v3080_v25 }
 0x6d7   : > { %v3084_v41 = vmul.f32 1.442695, %v3083_v28 }
 0x6d9   : > { %4530 = vpow2.f32 %v3084_v41 }
 0x6e3   : > { %v4531_v47 = vpop.eup %4530 }
 0x6e4   : > { %4532 = vrcp.f32 %v4531_v47 }
 0x6ee   : > { %v4533_v22 = vpop.eup %4532 }
 0x6ef   : > { %v3087_v51 = vsub.f32 %v4531_v47, %v4533_v22  ;;  %v3089_v55 = vadd.f32 %v4533_v22, %v4531_v47 }
 0x6f1   : > { %v3088_v16 = vmul.f32 0.5, %v3087_v51  ;;  %v3090_v48 = vmul.f32 0.5, %v3089_v55 }
 0x6f3   : > { %v3091_v24 = vmul.f32 %v4529_v59, %v3088_v16  ;;  %v3100_v47 = vrot.slane %v3090_v48, %v4873_v13 }
 0x6f5   : > { %v3095_v11 = vrot.slane %v3091_v24, %v4873_v13 }
 0x6f7   : > { %v3096_v41 = vmul.f32 %v3095_v11, %v3072_v33 }
 0x6f9   : > { %v3101_v33 = vsel %vm290_vm3, %v3100_v47, %v3096_v41 }
 0x739   : > { %v2557_v3 = vpop.f32.mrb[34].mxu0 }
 0x73a   : > { %v2563_v36 = vmax.f32 %v2557_v3, 1e-08  ;;  %v4081_v50 = vpop.f32.mrb[35].mxu0 }
 0x73c   : > { %4534 = vrcp.f32 %v2563_v36  ;;  %v2575_v36 = vrot.slane %v5811_v21, 4 }
 0x73d   : > { %v5827_v19 = vpop.f32.mrb[36].mxu0 }
 0x73e   : > { %v2787_v27 = vpop.f32.mrb[37].mxu0  ;;  %v2864_v61 = vmul.f32 %v5827_v19, %v5827_v19 }
 0x73f   : > { %v3659_v16 = vmul.f32 -1.442695, %v2787_v27  ;;  %v4284_v27 = vpack.c.bf16 %v4693_v18, %v3101_v33 }
 0x741   : > { %v5831_v26 = vpop.f32.mrb[38].mxu0 }
 0x742   : > { %v5833_v31 = vpop.f32.mrb[39].mxu0  ;;  %v2866_v25 = vmul.f32 %v5831_v26, %v5831_v26 }
 0x743   : > { %v2865_v23 = vmul.f32 %v5833_v31, %v5833_v31 }
 0x745   : > { %v4273_v63 = vpack.c.bf16 %v2865_v23, %v2864_v61  ;;  %v5839_v32 = vpop.f32.mrb[40].mxu0 }
 0x746   : > { %v4535_v54 = vpop.eup %4534  ;;  %v5841_v6 = vpop.f32.mrb[41].mxu0  ;;  %v2868_v22 = vmul.f32 %v5839_v32, %v5839_v32 }
 0x747   : > { %v2565_v35 = vmul.f32 %v4535_v54, %v3646_v45  ;;  %v2867_v0 = vmul.f32 %v5841_v6, %v5841_v6  ;;  %4274 = vmatpush3.bf16.msra.mxu1 %v4273_v63  ;;  %v2576_v45 = vadd.f32 %v2575_v36, %v5811_v21 }
 0x748   : > { %4275 = vmatprep.subr.bf16.mxu1 %v4694_v2 }
 0x749   : > { %4536 = vrsqrt.f32 %v2565_v35  ;;  %v5849_v14 = vpop.f32.mrb[42].mxu0  ;;  %v4276_v59 = vpack.c.bf16 %v2867_v0, %v2866_v25  ;;  %v2577_v25 = vrot.slane %v2576_v45, 2  ;;  %vm2568_vm14 = vcmp.eq.f32.partialorder %v2565_v35, inf }
 0x74a   : > { %v5851_v28 = vpop.f32.mrb[43].mxu0  ;;  %v2870_v24 = vmul.f32 %v5849_v14, %v5849_v14  ;;  %4538 = vpow2.f32 %v3659_v16  ;;  %vm2570_vm15 = vcmp.eq.f32.partialorder %v2565_v35, 0.0 }
 0x74b   : > { %v2869_v3 = vmul.f32 %v5851_v28, %v5851_v28  ;;  %4277 = vmatpush3.bf16.msra.mxu1 %v4276_v59  ;;  %v2571_v59 = vand.u32 2147483648, %v2565_v35  ;;  %v2578_v47 = vadd.f32 %v2577_v25, %v2576_v45  ;;  %v3661_v25 = vld [vmem:[%s5070_s8 + $0x6] ss:$0 sm:$0xff] }
 0x74c   : > { %4278 = vmatprep.subr.bf16.mxu1 %v4694_v2 }
 0x74d   : > { %v4279_v50 = vpack.c.bf16 %v2869_v3, %v2868_v22  ;;  %v4100_v51 = vpop.f32.mrb[44].mxu0  ;;  %v2579_v16 = vrot.slane %v2578_v47, 1 }
 0x74e   : > { %v2844_v9 = vsub.f32 0.0, %v4100_v51  ;;  %v5860_v55 = vpop.f32.mrb[45].mxu0 }
 0x74f   : > { %v2871_v61 = vmul.f32 %v5860_v55, %v5860_v55  ;;  %4280 = vmatpush3.bf16.msra.mxu1 %v4279_v50 }
 0x750   : > { %v5868_v23 = vmax.f32 %v2844_v9, 1.0000001  ;;  %4281 = vmatprep.subr.bf16.mxu1 %v4694_v2 }
 0x751   : > { %v4282_v63 = vpack.c.bf16 %v2871_v61, %v2870_v24 }
 0x752   : > { %v2846_v54 = vmul.f32 %v5868_v23, %v5868_v23 }
 0x753   : > { %v4537_v48 = vpop.eup %4536  ;;  %4283 = vmatpush3.bf16.msra.mxu1 %v4282_v63 }
 0x754   : > { %v2567_v11 = vmul.f32 %v4537_v48, %v2565_v35  ;;  %v3660_v0 = vadd.f32 -1.0, %v2846_v54  ;;  %4286 = vmatprep.subr.msk.bf16.mxu1 %vm4894_vm5, %v4284_v27  ;;  %v4539_v50 = vpop.eup %4538 }
 0x755   : > { %v2839_v45 = vadd.f32 1.0, %v4539_v50 }
 0x756   : > { %v2569_v21 = vsel %vm2568_vm14, %v2565_v35, %v2567_v11  ;;  %4540 = vrsqrt.f32 %v3660_v0  ;;  %4118 = vmatmul.mubr.msk.f32.vlgmr.msra.gmra.mrb[36].mxu1 %vm582_vm12, %v5036_v38  ;;  %vm2852_vm1 = vcmp.eq.f32.partialorder %v3660_v0, 0.0 }
 0x757   : > { %v2572_v41 = vsel %vm2570_vm15, %v2571_v59, %v2569_v21  ;;  %4289 = vmatpush3.bf16.msk.msra.mxu1 %vm4894_vm5, %v4284_v27  ;;  %4124 = vmatprep.mubr.msk.f32.mxu1 %vm395_vm0, %v5712_v57  ;;  %vm2850_vm5 = vcmp.eq.f32.partialorder %v3660_v0, inf  ;;  %4542 = vrcp.f32 %v2839_v45 }
 0x758   : > { %v2573_v18 = vmul.f32 %v2572_v41, %v5807_v44 }
 0x75a   : > { %v2584_v22 = vrot.slane %v2573_v18, %v4873_v13  ;;  %v2590_v3 = vrot.slane %v2573_v18, %v5148_v39  ;;  %v2598_v35 = vrot.slane %v2573_v18, %v5151_v40  ;;  %v2606_v36 = vrot.slane %v2573_v18, %v5156_v49  ;;  %4125 = vmatmul.mubr.msk.f32.vlgmr.msra.gmra.mrb[38].mxu1 %vm395_vm0, %v5724_v46 }
 0x75b   : > { %4127 = vmatprep.mubr.msk.f32.mxu1 %vm395_vm0, %v5734_v12  ;;  %v2580_v12 = vadd.f32 %v2579_v16, %v2578_v47  ;;  %v2862_v18 = vmul.f32 %v3661_v25, %v5078_v60 }
 0x75c   : > { %v2585_v44 = vmul.f32 %v5654_v53, %v2584_v22  ;;  %v2591_v17 = vmul.f32 %v5658_v5, %v2590_v3  ;;  %v2586_v57 = vmul.f32 %v2584_v22, %v5660_v20  ;;  %v2592_v51 = vmul.f32 %v2590_v3, %v5668_v29 }
 0x75d   : > { %v2599_v9 = vmul.f32 %v5666_v37, %v2598_v35  ;;  %v2600_v33 = vmul.f32 %v2598_v35, %v5678_v42  ;;  %v2607_v24 = vmul.f32 %v5676_v10, %v2606_v36  ;;  %v2608_v53 = vmul.f32 %v2606_v36, %v5686_v15 }
 0x75e   : > { %v2593_v46 = vadd.f32 %v2591_v17, %v2585_v44  ;;  %v2594_v61 = vadd.f32 %v2592_v51, %v2586_v57  ;;  %4128 = vmatmul.mubr.msk.f32.gmra.mrb[40].mxu1 %vm395_vm0, %v5749_v58  ;;  %v2853_v42 = vand.u32 2147483648, %v3660_v0 }
 0x75f   : > { %4130 = vmatprep.mubr.msk.f32.mxu1 %vm395_vm0, %v5756_v52 }
 0x760   : > { %v4541_v5 = vpop.eup %4540  ;;  %v2601_v20 = vadd.f32 %v2599_v9, %v2593_v46  ;;  %v2602_v29 = vadd.f32 %v2600_v33, %v2594_v61 }
 0x761   : > { %v2849_v37 = vmul.f32 %v4541_v5, %v3660_v0 }
 0x762   : > { %v2609_v63 = vadd.f32 %v2607_v24, %v2601_v20  ;;  %v2610_v10 = vadd.f32 %v2608_v53, %v2602_v29  ;;  %4131 = vmatmul.mubr.msk.f32.gmra.mrb[42].mxu1 %vm395_vm0, %v5765_v34 }
 0x763   : > { %v2851_v27 = vsel %vm2850_vm5, %v3660_v0, %v2849_v37  ;;  %4133 = vmatprep.mubr.msk.f32.mxu1 %vm395_vm0, %v5772_v56  ;;  %v4543_v0 = vpop.eup %4542 }
 0x764   : > { %v2854_v15 = vsel %vm2852_vm1, %v2853_v42, %v2851_v27  ;;  %v2611_v58 = vsel %vm290_vm3, %v2580_v12, %v2609_v63  ;;  %v2614_v52 = vmul.f32 %v2610_v10, %v2610_v10 }
 0x765   : > { %v2855_v54 = vadd.f32 %v2854_v15, %v5868_v23  ;;  %v2613_v48 = vmul.f32 %v2611_v58, %v2611_v58  ;;  %v2622_v41 = vmul.f32 2.0, %v2611_v58  ;;  %v2842_v23 = vmul.f32 %v4543_v0, %v5081_v62 }
 0x766   : > { %4134 = vmatmul.mubr.msk.f32.gmra.mrb[44].mxu1 %vm395_vm0, %v5782_v8 }
 0x767   : > { %4544 = vlog2.f32 %v2855_v54  ;;  %v2615_v11 = vadd.f32 %v2614_v52, %v2613_v48  ;;  %4136 = vmatprep.mubr.msk.f32.mxu1 %vm395_vm0, %v5789_v30  ;;  %v2623_v35 = vmul.f32 %v2622_v41, %v2611_v58  ;;  %v2843_v30 = vadd.f32 1.0001, %v2842_v23 }
 0x769   : > { %v2616_v34 = vrot.slane %v2615_v11, 4  ;;  %v2942_v20 = vmul.f32 %v2843_v30, %v2843_v30 }
 0x76a   : > { %4137 = vmatmul.mubr.msk.f32.gmra.mrb[46].mxu1 %vm395_vm0, %v5796_v4 }
 0x76b   : > { %v2617_v56 = vadd.f32 %v2616_v34, %v2615_v11 }
 0x76d   : > { %v2618_v59 = vrot.slane %v2617_v56, 2 }
 0x76f   : > { %v2619_v21 = vadd.f32 %v2618_v59, %v2617_v56 }
 0x771   : > { %v4545_v47 = vpop.eup %4544  ;;  %v2620_v8 = vrot.slane %v2619_v21, 1 }
 0x772   : > { %v2857_v22 = vmul.f32 0.6931472, %v4545_v47 }
 0x773   : > { %v2621_v3 = vadd.f32 %v2620_v8, %v2619_v21 }
 0x774   : > { %v5920_v36 = vmul.f32 %v2862_v18, %v2857_v22 }
 0x775   : > { %v2624_v50 = vsub.f32 %v2621_v3, %v2623_v35 }
 0x776   : > { %v2955_v4 = vmul.f32 %v5920_v36, %v2843_v30 }
 0x777   : > { %v2625_v44 = vand.u32 2147483647, %v2624_v50 }
 0x778   : > { %v2956_v0 = vrot.slane %v2955_v4, 4 }
 0x779   : > { %v2626_v17 = vmax.f32 %v2625_v44, 1e-08 }
 0x77a   : > { %v2957_v22 = vadd.f32 %v2956_v0, %v2955_v4 }
 0x77b   : > { %4546 = vrsqrt.f32 %v2626_v17 }
 0x77c   : > { %v2958_v17 = vrot.slane %v2957_v22, 2 }
 0x785   : > { %v4547_v57 = vpop.eup %4546 }
 0x786   : > { %v2631_v51 = vrot.slane %v4547_v57, %v4873_v13 }
 0x788   : > { %v2632_v16 = vmul.f32 %v2631_v51, %v2611_v58  ;;  %v2633_v9 = vmul.f32 %v2631_v51, %v2610_v10 }
 0x78a   : > { %v5925_v33 = vadd.f32 %v2632_v16, %v5818_v1  ;;  %v5928_v24 = vadd.f32 %v2633_v9, %v5821_v43  ;;  %v3663_v43 = vadd.f32 -1.0, %v2942_v20  ;;  %v2959_v9 = vadd.f32 %v2958_v17, %v2957_v22 }
 0x829   : > { %v2938_v46 = vpop.f32.mrb[36].mxu1 }
 0x82a   : > { %v2944_v61 = vmax.f32 %v2938_v46, 1e-08  ;;  %v4119_v53 = vpop.f32.mrb[37].mxu1 }
 0x82c   : > { %4548 = vrcp.f32 %v2944_v61 }
 0x82d   : > { %v5930_v45 = vpop.f32.mrb[38].mxu1 }
 0x82e   : > { %v3168_v5 = vpop.f32.mrb[39].mxu1  ;;  %v3245_v37 = vmul.f32 %v5930_v45, %v5930_v45 }
 0x82f   : > { %v3676_v21 = vmul.f32 -1.442695, %v3168_v5 }
 0x831   : > { %v5932_v29 = vpop.f32.mrb[40].mxu1 }
 0x832   : > { %v5934_v12 = vpop.f32.mrb[41].mxu1  ;;  %v3247_v52 = vmul.f32 %v5932_v29, %v5932_v29 }
 0x833   : > { %v3246_v1 = vmul.f32 %v5934_v12, %v5934_v12 }
 0x835   : > { %v4291_v42 = vpack.c.bf16 %v3246_v1, %v3245_v37  ;;  %v5940_v63 = vpop.f32.mrb[42].mxu1 }
 0x836   : > { %v4549_v10 = vpop.eup %4548  ;;  %v5942_v27 = vpop.f32.mrb[43].mxu1  ;;  %v3249_v34 = vmul.f32 %v5940_v63, %v5940_v63 }
 0x837   : > { %v2946_v15 = vmul.f32 %v4549_v10, %v3663_v43  ;;  %v3248_v58 = vmul.f32 %v5942_v27, %v5942_v27  ;;  %4292 = vmatpush3.bf16.msra.mxu0 %v4291_v42  ;;  %v2960_v43 = vrot.slane %v2959_v9, 1 }
 0x838   : > { %4293 = vmatprep.subr.bf16.mxu0 %v4694_v2 }
 0x839   : > { %4550 = vrsqrt.f32 %v2946_v15  ;;  %v5949_v54 = vpop.f32.mrb[44].mxu1  ;;  %v4294_v48 = vpack.c.bf16 %v3248_v58, %v3247_v52  ;;  %vm2949_vm0 = vcmp.eq.f32.partialorder %v2946_v15, inf  ;;  %v2952_v57 = vand.u32 2147483648, %v2946_v15 }
 0x83a   : > { %v5951_v11 = vpop.f32.mrb[45].mxu1  ;;  %v3251_v18 = vmul.f32 %v5949_v54, %v5949_v54  ;;  %4552 = vpow2.f32 %v3676_v21  ;;  %vm2951_vm2 = vcmp.eq.f32.partialorder %v2946_v15, 0.0 }
 0x83b   : > { %v3250_v56 = vmul.f32 %v5951_v11, %v5951_v11  ;;  %4295 = vmatpush3.bf16.msra.mxu0 %v4294_v48 }
 0x83c   : > { %4296 = vmatprep.subr.bf16.mxu0 %v4694_v2 }
 0x83d   : > { %v4297_v25 = vpack.c.bf16 %v3250_v56, %v3249_v34  ;;  %v4138_v59 = vpop.f32.mrb[46].mxu1 }
 0x83e   : > { %v3225_v41 = vsub.f32 0.0, %v4138_v59  ;;  %v5958_v23 = vpop.f32.mrb[47].mxu1 }
 0x83f   : > { %v3252_v47 = vmul.f32 %v5958_v23, %v5958_v23  ;;  %4298 = vmatpush3.bf16.msra.mxu0 %v4297_v25 }
 0x840   : > { %v3226_v8 = vmax.f32 %v3225_v41, 1.0000001  ;;  %4299 = vmatprep.subr.bf16.mxu0 %v4694_v2 }
 0x841   : > { %v4300_v3 = vpack.c.bf16 %v3252_v47, %v3251_v18 }
 0x842   : > { %v3227_v35 = vmul.f32 %v3226_v8, %v3226_v8 }
 0x843   : > { %v4551_v30 = vpop.eup %4550  ;;  %4301 = vmatpush3.bf16.msra.mxu0 %v4300_v3  ;;  %v3678_v3 = vld [vmem:[%s5070_s8 + $0x7] ss:$0 sm:$0xff]  ;;  %s3539_s8 = sshll.u32 %s4835_s13, 4 }
 0x844   : > { %v2948_v50 = vmul.f32 %v4551_v30, %v2946_v15  ;;  %v3677_v44 = vadd.f32 -1.0, %v3227_v35  ;;  %v4553_v5 = vpop.eup %4552  ;;  %s266_s7 = scalar_lea.vmem [#allocation5], %s3539_s8 }
 0x845   : > { %v3220_v48 = vadd.f32 1.0, %v4553_v5  ;;  %s3434_s25 = sshll.u32 %s266_s7, 4  ;;  %s6017_s25 = int_to_ptr.vmem [resolvable:$true] %s3434_s25 }
 0x846   : > { %v2950_v51 = vsel %vm2949_vm0, %v2946_v15, %v2948_v50  ;;  %4554 = vrsqrt.f32 %v3677_v44  ;;  %4156 = vmatmul.mubr.msk.f32.vlgmr.msra.gmra.mrb[46].mxu0 %vm582_vm12, %v5036_v38  ;;  %vm3231_vm12 = vcmp.eq.f32.partialorder %v3677_v44, inf  ;;  %vm3233_vm4 = vcmp.eq.f32.partialorder %v3677_v44, 0.0  ;;  %s4622_s17 = scalar_lea.vmem %s6017_s25, 256  ;;  %p4629_p9 = scmp.lt.s32.totalorder %s6017_s25, %s4627_s26 }
 0x847   : > { %v2953_v16 = vsel %vm2951_vm2, %v2952_v57, %v2950_v51  ;;  %4556 = vrcp.f32 %v3220_v48  ;;  %p4623_p6 = scmp.ne.s32.totalorder %s6017_s25, %s4622_s17  ;;  %p4630_p1 = scmp.lt.s32.totalorder %s4628_s15, %s4622_s17 }
 0x848   : > { %v2954_v4 = vmul.f32 %v2953_v16, %v5920_v36 }
 0x849   : > { %p4624_p12 = pnand %p4623_p6, %p6080_p11  ;;  %p4631_p3 = por %p4630_p1, %p4629_p9 }
 0x84a   : > { %v2965_v2 = vrot.slane %v2954_v4, %v4873_v13  ;;  %v2971_v46 = vrot.slane %v2954_v4, %v5148_v39  ;;  %v2979_v61 = vrot.slane %v2954_v4, %v5151_v40  ;;  %v2987_v53 = vrot.slane %v2954_v4, %v5156_v49 }
 0x84b   : > { %p4625_p4 = pneg %p4624_p12 }
 0x84c   : > { %v2966_v20 = vmul.f32 %v5827_v19, %v2965_v2  ;;  %v2967_v37 = vmul.f32 %v2965_v2, %v5833_v31  ;;  %v2972_v1 = vmul.f32 %v5831_v26, %v2971_v46  ;;  %v2973_v38 = vmul.f32 %v2971_v46, %v5841_v6 }
 0x84d   : > { %v2980_v36 = vmul.f32 %v5839_v32, %v2979_v61  ;;  %v2981_v42 = vmul.f32 %v2979_v61, %v5851_v28  ;;  %v2988_v10 = vmul.f32 %v5849_v14, %v2987_v53  ;;  %v2989_v52 = vmul.f32 %v2987_v53, %v5860_v55  ;;  %p4632_p5 = pnand %p4631_p3, %p4625_p4 }
 0x84e   : > { %v2974_v15 = vadd.f32 %v2972_v1, %v2966_v20  ;;  %v2975_v58 = vadd.f32 %v2973_v38, %v2967_v37  ;;  %v2961_v31 = vadd.f32 %v2960_v43, %v2959_v9  ;;  %v3234_v26 = vand.u32 2147483648, %v3677_v44 }
 0x850   : > { %v4555_v34 = vpop.eup %4554  ;;  %v2982_v19 = vadd.f32 %v2980_v36, %v2974_v15  ;;  %v2983_v56 = vadd.f32 %v2981_v42, %v2975_v58 }
 0x851   : > { %v3230_v0 = vmul.f32 %v4555_v34, %v3677_v44  ;;  %v4557_v22 = vpop.eup %4556 }
 0x852   : > { %v2990_v6 = vadd.f32 %v2988_v10, %v2982_v19  ;;  %v2991_v25 = vadd.f32 %v2989_v52, %v2983_v56  ;;  %v3223_v17 = vmul.f32 %v4557_v22, %v5081_v62 }
 0x853   : > { %v3232_v32 = vsel %vm3231_vm12, %v3677_v44, %v3230_v0  ;;  %v3243_v44 = vmul.f32 %v3678_v3, %v5078_v60 }
 0x854   : > { %v3235_v28 = vsel %vm3233_vm4, %v3234_v26, %v3232_v32  ;;  %v2992_v14 = vsel %vm290_vm3, %v2961_v31, %v2990_v6  ;;  %v2995_v59 = vmul.f32 %v2991_v25, %v2991_v25 }
 0x855   : > { %v3236_v55 = vadd.f32 %v3235_v28, %v3226_v8  ;;  %v2994_v21 = vmul.f32 %v2992_v14, %v2992_v14  ;;  %v3003_v50 = vmul.f32 2.0, %v2992_v14  ;;  %v3224_v8 = vadd.f32 1.0001, %v3223_v17 }
 0x857   : > { %4558 = vlog2.f32 %v3236_v55  ;;  %v2996_v41 = vadd.f32 %v2995_v59, %v2994_v21  ;;  %v3004_v9 = vmul.f32 %v3003_v50, %v2992_v14  ;;  %v3323_v10 = vmul.f32 %v3224_v8, %v3224_v8 }
 0x859   : > { %v2997_v18 = vrot.slane %v2996_v41, 4  ;;  %v3680_v15 = vadd.f32 -1.0, %v3323_v10 }
 0x85b   : > { %v2998_v47 = vadd.f32 %v2997_v18, %v2996_v41 }
 0x85d   : > { %v2999_v35 = vrot.slane %v2998_v47, 2 }
 0x85f   : > { %v3000_v30 = vadd.f32 %v2999_v35, %v2998_v47 }
 0x861   : > { %v4559_v57 = vpop.eup %4558  ;;  %v3001_v51 = vrot.slane %v3000_v30, 1 }
 0x862   : > { %v3238_v16 = vmul.f32 0.6931472, %v4559_v57 }
 0x863   : > { %v3002_v4 = vadd.f32 %v3001_v51, %v3000_v30 }
 0x864   : > { %v3244_v2 = vmul.f32 %v3243_v44, %v3238_v16 }
 0x865   : > { %v3005_v46 = vsub.f32 %v3002_v4, %v3004_v9 }
 0x866   : > { %v3336_v61 = vmul.f32 %v3244_v2, %v3224_v8 }
 0x867   : > { %v3006_v53 = vand.u32 2147483647, %v3005_v46 }
 0x868   : > { %v3337_v48 = vrot.slane %v3336_v61, 4 }
 0x869   : > { %v3007_v5 = vmax.f32 %v3006_v53, 1e-08 }
 0x86a   : > { %v3338_v34 = vadd.f32 %v3337_v48, %v3336_v61 }
 0x86b   : > { %4560 = vrsqrt.f32 %v3007_v5 }
 0x86c   : > { %v3339_v31 = vrot.slane %v3338_v34, 2 }
 0x86e   : > { %v3340_v6 = vadd.f32 %v3339_v31, %v3338_v34 }
 0x870   : > { %v3341_v3 = vrot.slane %v3340_v6, 1 }
 0x875   : > { %v4561_v20 = vpop.eup %4560 }
 0x876   : > { %v3012_v37 = vrot.slane %v4561_v20, %v4873_v13 }
 0x878   : > { %v3013_v1 = vmul.f32 %v3012_v37, %v2992_v14  ;;  %v3014_v38 = vmul.f32 %v3012_v37, %v2991_v25 }
 0x87a   : > { %v5987_v62 = vadd.f32 %v3013_v1, %v5925_v33  ;;  %v5990_v60 = vadd.f32 %v3014_v38, %v5928_v24 }
 0x919   : > { %v3319_v43 = vpop.f32.mrb[46].mxu0 }
 0x91a   : > { %v3325_v36 = vmax.f32 %v3319_v43, 1e-08  ;;  %v4157_v42 = vpop.f32.mrb[47].mxu0 }
 0x91c   : > { %4562 = vrcp.f32 %v3325_v36 }
 0x926   : > { %v4563_v58 = vpop.eup %4562 }
 0x927   : > { %v3327_v52 = vmul.f32 %v4563_v58, %v3680_v15 }
 0x929   : > { %4564 = vrsqrt.f32 %v3327_v52  ;;  %vm3330_vm6 = vcmp.eq.f32.partialorder %v3327_v52, inf  ;;  %v3333_v33 = vand.u32 2147483648, %v3327_v52  ;;  %vm3332_vm7 = vcmp.eq.f32.partialorder %v3327_v52, 0.0 }
 0x933   : > { %v4565_v19 = vpop.eup %4564 }
 0x934   : > { %v3329_v56 = vmul.f32 %v4565_v19, %v3327_v52 }
 0x936   : > { %v3331_v0 = vsel %vm3330_vm6, %v3327_v52, %v3329_v56 }
 0x937   : > { %v3334_v24 = vsel %vm3332_vm7, %v3333_v33, %v3331_v0 }
 0x938   : > { %v3335_v26 = vmul.f32 %v3334_v24, %v3244_v2 }
 0x93a   : > { %v3346_v25 = vrot.slane %v3335_v26, %v4873_v13  ;;  %v3352_v32 = vrot.slane %v3335_v26, %v5148_v39  ;;  %v3360_v28 = vrot.slane %v3335_v26, %v5151_v40  ;;  %v3368_v14 = vrot.slane %v3335_v26, %v5156_v49 }
 0x93c   : > { %v3347_v59 = vmul.f32 %v5930_v45, %v3346_v25  ;;  %v3348_v55 = vmul.f32 %v3346_v25, %v5934_v12  ;;  %v3353_v21 = vmul.f32 %v5932_v29, %v3352_v32  ;;  %v3354_v41 = vmul.f32 %v3352_v32, %v5942_v27 }
 0x93d   : > { %v3361_v18 = vmul.f32 %v5940_v63, %v3360_v28  ;;  %v3362_v47 = vmul.f32 %v3360_v28, %v5951_v11  ;;  %v3369_v22 = vmul.f32 %v5949_v54, %v3368_v14  ;;  %v3370_v39 = vmul.f32 %v3368_v14, %v5958_v23 }
 0x93e   : > { %v3355_v40 = vadd.f32 %v3353_v21, %v3347_v59  ;;  %v3356_v35 = vadd.f32 %v3354_v41, %v3348_v55  ;;  %v3342_v45 = vadd.f32 %v3341_v3, %v3340_v6 }
 0x940   : > { %v3363_v49 = vadd.f32 %v3361_v18, %v3355_v40  ;;  %v3364_v30 = vadd.f32 %v3362_v47, %v3356_v35 }
 0x942   : > { %v3371_v50 = vadd.f32 %v3369_v22, %v3363_v49  ;;  %v3372_v12 = vadd.f32 %v3370_v39, %v3364_v30 }
 0x944   : > { %v3373_v29 = vsel %vm290_vm3, %v3342_v45, %v3371_v50  ;;  %v3376_v27 = vmul.f32 %v3372_v12, %v3372_v12 }
 0x945   : > { %v3375_v17 = vmul.f32 %v3373_v29, %v3373_v29  ;;  %v3384_v51 = vmul.f32 2.0, %v3373_v29 }
 0x947   : > { %v3377_v63 = vadd.f32 %v3376_v27, %v3375_v17  ;;  %v3385_v4 = vmul.f32 %v3384_v51, %v3373_v29 }
 0x949   : > { %v3378_v44 = vrot.slane %v3377_v63, 4 }
 0x94b   : > { %v3379_v11 = vadd.f32 %v3378_v44, %v3377_v63 }
 0x94d   : > { %v3380_v57 = vrot.slane %v3379_v11, 2 }
 0x94f   : > { %v3381_v54 = vadd.f32 %v3380_v57, %v3379_v11 }
 0x951   : > { %v3382_v23 = vrot.slane %v3381_v54, 1 }
 0x953   : > { %v3383_v16 = vadd.f32 %v3382_v23, %v3381_v54 }
 0x955   : > { %v3386_v9 = vsub.f32 %v3383_v16, %v3385_v4 }
 0x957   : > { %v3387_v8 = vand.u32 2147483647, %v3386_v9 }
 0x959   : > { %v3388_v2 = vmax.f32 %v3387_v8, 1e-08 }
 0x95b   : > { %4566 = vrsqrt.f32 %v3388_v2 }
 0x965   : > { %v4567_v46 = vpop.eup %4566 }
 0x966   : > { %v3393_v61 = vrot.slane %v4567_v46, %v4873_v13 }
 0x968   : > { %v3394_v7 = vmul.f32 %v3393_v61, %v3373_v29  ;;  %v3395_v53 = vmul.f32 %v3393_v61, %v3372_v12 }
 0x96a   : > { %v3396_v5 = vadd.f32 %v3394_v7, %v5987_v62  ;;  %v3397_v20 = vadd.f32 %v3395_v53, %v5990_v60 }
 0x96c   : > { %v3398_v37 = vmul.f32 %v3396_v5, %v3396_v5  ;;  %v3399_v1 = vmul.f32 %v3397_v20, %v3397_v20  ;;  %v3407_v15 = vmul.f32 2.0, %v3396_v5 }
 0x96e   : > { %v3400_v38 = vadd.f32 %v3399_v1, %v3398_v37  ;;  %v3408_v48 = vmul.f32 %v3407_v15, %v3396_v5 }
 0x970   : > { %v3401_v43 = vrot.slane %v3400_v38, 4 }
 0x972   : > { %v3402_v36 = vadd.f32 %v3401_v43, %v3400_v38 }
 0x974   : > { %v3403_v42 = vrot.slane %v3402_v36, 2 }
 0x976   : > { %v3404_v10 = vadd.f32 %v3403_v42, %v3402_v36 }
 0x978   : > { %v3405_v58 = vrot.slane %v3404_v10, 1 }
 0x97a   : > { %v3406_v52 = vadd.f32 %v3405_v58, %v3404_v10 }
 0x97c   : > { %v3409_v34 = vsub.f32 %v3406_v52, %v3408_v48 }
 0x97e   : > { %v3410_v19 = vand.u32 2147483647, %v3409_v34 }
 0x980   : > { %v3411_v56 = vmax.f32 %v3410_v19, 1e-08 }
 0x982   : > { %4568 = vrsqrt.f32 %v3411_v56 }
 0x98c   : > { %v4569_v62 = vpop.eup %4568 }
 0x98d   : > { %v3416_v60 = vrot.slane %v4569_v62, %v4873_v13 }
 0x98f   : > { %v3417_v31 = vmul.f32 %v3416_v60, %v3396_v5  ;;  %v3418_v33 = vmul.f32 %v3416_v60, %v3397_v20 }
 0x991   : > { %3419 = vst [vmem:[%s266_s7] sm:$0xff] %v3417_v31  ;;  %3420 = vst [vmem:[%s266_s7 + $0x8] sm:$0xff] %v3418_v33 }
 0x992   : > { %4635 = shalt.err (!%p4632_p5)
}
 0x993   : > { %s4636_s16 = scalar_lea.hbm %s6015_s11, 256  ;;  %s4640_s12 = scalar_lea.hbm %s6065_s5, 1024 }
 0x994   : > { %p4637_p7 = scmp.ne.s32.totalorder %s6015_s11, %s4636_s16  ;;  %p4641_p0 = scmp.lt.u32.totalorder %s6015_s11, %s6065_s5 }
 0x995   : > { %p4642_p2 = scmp.lt.u32.totalorder %s4640_s12, %s4636_s16  ;;  %p4644_p6 = scmp.lt.u32.totalorder %s4636_s16, %s6015_s11 }
 0x996   : > { %p4638_p8 = pnand %p4637_p7, %p6080_p11 }
 0x997   : > { %p4643_p10 = por %p4642_p2, %p4641_p0 }
 0x998   : > { %p4639_p13 = pneg %p4638_p8 }
 0x999   : > { %p4645_p12 = por %p4644_p6, %p4643_p10 }
 0x99b   : > { %p4646_p4 = pnand %p4645_p12, %p4639_p13 }
 0x99d   : > { %4649 = shalt.err (!%p4646_p4)
}
 0x99e   : > { %s4698_s7 = smov 128   ;;  %s4699_s9 = smov 512  }
 0x99f   : > { %s4700_s10 = smov 8  }
 0x9a0   : > { %4304 = dma.vmem_to_hbm [thread:$0]  (%p6080_p11), %s6017_s25, 256, %s6015_s11, %s3422_s22, %s4698_s7, %s4699_s9, %s4700_s10  }
 0x9a1 PF: > { %p4315_p9 = scmp.ge.s32.totalorder %s4688_s21, 2  ;;  %s3449_s17 = sand.u32 1, %s4676_s18  }
 0x9a2   : > { %p6081_p1 = scmp.ne.s32.totalorder %s6070_s6, 0  ;;  %s3450_s23 = scalar_lea.sflag [#allocation4], %s3449_s17 }
 0x9a4   : > { %p4311_p3 = pnand %p4315_p9, %p6081_p1 }
 0x9a6   : > { %4671 = dma.done.wait (!%p4311_p3), %s3450_s23, 256  }
 0x9a7   : > { %4673 = vsyncadd (!%p4311_p3), %s3450_s23, 4294967040  ;;  %p18_p5 = scmp.ge.s32.totalorder %s4756_s24, 6   ;;  %s6082_s18 = smov %s4680_s19 }
 0x9a8   : > { %s6083_s19 = smov %s4684_s20  ;;  %s6084_s20 = smov %s4768_s27 }
 0x9a9   : > { %s6085_s21 = smov %s4756_s24  ;;  %20 = sbr.rel (!%p18_p5) target bundleno = 5 (0x5), region = 91 }
 0x9b0   :  { %3455 = vsyncpa [#allocation3], 1 }
 0x9b1   :  { %3457 = vsyncpa [#allocation3 + $0x1], 1 }
 0x9b2   :  { %3458 = vsyncpa [#allocation4], 1 }
 0x9b3   :  { %3460 = vsyncpa [#allocation4 + $0x1], 1 }

</bundles_post_ra>
